<compile_context>
chip_gen: v7x
topology: tpu7x:2x2x1
jax: 0.10.0
libtpu: 0.0.40
codegen_flags: <defaults>
</compile_context>

<pallas_src>
import functools
import math

import jax
import jax.numpy as jnp
from jax.experimental import pallas as pl
from jax.experimental.pallas import tpu as pltpu

LN_EPS = 1e-5        # PyTorch LayerNorm default eps
NEG_INF = -1e30      # additive mask for padded attention keys


def _layer_norm(x, w, b):
    mu = jnp.mean(x, axis=-1, keepdims=True)
    var = jnp.mean((x - mu) ** 2, axis=-1, keepdims=True)
    return (x - mu) * jax.lax.rsqrt(var + LN_EPS) * w + b


# ---------------------------------------------------------------------------
# Fused ViT kernel.  Grid = (batch_chunk, layer, ff_chunk).
#   ff_chunk == 0      : attention block + LN2 prep (+ stream init at layer 0)
#   every ff_chunk     : one ff_dim tile of the FFN accumulated into the stream
#   last layer & chunk : final LayerNorm + classifier on the CLS tokens
# ---------------------------------------------------------------------------
def vit_kernel(emb_ref,
               ln1w_ref, ln1b_ref, wqkv_ref, bqkv_ref, wout_ref, bout_ref,
               ln2w_ref, ln2b_ref, w1_ref, b1_ref, w2_ref, b2_ref,
               lnf_w_ref, lnf_b_ref, ow_ref, ob_ref,
               o_ref,
               acc_ref, attn_ref, h2_ref,
               *, nhead, n_tokens, cb, npad):
    layer = pl.program_id(1)
    ffc = pl.program_id(2)
    rows, d = acc_ref.shape          # rows = cb * npad
    hd = d // nhead

    # ---- attention block (pre-norm), once per (chunk, layer) --------------
    @pl.when(ffc == 0)
    def _attention():
        @pl.when(layer == 0)
        def _init():
            # embedded patches + CLS + pos, computed in XLA outside the kernel
            acc_ref[...] = emb_ref[...].reshape(rows, d)

        x = acc_ref[...]                                            # (rows, D) f32
        h = _layer_norm(x, ln1w_ref[0], ln1b_ref[0]).astype(jnp.bfloat16)
        # 1/sqrt(hd) is pre-folded into the q columns of W_qkv / b_qkv.
        qkv = (jnp.dot(h, wqkv_ref[0], preferred_element_type=jnp.float32)
               + bqkv_ref[0]).astype(jnp.bfloat16)                  # (rows, 3D)
        qkv3 = qkv.reshape(cb, npad, 3 * d)                         # per-image view

        # key-validity mask built in-kernel (no (rows, rows) bias input)
        kid = jax.lax.broadcasted_iota(jnp.int32, (1, 1, npad), 2)
        kmask = jnp.where(kid < n_tokens, 0.0, NEG_INF)

        # TODO(synk): fold the per-head loop into a single (B, nhead)-batched
        # contraction once a head-major QKV weight layout is plumbed through.
        for head in range(nhead):
            q = qkv3[:, :, head * hd:(head + 1) * hd]               # (cb,npad,hd)
            k = qkv3[:, :, d + head * hd:d + (head + 1) * hd]
            v = qkv3[:, :, 2 * d + head * hd:2 * d + (head + 1) * hd]
            s = jnp.einsum('bqd,bkd->bqk', q, k,
                           preferred_element_type=jnp.float32)      # (cb,npad,npad)
            s = s + kmask
            s = s - jnp.max(s, axis=-1, keepdims=True)
            e = jnp.exp(s)
            p = (e * pl.reciprocal(jnp.sum(e, axis=-1, keepdims=True),
                                   approx=True)).astype(jnp.bfloat16)
            ctx = jnp.einsum('bqk,bkd->bqd', p, v,
                             preferred_element_type=jnp.float32)    # (cb,npad,hd)
            attn_ref[:, head * hd:(head + 1) * hd] = (
                ctx.reshape(rows, hd).astype(jnp.bfloat16))

        # ONE out-projection matmul over the concatenated (bf16) head outputs
        attn = (jnp.dot(attn_ref[...], wout_ref[0],
                        preferred_element_type=jnp.float32) + bout_ref[0])
        x = x + attn                              # dropout1 == identity (eval)
        h2_ref[...] = _layer_norm(x, ln2w_ref[0], ln2b_ref[0]).astype(jnp.bfloat16)
        acc_ref[...] = x + b2_ref[0]              # fold FFN's 2nd bias in once

    # ---- FFN, tiled over ff_dim: each grid step adds one chunk -------------
    f = (jnp.dot(h2_ref[...], w1_ref[0], preferred_element_type=jnp.float32)
         + b1_ref[0])
    f = jnp.maximum(f, 0.0).astype(jnp.bfloat16)                    # ReLU
    acc_ref[...] += jnp.dot(f, w2_ref[0], preferred_element_type=jnp.float32)
    # dropout2 == identity (eval)

    # ---- final LayerNorm + classifier on the CLS tokens ---------------------
    @pl.when(jnp.logical_and(layer == pl.num_programs(1) - 1,
                             ffc == pl.num_programs(2) - 1))
    def _head():
        x3 = acc_ref[...].reshape(cb, npad, d)
        cls_tok = x3[:, 0:1, :].reshape(cb, d)                      # token 0 = CLS
        hf = _layer_norm(cls_tok, lnf_w_ref[...], lnf_b_ref[...])
        o_ref[0] = (jnp.dot(hf.astype(jnp.bfloat16), ow_ref[...],
                            preferred_element_type=jnp.float32) + ob_ref[...])


# ---------------------------------------------------------------------------
# Wrapper
# ---------------------------------------------------------------------------
def extract_patches(x, p):
    b, c, h, w = x.shape
    gh, gw = h // p, w // p
    x = x.reshape(b, c, gh, p, gw, p)
    x = x.transpose(0, 2, 4, 1, 3, 5)           # (B, gh, gw, C, p, p)
    return x.reshape(b, gh * gw, c * p * p)     # matches Conv2d (c, kh, kw) order


def _vmem_limit(chunk_b, npad, d, fc, classes):
    f32, bf16 = 4, 2
    rows = chunk_b * npad
    weights = 2 * bf16 * (d * 3 * d + d * d + d * fc + fc * d)   # dbl-buffered bf16
    biases = 2 * f32 * (12 * d + fc + classes) + 2 * bf16 * d * classes
    embed = 2 * f32 * chunk_b * npad * d
    scratch = rows * d * (f32 + 2 * bf16)
    interm = (rows * 3 * d * (f32 + bf16)          # qkv
              + 3 * chunk_b * npad * npad * f32    # live score slabs
              + rows * fc * (f32 + bf16)           # FFN chunk intermediate
              + 6 * rows * d * f32)                # residual temporaries
    need = weights + biases + embed + scratch + interm
    return int(min(max(2 * need, 32 * 1024 * 1024), 120 * 1024 * 1024))


def vit_forward(x, params, *, patch, nhead, chunk_b=1, ff_chunk=512):
    bsz = x.shape[0]
    d = params["patch_w"].shape[1]
    classes = params["out_w"].shape[1]
    num_layers = len(params["layers"])
    ff_dim = params["layers"][0]["w1"].shape[1]

    pat = extract_patches(x, patch)                   # (B, n, pd)
    n = pat.shape[1]
    tokens = n + 1
    npad = ((tokens + 127) // 128) * 128              # lane-dense score matrices

    assert bsz % chunk_b == 0
    n_chunks = bsz // chunk_b
    fc = ff_chunk if (ff_dim % ff_chunk == 0 and ff_chunk <= ff_dim) else ff_dim
    n_ff = ff_dim // fc

    # Patch embedding + CLS token + positional embeddings in plain XLA; only
    # the embedded (B, npad, D) stream enters the fused kernel (layer-0 init).
    emb = jnp.einsum('bnp,pd->bnd', pat.astype(jnp.float32), params["patch_w"])
    emb = emb + params["patch_b"]
    cls = jnp.broadcast_to(params["cls"].reshape(1, 1, d), (bsz, 1, d))
    tok = jnp.concatenate([cls, emb], axis=1) + params["pos"][None, :tokens, :]
    stream0 = jnp.pad(tok, ((0, 0), (0, npad - tokens), (0, 0)))   # (B, npad, D)

    bf16 = jnp.bfloat16
    scale = 1.0 / math.sqrt(d // nhead)

    def stack(key, dtype=jnp.float32):
        return jnp.stack([lp[key] for lp in params["layers"]]).astype(dtype)

    # fold the 1/sqrt(hd) attention scale into the q columns of W_qkv / b_qkv
    wqkv_all = jnp.stack([
        jnp.concatenate([lp["wqkv"][:, :d] * scale, lp["wqkv"][:, d:]], axis=1)
        for lp in params["layers"]]).astype(bf16)
    bqkv_all = jnp.stack([
        jnp.concatenate([lp["bqkv"][:, :d] * scale, lp["bqkv"][:, d:]], axis=1)
        for lp in params["layers"]])

    layer_args = [
        stack("ln1w"), stack("ln1b"), wqkv_all, bqkv_all,
        stack("wout", bf16), stack("bout"),
        stack("ln2w"), stack("ln2b"),
        stack("w1", bf16), stack("b1"), stack("w2", bf16), stack("b2"),
    ]
    head_args = [params["ln_w"], params["ln_b"],
                 params["out_w"].astype(bf16), params["out_b"]]

    def const_spec(a):
        nd = a.ndim
        return pl.BlockSpec(a.shape, lambda c, l, f, nd=nd: (0,) * nd)

    def layer_spec(a):
        nd = a.ndim
        return pl.BlockSpec((1,) + a.shape[1:],
                            lambda c, l, f, nd=nd: (l,) + (0,) * (nd - 1))

    layer_specs = [
        layer_spec(layer_args[0]),                              # ln1w
        layer_spec(layer_args[1]),                              # ln1b
        layer_spec(layer_args[2]),                              # wqkv
        layer_spec(layer_args[3]),                              # bqkv
        layer_spec(layer_args[4]),                              # wout
        layer_spec(layer_args[5]),                              # bout
        layer_spec(layer_args[6]),                              # ln2w
        layer_spec(layer_args[7]),                              # ln2b
        pl.BlockSpec((1, d, fc), lambda c, l, f: (l, 0, f)),    # w1 (ff-chunked)
        pl.BlockSpec((1, 1, fc), lambda c, l, f: (l, 0, f)),    # b1 (ff-chunked)
        pl.BlockSpec((1, fc, d), lambda c, l, f: (l, f, 0)),    # w2 (ff-chunked)
        layer_spec(layer_args[11]),                             # b2
    ]
    in_specs = ([pl.BlockSpec((chunk_b, npad, d), lambda c, l, f: (c, 0, 0))]
                + layer_specs
                + [const_spec(a) for a in head_args])

    rows_chunk = chunk_b * npad
    kernel = functools.partial(vit_kernel, nhead=nhead, n_tokens=tokens,
                               cb=chunk_b, npad=npad)
    out = pl.pallas_call(
        kernel,
        out_shape=jax.ShapeDtypeStruct((n_chunks, chunk_b, classes), jnp.float32),
        grid=(n_chunks, num_layers, n_ff),
        in_specs=in_specs,
        out_specs=pl.BlockSpec((1, chunk_b, classes), lambda c, l, f: (c, 0, 0)),
        scratch_shapes=[
            pltpu.VMEM((rows_chunk, d), jnp.float32),    # residual stream
            pltpu.VMEM((rows_chunk, d), jnp.bfloat16),   # concat head contexts
            pltpu.VMEM((rows_chunk, d), jnp.bfloat16),   # LN2(x) for FFN chunks
        ],
        compiler_params=pltpu.CompilerParams(
            dimension_semantics=("parallel", "arbitrary", "arbitrary"),
            vmem_limit_bytes=_vmem_limit(chunk_b, npad, d, fc, classes),
        ),
    )(stream0, *layer_args, *head_args)
    return out.reshape(bsz, classes)


# ---------------------------------------------------------------------------
# Parameter init (matches PyTorch module structure; weights in x @ W layout)
# ---------------------------------------------------------------------------
def init_vit_params(key, *, in_ch, class_num, patch, image, dim, nhead,
                    ff_dim, num_layers):
    del nhead
    pd = patch * patch * in_ch
    n = (image // patch) ** 2
    keys = jax.random.split(key, 4 + num_layers)

    def nrm(k, shape, scale=0.02):
        return scale * jax.random.normal(k, shape, jnp.float32)

    params = dict(
        patch_w=nrm(keys[0], (pd, dim)),
        patch_b=jnp.zeros((1, dim), jnp.float32),
        cls=jax.random.normal(keys[1], (1, 1, dim), jnp.float32),
        pos=jax.random.normal(keys[2], (n + 1, dim), jnp.float32),
        ln_w=jnp.ones((1, dim), jnp.float32),
        ln_b=jnp.zeros((1, dim), jnp.float32),
        out_w=nrm(keys[3], (dim, class_num)),
        out_b=jnp.zeros((1, class_num), jnp.float32),
        layers=[],
    )
    for i in range(num_layers):
        lk = jax.random.split(keys[4 + i], 4)
        params["layers"].append(dict(
            ln1w=jnp.ones((1, dim), jnp.float32),
            ln1b=jnp.zeros((1, dim), jnp.float32),
            wqkv=nrm(lk[0], (dim, 3 * dim)),
            bqkv=jnp.zeros((1, 3 * dim), jnp.float32),
            wout=nrm(lk[1], (dim, dim)),
            bout=jnp.zeros((1, dim), jnp.float32),
            ln2w=jnp.ones((1, dim), jnp.float32),
            ln2b=jnp.zeros((1, dim), jnp.float32),
            w1=nrm(lk[2], (dim, ff_dim)),
            b1=jnp.zeros((1, ff_dim), jnp.float32),
            w2=nrm(lk[3], (ff_dim, dim)),
            b2=jnp.zeros((1, dim), jnp.float32),
        ))
    return params


if __name__ == "__main__":
    # Small shapes consistent with the module: 16x16 image, 4 channels, 4x4
    # patches -> 16 patches + CLS = 17 tokens (padded to 128 per image for
    # lane-dense scores), dim=32, 4 heads, 2 layers, 16 classes, FF kept at
    # the nn.TransformerEncoderLayer default (2048, tiled in chunks of 512).
    # NOTE: toy dims (D=32, hd=8) heavily under-use the MXU; keep D / 3D / FF
    # multiples of 128 for production configurations.
    B, C, IMG, P = 2, 4, 16, 4
    DIM, NHEAD, FF, LAYERS, CLASSES = 32, 4, 2048, 2, 16

    key = jax.random.PRNGKey(0)
    pkey, xkey = jax.random.split(key)
    params = init_vit_params(pkey, in_ch=C, class_num=CLASSES, patch=P,
                             image=IMG, dim=DIM, nhead=NHEAD, ff_dim=FF,
                             num_layers=LAYERS)
    x = jax.random.normal(xkey, (B, C, IMG, IMG), jnp.float32)

    # TODO(synk): dropout (p=0.5) is modeled as identity (eval/inference mode).
    logits = vit_forward(x, params, patch=P, nhead=NHEAD)
    jax.block_until_ready(logits)
    assert logits.shape == (B, CLASSES)
    print("KERNEL_OK")
</pallas_src>

<mosaic_0001>
module attributes {stable_mosaic.version = 11 : i64} {
  func.func @vit_kernel(%arg0: i32, %arg1: i32, %arg2: i32, %arg3: memref<1x128x32xf32, #tpu.memory_space<vmem>>, %arg4: memref<1x1x32xf32, #tpu.memory_space<vmem>>, %arg5: memref<1x1x32xf32, #tpu.memory_space<vmem>>, %arg6: memref<1x32x96xbf16, #tpu.memory_space<vmem>>, %arg7: memref<1x1x96xf32, #tpu.memory_space<vmem>>, %arg8: memref<1x32x32xbf16, #tpu.memory_space<vmem>>, %arg9: memref<1x1x32xf32, #tpu.memory_space<vmem>>, %arg10: memref<1x1x32xf32, #tpu.memory_space<vmem>>, %arg11: memref<1x1x32xf32, #tpu.memory_space<vmem>>, %arg12: memref<1x32x512xbf16, #tpu.memory_space<vmem>>, %arg13: memref<1x1x512xf32, #tpu.memory_space<vmem>>, %arg14: memref<1x512x32xbf16, #tpu.memory_space<vmem>>, %arg15: memref<1x1x32xf32, #tpu.memory_space<vmem>>, %arg16: memref<1x32xf32, #tpu.memory_space<vmem>>, %arg17: memref<1x32xf32, #tpu.memory_space<vmem>>, %arg18: memref<32x16xbf16, #tpu.memory_space<vmem>>, %arg19: memref<1x16xf32, #tpu.memory_space<vmem>>, %arg20: memref<1x1x16xf32, #tpu.memory_space<vmem>>, %arg21: memref<128x32xf32, #tpu.memory_space<vmem>>, %arg22: memref<128x32xbf16, #tpu.memory_space<vmem>>, %arg23: memref<128x32xbf16, #tpu.memory_space<vmem>>) attributes {dimension_semantics = [#tpu.dimension_semantics<parallel>, #tpu.dimension_semantics<arbitrary>, #tpu.dimension_semantics<arbitrary>], iteration_bounds = array<i64: 2, 2, 4>, scalar_prefetch = 0 : i64, scratch_operands = 3 : i64, tpu.core_type = #tpu.core_type<tc>, window_params = [{transform_indices = @transform_0, window_bounds = array<i64: 1, 128, 32>}, {transform_indices = @transform_1, window_bounds = array<i64: 1, 1, 32>}, {transform_indices = @transform_2, window_bounds = array<i64: 1, 1, 32>}, {transform_indices = @transform_3, window_bounds = array<i64: 1, 32, 96>}, {transform_indices = @transform_4, window_bounds = array<i64: 1, 1, 96>}, {transform_indices = @transform_5, window_bounds = array<i64: 1, 32, 32>}, {transform_indices = @transform_6, window_bounds = array<i64: 1, 1, 32>}, {transform_indices = @transform_7, window_bounds = array<i64: 1, 1, 32>}, {transform_indices = @transform_8, window_bounds = array<i64: 1, 1, 32>}, {transform_indices = @transform_9, window_bounds = array<i64: 1, 32, 512>}, {transform_indices = @transform_10, window_bounds = array<i64: 1, 1, 512>}, {transform_indices = @transform_11, window_bounds = array<i64: 1, 512, 32>}, {transform_indices = @transform_12, window_bounds = array<i64: 1, 1, 32>}, {pipeline_mode = #tpu.pipeline_mode<synchronous>, transform_indices = @transform_13, window_bounds = array<i64: 1, 32>}, {pipeline_mode = #tpu.pipeline_mode<synchronous>, transform_indices = @transform_14, window_bounds = array<i64: 1, 32>}, {pipeline_mode = #tpu.pipeline_mode<synchronous>, transform_indices = @transform_15, window_bounds = array<i64: 32, 16>}, {pipeline_mode = #tpu.pipeline_mode<synchronous>, transform_indices = @transform_16, window_bounds = array<i64: 1, 16>}, {transform_indices = @transform_17, window_bounds = array<i64: 1, 1, 16>}]} {
    %c0_i32 = arith.constant 0 : i32
    %0 = arith.cmpi eq, %arg2, %c0_i32 : i32
    %1 = arith.extui %0 : i1 to i32
    %c0_i32_0 = arith.constant 0 : i32
    %2 = arith.cmpi ne, %1, %c0_i32_0 : i32
    scf.if %2 {
      %c0_i32_18 = arith.constant 0 : i32
      %25 = arith.cmpi eq, %arg1, %c0_i32_18 : i32
      %26 = arith.extui %25 : i1 to i32
      %c0_i32_19 = arith.constant 0 : i32
      %27 = arith.cmpi ne, %26, %c0_i32_19 : i32
      scf.if %27 {
        %c0_90 = arith.constant 0 : index
        %c0_91 = arith.constant 0 : index
        %c0_92 = arith.constant 0 : index
        %197 = vector.load %arg3[%c0_90, %c0_91, %c0_92] : memref<1x128x32xf32, #tpu.memory_space<vmem>>, vector<1x128x32xf32>
        %198 = vector.shape_cast %197 : vector<1x128x32xf32> to vector<128x32xf32>
        %c0_93 = arith.constant 0 : index
        %c0_94 = arith.constant 0 : index
        %199 = vector.load %arg21[%c0_93, %c0_94] : memref<128x32xf32, #tpu.memory_space<vmem>>, vector<128x32xf32>
        tpu.vector_store %arg21[%c0_93, %c0_94], %198 {strides = array<i32>} : memref<128x32xf32, #tpu.memory_space<vmem>>, vector<128x32xf32>,
      } else {
      }
      %c0_20 = arith.constant 0 : index
      %c0_21 = arith.constant 0 : index
      %28 = vector.load %arg21[%c0_20, %c0_21] : memref<128x32xf32, #tpu.memory_space<vmem>>, vector<128x32xf32>
      %c0_22 = arith.constant 0 : index
      %c0_23 = arith.constant 0 : index
      %c0_24 = arith.constant 0 : index
      %29 = vector.load %arg4[%c0_22, %c0_23, %c0_24] : memref<1x1x32xf32, #tpu.memory_space<vmem>>, vector<1x1x32xf32>
      %30 = vector.shape_cast %29 : vector<1x1x32xf32> to vector<1x32xf32>
      %c0_25 = arith.constant 0 : index
      %c0_26 = arith.constant 0 : index
      %c0_27 = arith.constant 0 : index
      %31 = vector.load %arg5[%c0_25, %c0_26, %c0_27] : memref<1x1x32xf32, #tpu.memory_space<vmem>>, vector<1x1x32xf32>
      %32 = vector.shape_cast %31 : vector<1x1x32xf32> to vector<1x32xf32>
      %cst_28 = arith.constant dense<0.000000e+00> : vector<128xf32>
      %33 = vector.multi_reduction <add>, %28, %cst_28 [1] : vector<128x32xf32> to vector<128xf32>
      %34 = vector.shape_cast %33 : vector<128xf32> to vector<128x1xf32>
      %cst_29 = arith.constant 3.200000e+01 : f32
      %35 = vector.broadcast %cst_29 : f32 to vector<128x1xf32>
      %36 = arith.divf %34, %35 : vector<128x1xf32>
      %37 = vector.broadcast %36 : vector<128x1xf32> to vector<128x32xf32>
      %38 = arith.subf %28, %37 : vector<128x32xf32>
      %39 = arith.mulf %38, %38 : vector<128x32xf32>
      %cst_30 = arith.constant dense<0.000000e+00> : vector<128xf32>
      %40 = vector.multi_reduction <add>, %39, %cst_30 [1] : vector<128x32xf32> to vector<128xf32>
      %41 = vector.shape_cast %40 : vector<128xf32> to vector<128x1xf32>
      %cst_31 = arith.constant 3.200000e+01 : f32
      %42 = vector.broadcast %cst_31 : f32 to vector<128x1xf32>
      %43 = arith.divf %41, %42 : vector<128x1xf32>
      %44 = vector.broadcast %36 : vector<128x1xf32> to vector<128x32xf32>
      %45 = arith.subf %28, %44 : vector<128x32xf32>
      %cst_32 = arith.constant 9.99999974E-6 : f32
      %46 = vector.broadcast %cst_32 : f32 to vector<128x1xf32>
      %47 = arith.addf %43, %46 : vector<128x1xf32>
      %48 = math.rsqrt %47 : vector<128x1xf32>
      %49 = vector.broadcast %48 : vector<128x1xf32> to vector<128x32xf32>
      %50 = arith.mulf %45, %49 : vector<128x32xf32>
      %51 = vector.broadcast %30 : vector<1x32xf32> to vector<128x32xf32>
      %52 = arith.mulf %50, %51 : vector<128x32xf32>
      %53 = vector.broadcast %32 : vector<1x32xf32> to vector<128x32xf32>
      %54 = arith.addf %52, %53 : vector<128x32xf32>
      %55 = arith.truncf %54 : vector<128x32xf32> to vector<128x32xbf16>
      %c0_33 = arith.constant 0 : index
      %c0_34 = arith.constant 0 : index
      %c0_35 = arith.constant 0 : index
      %56 = vector.load %arg6[%c0_33, %c0_34, %c0_35] : memref<1x32x96xbf16, #tpu.memory_space<vmem>>, vector<1x32x96xbf16>
      %57 = vector.shape_cast %56 : vector<1x32x96xbf16> to vector<32x96xbf16>
      %cst_36 = arith.constant dense<0.000000e+00> : vector<128x96xf32>
      %58 = tpu.matmul %55, %57, %cst_36 {dimension_numbers = #tpu.dot_dimension_numbers<[1], [0], [0], [1], [0, 0, 1, 1], [], []>} : vector<128x32xbf16>, vector<32x96xbf16>, vector<128x96xf32> -> vector<128x96xf32>
      %c0_37 = arith.constant 0 : index
      %c0_38 = arith.constant 0 : index
      %c0_39 = arith.constant 0 : index
      %59 = vector.load %arg7[%c0_37, %c0_38, %c0_39] : memref<1x1x96xf32, #tpu.memory_space<vmem>>, vector<1x1x96xf32>
      %60 = vector.shape_cast %59 : vector<1x1x96xf32> to vector<1x96xf32>
      %61 = vector.broadcast %60 : vector<1x96xf32> to vector<128x96xf32>
      %62 = arith.addf %58, %61 : vector<128x96xf32>
      %63 = arith.truncf %62 : vector<128x96xf32> to vector<128x96xbf16>
      %64 = vector.shape_cast %63 : vector<128x96xbf16> to vector<1x128x96xbf16>
      %65 = tpu.iota {dimensions = array<i32: 2>} : vector<1x1x128xi32>
      %c17_i32 = arith.constant 17 : i32
      %66 = vector.broadcast %c17_i32 : i32 to vector<1x1x128xi32>
      %67 = arith.cmpi slt, %65, %66 : vector<1x1x128xi32>
      %cst_40 = arith.constant 0.000000e+00 : f32
      %cst_41 = arith.constant -1.000000e+30 : f32
      %68 = vector.broadcast %cst_40 : f32 to vector<1x1x128xf32>
      %69 = vector.broadcast %cst_41 : f32 to vector<1x1x128xf32>
      %70 = arith.select %67, %68, %69 : vector<1x1x128xi1>, vector<1x1x128xf32>
      %71 = vector.extract_strided_slice %64 {offsets = [0, 0, 0], sizes = [1, 128, 8], strides = [1, 1, 1]} : vector<1x128x96xbf16> to vector<1x128x8xbf16>
      %72 = vector.extract_strided_slice %64 {offsets = [0, 0, 32], sizes = [1, 128, 8], strides = [1, 1, 1]} : vector<1x128x96xbf16> to vector<1x128x8xbf16>
      %73 = vector.extract_strided_slice %64 {offsets = [0, 0, 64], sizes = [1, 128, 8], strides = [1, 1, 1]} : vector<1x128x96xbf16> to vector<1x128x8xbf16>
      "tpu.trace_start"() <{level = 10 : i32, message = "bqd,bkd->bqk"}> : () -> ()
      %cst_42 = arith.constant dense<0.000000e+00> : vector<1x128x128xf32>
      %74 = tpu.matmul %71, %72, %cst_42 {dimension_numbers = #tpu.dot_dimension_numbers<[2], [2], [1], [1], [0, 0, 0, 1, 1, 1], [0], [0]>} : vector<1x128x8xbf16>, vector<1x128x8xbf16>, vector<1x128x128xf32> -> vector<1x128x128xf32>
      "tpu.trace_stop"() : () -> ()
      %75 = vector.broadcast %70 : vector<1x1x128xf32> to vector<1x128x128xf32>
      %76 = arith.addf %74, %75 : vector<1x128x128xf32>
      %cst_43 = arith.constant dense<0xFF800000> : vector<1x128xf32>
      %77 = vector.multi_reduction <maximumf>, %76, %cst_43 [2] : vector<1x128x128xf32> to vector<1x128xf32>
      %78 = vector.shape_cast %77 : vector<1x128xf32> to vector<1x128x1xf32>
      %79 = vector.broadcast %78 : vector<1x128x1xf32> to vector<1x128x128xf32>
      %80 = arith.subf %76, %79 : vector<1x128x128xf32>
      %81 = math.exp %80 : vector<1x128x128xf32>
      %cst_44 = arith.constant dense<0.000000e+00> : vector<1x128xf32>
      %82 = vector.multi_reduction <add>, %81, %cst_44 [2] : vector<1x128x128xf32> to vector<1x128xf32>
      %83 = vector.shape_cast %82 : vector<1x128xf32> to vector<1x128x1xf32>
      %84 = tpu.reciprocal %83 {approx = true} : vector<1x128x1xf32> -> vector<1x128x1xf32>
      %85 = vector.broadcast %84 : vector<1x128x1xf32> to vector<1x128x128xf32>
      %86 = arith.mulf %81, %85 : vector<1x128x128xf32>
      %87 = arith.truncf %86 : vector<1x128x128xf32> to vector<1x128x128xbf16>
      "tpu.trace_start"() <{level = 10 : i32, message = "bqk,bkd->bqd"}> : () -> ()
      %cst_45 = arith.constant dense<0.000000e+00> : vector<1x128x8xf32>
      %88 = tpu.matmul %87, %73, %cst_45 {dimension_numbers = #tpu.dot_dimension_numbers<[2], [1], [1], [2], [0, 0, 0, 1, 1, 2], [0], [0]>} : vector<1x128x128xbf16>, vector<1x128x8xbf16>, vector<1x128x8xf32> -> vector<1x128x8xf32>
      "tpu.trace_stop"() : () -> ()
      %89 = vector.shape_cast %88 : vector<1x128x8xf32> to vector<128x8xf32>
      %90 = arith.truncf %89 : vector<128x8xf32> to vector<128x8xbf16>
      %c0_46 = arith.constant 0 : index
      %c0_47 = arith.constant 0 : index
      %91 = vector.load %arg22[%c0_46, %c0_47] : memref<128x32xbf16, #tpu.memory_space<vmem>>, vector<128x8xbf16>
      tpu.vector_store %arg22[%c0_46, %c0_47], %90 {strides = array<i32>} : memref<128x32xbf16, #tpu.memory_space<vmem>>, vector<128x8xbf16>,
      %92 = vector.extract_strided_slice %64 {offsets = [0, 0, 8], sizes = [1, 128, 8], strides = [1, 1, 1]} : vector<1x128x96xbf16> to vector<1x128x8xbf16>
      %93 = vector.extract_strided_slice %64 {offsets = [0, 0, 40], sizes = [1, 128, 8], strides = [1, 1, 1]} : vector<1x128x96xbf16> to vector<1x128x8xbf16>
      %94 = vector.extract_strided_slice %64 {offsets = [0, 0, 72], sizes = [1, 128, 8], strides = [1, 1, 1]} : vector<1x128x96xbf16> to vector<1x128x8xbf16>
      "tpu.trace_start"() <{level = 10 : i32, message = "bqd,bkd->bqk"}> : () -> ()
      %cst_48 = arith.constant dense<0.000000e+00> : vector<1x128x128xf32>
      %95 = tpu.matmul %92, %93, %cst_48 {dimension_numbers = #tpu.dot_dimension_numbers<[2], [2], [1], [1], [0, 0, 0, 1, 1, 1], [0], [0]>} : vector<1x128x8xbf16>, vector<1x128x8xbf16>, vector<1x128x128xf32> -> vector<1x128x128xf32>
      "tpu.trace_stop"() : () -> ()
      %96 = vector.broadcast %70 : vector<1x1x128xf32> to vector<1x128x128xf32>
      %97 = arith.addf %95, %96 : vector<1x128x128xf32>
      %cst_49 = arith.constant dense<0xFF800000> : vector<1x128xf32>
      %98 = vector.multi_reduction <maximumf>, %97, %cst_49 [2] : vector<1x128x128xf32> to vector<1x128xf32>
      %99 = vector.shape_cast %98 : vector<1x128xf32> to vector<1x128x1xf32>
      %100 = vector.broadcast %99 : vector<1x128x1xf32> to vector<1x128x128xf32>
      %101 = arith.subf %97, %100 : vector<1x128x128xf32>
      %102 = math.exp %101 : vector<1x128x128xf32>
      %cst_50 = arith.constant dense<0.000000e+00> : vector<1x128xf32>
      %103 = vector.multi_reduction <add>, %102, %cst_50 [2] : vector<1x128x128xf32> to vector<1x128xf32>
      %104 = vector.shape_cast %103 : vector<1x128xf32> to vector<1x128x1xf32>
      %105 = tpu.reciprocal %104 {approx = true} : vector<1x128x1xf32> -> vector<1x128x1xf32>
      %106 = vector.broadcast %105 : vector<1x128x1xf32> to vector<1x128x128xf32>
      %107 = arith.mulf %102, %106 : vector<1x128x128xf32>
      %108 = arith.truncf %107 : vector<1x128x128xf32> to vector<1x128x128xbf16>
      "tpu.trace_start"() <{level = 10 : i32, message = "bqk,bkd->bqd"}> : () -> ()
      %cst_51 = arith.constant dense<0.000000e+00> : vector<1x128x8xf32>
      %109 = tpu.matmul %108, %94, %cst_51 {dimension_numbers = #tpu.dot_dimension_numbers<[2], [1], [1], [2], [0, 0, 0, 1, 1, 2], [0], [0]>} : vector<1x128x128xbf16>, vector<1x128x8xbf16>, vector<1x128x8xf32> -> vector<1x128x8xf32>
      "tpu.trace_stop"() : () -> ()
      %110 = vector.shape_cast %109 : vector<1x128x8xf32> to vector<128x8xf32>
      %111 = arith.truncf %110 : vector<128x8xf32> to vector<128x8xbf16>
      %c0_52 = arith.constant 0 : index
      %c8 = arith.constant 8 : index
      %112 = vector.load %arg22[%c0_52, %c8] : memref<128x32xbf16, #tpu.memory_space<vmem>>, vector<128x8xbf16>
      tpu.vector_store %arg22[%c0_52, %c8], %111 {strides = array<i32>} : memref<128x32xbf16, #tpu.memory_space<vmem>>, vector<128x8xbf16>,
      %113 = vector.extract_strided_slice %64 {offsets = [0, 0, 16], sizes = [1, 128, 8], strides = [1, 1, 1]} : vector<1x128x96xbf16> to vector<1x128x8xbf16>
      %114 = vector.extract_strided_slice %64 {offsets = [0, 0, 48], sizes = [1, 128, 8], strides = [1, 1, 1]} : vector<1x128x96xbf16> to vector<1x128x8xbf16>
      %115 = vector.extract_strided_slice %64 {offsets = [0, 0, 80], sizes = [1, 128, 8], strides = [1, 1, 1]} : vector<1x128x96xbf16> to vector<1x128x8xbf16>
      "tpu.trace_start"() <{level = 10 : i32, message = "bqd,bkd->bqk"}> : () -> ()
      %cst_53 = arith.constant dense<0.000000e+00> : vector<1x128x128xf32>
      %116 = tpu.matmul %113, %114, %cst_53 {dimension_numbers = #tpu.dot_dimension_numbers<[2], [2], [1], [1], [0, 0, 0, 1, 1, 1], [0], [0]>} : vector<1x128x8xbf16>, vector<1x128x8xbf16>, vector<1x128x128xf32> -> vector<1x128x128xf32>
      "tpu.trace_stop"() : () -> ()
      %117 = vector.broadcast %70 : vector<1x1x128xf32> to vector<1x128x128xf32>
      %118 = arith.addf %116, %117 : vector<1x128x128xf32>
      %cst_54 = arith.constant dense<0xFF800000> : vector<1x128xf32>
      %119 = vector.multi_reduction <maximumf>, %118, %cst_54 [2] : vector<1x128x128xf32> to vector<1x128xf32>
      %120 = vector.shape_cast %119 : vector<1x128xf32> to vector<1x128x1xf32>
      %121 = vector.broadcast %120 : vector<1x128x1xf32> to vector<1x128x128xf32>
      %122 = arith.subf %118, %121 : vector<1x128x128xf32>
      %123 = math.exp %122 : vector<1x128x128xf32>
      %cst_55 = arith.constant dense<0.000000e+00> : vector<1x128xf32>
      %124 = vector.multi_reduction <add>, %123, %cst_55 [2] : vector<1x128x128xf32> to vector<1x128xf32>
      %125 = vector.shape_cast %124 : vector<1x128xf32> to vector<1x128x1xf32>
      %126 = tpu.reciprocal %125 {approx = true} : vector<1x128x1xf32> -> vector<1x128x1xf32>
      %127 = vector.broadcast %126 : vector<1x128x1xf32> to vector<1x128x128xf32>
      %128 = arith.mulf %123, %127 : vector<1x128x128xf32>
      %129 = arith.truncf %128 : vector<1x128x128xf32> to vector<1x128x128xbf16>
      "tpu.trace_start"() <{level = 10 : i32, message = "bqk,bkd->bqd"}> : () -> ()
      %cst_56 = arith.constant dense<0.000000e+00> : vector<1x128x8xf32>
      %130 = tpu.matmul %129, %115, %cst_56 {dimension_numbers = #tpu.dot_dimension_numbers<[2], [1], [1], [2], [0, 0, 0, 1, 1, 2], [0], [0]>} : vector<1x128x128xbf16>, vector<1x128x8xbf16>, vector<1x128x8xf32> -> vector<1x128x8xf32>
      "tpu.trace_stop"() : () -> ()
      %131 = vector.shape_cast %130 : vector<1x128x8xf32> to vector<128x8xf32>
      %132 = arith.truncf %131 : vector<128x8xf32> to vector<128x8xbf16>
      %c0_57 = arith.constant 0 : index
      %c16 = arith.constant 16 : index
      %133 = vector.load %arg22[%c0_57, %c16] : memref<128x32xbf16, #tpu.memory_space<vmem>>, vector<128x8xbf16>
      tpu.vector_store %arg22[%c0_57, %c16], %132 {strides = array<i32>} : memref<128x32xbf16, #tpu.memory_space<vmem>>, vector<128x8xbf16>,
      %134 = vector.extract_strided_slice %64 {offsets = [0, 0, 24], sizes = [1, 128, 8], strides = [1, 1, 1]} : vector<1x128x96xbf16> to vector<1x128x8xbf16>
      %135 = vector.extract_strided_slice %64 {offsets = [0, 0, 56], sizes = [1, 128, 8], strides = [1, 1, 1]} : vector<1x128x96xbf16> to vector<1x128x8xbf16>
      %136 = vector.extract_strided_slice %64 {offsets = [0, 0, 88], sizes = [1, 128, 8], strides = [1, 1, 1]} : vector<1x128x96xbf16> to vector<1x128x8xbf16>
      "tpu.trace_start"() <{level = 10 : i32, message = "bqd,bkd->bqk"}> : () -> ()
      %cst_58 = arith.constant dense<0.000000e+00> : vector<1x128x128xf32>
      %137 = tpu.matmul %134, %135, %cst_58 {dimension_numbers = #tpu.dot_dimension_numbers<[2], [2], [1], [1], [0, 0, 0, 1, 1, 1], [0], [0]>} : vector<1x128x8xbf16>, vector<1x128x8xbf16>, vector<1x128x128xf32> -> vector<1x128x128xf32>
      "tpu.trace_stop"() : () -> ()
      %138 = vector.broadcast %70 : vector<1x1x128xf32> to vector<1x128x128xf32>
      %139 = arith.addf %137, %138 : vector<1x128x128xf32>
      %cst_59 = arith.constant dense<0xFF800000> : vector<1x128xf32>
      %140 = vector.multi_reduction <maximumf>, %139, %cst_59 [2] : vector<1x128x128xf32> to vector<1x128xf32>
      %141 = vector.shape_cast %140 : vector<1x128xf32> to vector<1x128x1xf32>
      %142 = vector.broadcast %141 : vector<1x128x1xf32> to vector<1x128x128xf32>
      %143 = arith.subf %139, %142 : vector<1x128x128xf32>
      %144 = math.exp %143 : vector<1x128x128xf32>
      %cst_60 = arith.constant dense<0.000000e+00> : vector<1x128xf32>
      %145 = vector.multi_reduction <add>, %144, %cst_60 [2] : vector<1x128x128xf32> to vector<1x128xf32>
      %146 = vector.shape_cast %145 : vector<1x128xf32> to vector<1x128x1xf32>
      %147 = tpu.reciprocal %146 {approx = true} : vector<1x128x1xf32> -> vector<1x128x1xf32>
      %148 = vector.broadcast %147 : vector<1x128x1xf32> to vector<1x128x128xf32>
      %149 = arith.mulf %144, %148 : vector<1x128x128xf32>
      %150 = arith.truncf %149 : vector<1x128x128xf32> to vector<1x128x128xbf16>
      "tpu.trace_start"() <{level = 10 : i32, message = "bqk,bkd->bqd"}> : () -> ()
      %cst_61 = arith.constant dense<0.000000e+00> : vector<1x128x8xf32>
      %151 = tpu.matmul %150, %136, %cst_61 {dimension_numbers = #tpu.dot_dimension_numbers<[2], [1], [1], [2], [0, 0, 0, 1, 1, 2], [0], [0]>} : vector<1x128x128xbf16>, vector<1x128x8xbf16>, vector<1x128x8xf32> -> vector<1x128x8xf32>
      "tpu.trace_stop"() : () -> ()
      %152 = vector.shape_cast %151 : vector<1x128x8xf32> to vector<128x8xf32>
      %153 = arith.truncf %152 : vector<128x8xf32> to vector<128x8xbf16>
      %c0_62 = arith.constant 0 : index
      %c24 = arith.constant 24 : index
      %154 = vector.load %arg22[%c0_62, %c24] : memref<128x32xbf16, #tpu.memory_space<vmem>>, vector<128x8xbf16>
      tpu.vector_store %arg22[%c0_62, %c24], %153 {strides = array<i32>} : memref<128x32xbf16, #tpu.memory_space<vmem>>, vector<128x8xbf16>,
      %c0_63 = arith.constant 0 : index
      %c0_64 = arith.constant 0 : index
      %155 = vector.load %arg22[%c0_63, %c0_64] : memref<128x32xbf16, #tpu.memory_space<vmem>>, vector<128x32xbf16>
      %c0_65 = arith.constant 0 : index
      %c0_66 = arith.constant 0 : index
      %c0_67 = arith.constant 0 : index
      %156 = vector.load %arg8[%c0_65, %c0_66, %c0_67] : memref<1x32x32xbf16, #tpu.memory_space<vmem>>, vector<1x32x32xbf16>
      %157 = vector.shape_cast %156 : vector<1x32x32xbf16> to vector<32x32xbf16>
      %cst_68 = arith.constant dense<0.000000e+00> : vector<128x32xf32>
      %158 = tpu.matmul %155, %157, %cst_68 {dimension_numbers = #tpu.dot_dimension_numbers<[1], [0], [0], [1], [0, 0, 1, 1], [], []>} : vector<128x32xbf16>, vector<32x32xbf16>, vector<128x32xf32> -> vector<128x32xf32>
      %c0_69 = arith.constant 0 : index
      %c0_70 = arith.constant 0 : index
      %c0_71 = arith.constant 0 : index
      %159 = vector.load %arg9[%c0_69, %c0_70, %c0_71] : memref<1x1x32xf32, #tpu.memory_space<vmem>>, vector<1x1x32xf32>
      %160 = vector.shape_cast %159 : vector<1x1x32xf32> to vector<1x32xf32>
      %161 = vector.broadcast %160 : vector<1x32xf32> to vector<128x32xf32>
      %162 = arith.addf %158, %161 : vector<128x32xf32>
      %163 = arith.addf %28, %162 : vector<128x32xf32>
      %c0_72 = arith.constant 0 : index
      %c0_73 = arith.constant 0 : index
      %c0_74 = arith.constant 0 : index
      %164 = vector.load %arg10[%c0_72, %c0_73, %c0_74] : memref<1x1x32xf32, #tpu.memory_space<vmem>>, vector<1x1x32xf32>
      %165 = vector.shape_cast %164 : vector<1x1x32xf32> to vector<1x32xf32>
      %c0_75 = arith.constant 0 : index
      %c0_76 = arith.constant 0 : index
      %c0_77 = arith.constant 0 : index
      %166 = vector.load %arg11[%c0_75, %c0_76, %c0_77] : memref<1x1x32xf32, #tpu.memory_space<vmem>>, vector<1x1x32xf32>
      %167 = vector.shape_cast %166 : vector<1x1x32xf32> to vector<1x32xf32>
      %cst_78 = arith.constant dense<0.000000e+00> : vector<128xf32>
      %168 = vector.multi_reduction <add>, %163, %cst_78 [1] : vector<128x32xf32> to vector<128xf32>
      %169 = vector.shape_cast %168 : vector<128xf32> to vector<128x1xf32>
      %cst_79 = arith.constant 3.200000e+01 : f32
      %170 = vector.broadcast %cst_79 : f32 to vector<128x1xf32>
      %171 = arith.divf %169, %170 : vector<128x1xf32>
      %172 = vector.broadcast %171 : vector<128x1xf32> to vector<128x32xf32>
      %173 = arith.subf %163, %172 : vector<128x32xf32>
      %174 = arith.mulf %173, %173 : vector<128x32xf32>
      %cst_80 = arith.constant dense<0.000000e+00> : vector<128xf32>
      %175 = vector.multi_reduction <add>, %174, %cst_80 [1] : vector<128x32xf32> to vector<128xf32>
      %176 = vector.shape_cast %175 : vector<128xf32> to vector<128x1xf32>
      %cst_81 = arith.constant 3.200000e+01 : f32
      %177 = vector.broadcast %cst_81 : f32 to vector<128x1xf32>
      %178 = arith.divf %176, %177 : vector<128x1xf32>
      %179 = vector.broadcast %171 : vector<128x1xf32> to vector<128x32xf32>
      %180 = arith.subf %163, %179 : vector<128x32xf32>
      %cst_82 = arith.constant 9.99999974E-6 : f32
      %181 = vector.broadcast %cst_82 : f32 to vector<128x1xf32>
      %182 = arith.addf %178, %181 : vector<128x1xf32>
      %183 = math.rsqrt %182 : vector<128x1xf32>
      %184 = vector.broadcast %183 : vector<128x1xf32> to vector<128x32xf32>
      %185 = arith.mulf %180, %184 : vector<128x32xf32>
      %186 = vector.broadcast %165 : vector<1x32xf32> to vector<128x32xf32>
      %187 = arith.mulf %185, %186 : vector<128x32xf32>
      %188 = vector.broadcast %167 : vector<1x32xf32> to vector<128x32xf32>
      %189 = arith.addf %187, %188 : vector<128x32xf32>
      %190 = arith.truncf %189 : vector<128x32xf32> to vector<128x32xbf16>
      %c0_83 = arith.constant 0 : index
      %c0_84 = arith.constant 0 : index
      %191 = vector.load %arg23[%c0_83, %c0_84] : memref<128x32xbf16, #tpu.memory_space<vmem>>, vector<128x32xbf16>
      tpu.vector_store %arg23[%c0_83, %c0_84], %190 {strides = array<i32>} : memref<128x32xbf16, #tpu.memory_space<vmem>>, vector<128x32xbf16>,
      %c0_85 = arith.constant 0 : index
      %c0_86 = arith.constant 0 : index
      %c0_87 = arith.constant 0 : index
      %192 = vector.load %arg15[%c0_85, %c0_86, %c0_87] : memref<1x1x32xf32, #tpu.memory_space<vmem>>, vector<1x1x32xf32>
      %193 = vector.shape_cast %192 : vector<1x1x32xf32> to vector<1x32xf32>
      %194 = vector.broadcast %193 : vector<1x32xf32> to vector<128x32xf32>
      %195 = arith.addf %163, %194 : vector<128x32xf32>
      %c0_88 = arith.constant 0 : index
      %c0_89 = arith.constant 0 : index
      %196 = vector.load %arg21[%c0_88, %c0_89] : memref<128x32xf32, #tpu.memory_space<vmem>>, vector<128x32xf32>
      tpu.vector_store %arg21[%c0_88, %c0_89], %195 {strides = array<i32>} : memref<128x32xf32, #tpu.memory_space<vmem>>, vector<128x32xf32>,
    } else {
    }
    %c0 = arith.constant 0 : index
    %c0_1 = arith.constant 0 : index
    %3 = vector.load %arg23[%c0, %c0_1] : memref<128x32xbf16, #tpu.memory_space<vmem>>, vector<128x32xbf16>
    %c0_2 = arith.constant 0 : index
    %c0_3 = arith.constant 0 : index
    %c0_4 = arith.constant 0 : index
    %4 = vector.load %arg12[%c0_2, %c0_3, %c0_4] : memref<1x32x512xbf16, #tpu.memory_space<vmem>>, vector<1x32x512xbf16>
    %5 = vector.shape_cast %4 : vector<1x32x512xbf16> to vector<32x512xbf16>
    %cst = arith.constant dense<0.000000e+00> : vector<128x512xf32>
    %6 = tpu.matmul %3, %5, %cst {dimension_numbers = #tpu.dot_dimension_numbers<[1], [0], [0], [1], [0, 0, 1, 1], [], []>} : vector<128x32xbf16>, vector<32x512xbf16>, vector<128x512xf32> -> vector<128x512xf32>
    %c0_5 = arith.constant 0 : index
    %c0_6 = arith.constant 0 : index
    %c0_7 = arith.constant 0 : index
    %7 = vector.load %arg13[%c0_5, %c0_6, %c0_7] : memref<1x1x512xf32, #tpu.memory_space<vmem>>, vector<1x1x512xf32>
    %8 = vector.shape_cast %7 : vector<1x1x512xf32> to vector<1x512xf32>
    %9 = vector.broadcast %8 : vector<1x512xf32> to vector<128x512xf32>
    %10 = arith.addf %6, %9 : vector<128x512xf32>
    %cst_8 = arith.constant 0.000000e+00 : f32
    %11 = vector.broadcast %cst_8 : f32 to vector<128x512xf32>
    %12 = arith.maximumf %10, %11 : vector<128x512xf32>
    %13 = arith.truncf %12 : vector<128x512xf32> to vector<128x512xbf16>
    %c0_9 = arith.constant 0 : index
    %c0_10 = arith.constant 0 : index
    %14 = vector.load %arg21[%c0_9, %c0_10] : memref<128x32xf32, #tpu.memory_space<vmem>>, vector<128x32xf32>
    %c0_11 = arith.constant 0 : index
    %c0_12 = arith.constant 0 : index
    %c0_13 = arith.constant 0 : index
    %15 = vector.load %arg14[%c0_11, %c0_12, %c0_13] : memref<1x512x32xbf16, #tpu.memory_space<vmem>>, vector<1x512x32xbf16>
    %16 = vector.shape_cast %15 : vector<1x512x32xbf16> to vector<512x32xbf16>
    %cst_14 = arith.constant dense<0.000000e+00> : vector<128x32xf32>
    %17 = tpu.matmul %13, %16, %cst_14 {dimension_numbers = #tpu.dot_dimension_numbers<[1], [0], [0], [1], [0, 0, 1, 1], [], []>} : vector<128x512xbf16>, vector<512x32xbf16>, vector<128x32xf32> -> vector<128x32xf32>
    %18 = arith.addf %14, %17 : vector<128x32xf32>
    %c0_15 = arith.constant 0 : index
    %c0_16 = arith.constant 0 : index
    %19 = vector.load %arg21[%c0_15, %c0_16] : memref<128x32xf32, #tpu.memory_space<vmem>>, vector<128x32xf32>
    tpu.vector_store %arg21[%c0_15, %c0_16], %18 {strides = array<i32>} : memref<128x32xf32, #tpu.memory_space<vmem>>, vector<128x32xf32>,
    %c1_i32 = arith.constant 1 : i32
    %20 = arith.cmpi eq, %arg1, %c1_i32 : i32
    %c3_i32 = arith.constant 3 : i32
    %21 = arith.cmpi eq, %arg2, %c3_i32 : i32
    %22 = arith.andi %20, %21 : i1
    %23 = arith.extui %22 : i1 to i32
    %c0_i32_17 = arith.constant 0 : i32
    %24 = arith.cmpi ne, %23, %c0_i32_17 : i32
    scf.if %24 {
      %c0_18 = arith.constant 0 : index
      %c0_19 = arith.constant 0 : index
      %25 = vector.load %arg21[%c0_18, %c0_19] : memref<128x32xf32, #tpu.memory_space<vmem>>, vector<128x32xf32>
      %26 = vector.shape_cast %25 : vector<128x32xf32> to vector<1x128x32xf32>
      %27 = vector.extract_strided_slice %26 {offsets = [0, 0, 0], sizes = [1, 1, 32], strides = [1, 1, 1]} : vector<1x128x32xf32> to vector<1x1x32xf32>
      %28 = vector.shape_cast %27 : vector<1x1x32xf32> to vector<1x32xf32>
      %c0_20 = arith.constant 0 : index
      %c0_21 = arith.constant 0 : index
      %29 = vector.load %arg16[%c0_20, %c0_21] : memref<1x32xf32, #tpu.memory_space<vmem>>, vector<1x32xf32>
      %c0_22 = arith.constant 0 : index
      %c0_23 = arith.constant 0 : index
      %30 = vector.load %arg17[%c0_22, %c0_23] : memref<1x32xf32, #tpu.memory_space<vmem>>, vector<1x32xf32>
      %cst_24 = arith.constant dense<0.000000e+00> : vector<1xf32>
      %31 = vector.multi_reduction <add>, %28, %cst_24 [1] : vector<1x32xf32> to vector<1xf32>
      %32 = vector.shape_cast %31 : vector<1xf32> to vector<1x1xf32>
      %cst_25 = arith.constant 3.200000e+01 : f32
      %33 = vector.broadcast %cst_25 : f32 to vector<1x1xf32>
      %34 = arith.divf %32, %33 : vector<1x1xf32>
      %35 = vector.broadcast %34 : vector<1x1xf32> to vector<1x32xf32>
      %36 = arith.subf %28, %35 : vector<1x32xf32>
      %37 = arith.mulf %36, %36 : vector<1x32xf32>
      %cst_26 = arith.constant dense<0.000000e+00> : vector<1xf32>
      %38 = vector.multi_reduction <add>, %37, %cst_26 [1] : vector<1x32xf32> to vector<1xf32>
      %39 = vector.shape_cast %38 : vector<1xf32> to vector<1x1xf32>
      %cst_27 = arith.constant 3.200000e+01 : f32
      %40 = vector.broadcast %cst_27 : f32 to vector<1x1xf32>
      %41 = arith.divf %39, %40 : vector<1x1xf32>
      %42 = vector.broadcast %34 : vector<1x1xf32> to vector<1x32xf32>
      %43 = arith.subf %28, %42 : vector<1x32xf32>
      %cst_28 = arith.constant 9.99999974E-6 : f32
      %44 = vector.broadcast %cst_28 : f32 to vector<1x1xf32>
      %45 = arith.addf %41, %44 : vector<1x1xf32>
      %46 = math.rsqrt %45 : vector<1x1xf32>
      %47 = vector.broadcast %46 : vector<1x1xf32> to vector<1x32xf32>
      %48 = arith.mulf %43, %47 : vector<1x32xf32>
      %49 = arith.mulf %48, %29 : vector<1x32xf32>
      %50 = arith.addf %49, %30 : vector<1x32xf32>
      %51 = arith.truncf %50 : vector<1x32xf32> to vector<1x32xbf16>
      %c0_29 = arith.constant 0 : index
      %c0_30 = arith.constant 0 : index
      %52 = vector.load %arg18[%c0_29, %c0_30] : memref<32x16xbf16, #tpu.memory_space<vmem>>, vector<32x16xbf16>
      %cst_31 = arith.constant dense<0.000000e+00> : vector<1x16xf32>
      %53 = tpu.matmul %51, %52, %cst_31 {dimension_numbers = #tpu.dot_dimension_numbers<[1], [0], [0], [1], [0, 0, 1, 1], [], []>} : vector<1x32xbf16>, vector<32x16xbf16>, vector<1x16xf32> -> vector<1x16xf32>
      %c0_32 = arith.constant 0 : index
      %c0_33 = arith.constant 0 : index
      %54 = vector.load %arg19[%c0_32, %c0_33] : memref<1x16xf32, #tpu.memory_space<vmem>>, vector<1x16xf32>
      %55 = arith.addf %53, %54 : vector<1x16xf32>
      %c0_34 = arith.constant 0 : index
      %c0_35 = arith.constant 0 : index
      %c0_36 = arith.constant 0 : index
      %56 = vector.load %arg20[%c0_34, %c0_35, %c0_36] : memref<1x1x16xf32, #tpu.memory_space<vmem>>, vector<1x1x16xf32>
      %57 = vector.shape_cast %56 : vector<1x1x16xf32> to vector<1x16xf32>
      %58 = vector.shape_cast %55 : vector<1x16xf32> to vector<1x1x16xf32>
      tpu.vector_store %arg20[%c0_34, %c0_35, %c0_36], %58 {strides = array<i32>} : memref<1x1x16xf32, #tpu.memory_space<vmem>>, vector<1x1x16xf32>,
    } else {
    }
    return
  }
  func.func @transform_0(%arg0: i32, %arg1: i32, %arg2: i32) -> (i32, i32, i32) {
    %c0_i32 = arith.constant 0 : i32
    %c0_i32_0 = arith.constant 0 : i32
    %c0_i32_1 = arith.constant 0 : i32
    return %arg0, %c0_i32, %c0_i32_0 : i32, i32, i32
  }
  func.func @transform_1(%arg0: i32, %arg1: i32, %arg2: i32) -> (i32, i32, i32) {
    %c0_i32 = arith.constant 0 : i32
    %c0_i32_0 = arith.constant 0 : i32
    %c0_i32_1 = arith.constant 0 : i32
    return %arg1, %c0_i32, %c0_i32_0 : i32, i32, i32
  }
  func.func @transform_2(%arg0: i32, %arg1: i32, %arg2: i32) -> (i32, i32, i32) {
    %c0_i32 = arith.constant 0 : i32
    %c0_i32_0 = arith.constant 0 : i32
    %c0_i32_1 = arith.constant 0 : i32
    return %arg1, %c0_i32, %c0_i32_0 : i32, i32, i32
  }
  func.func @transform_3(%arg0: i32, %arg1: i32, %arg2: i32) -> (i32, i32, i32) {
    %c0_i32 = arith.constant 0 : i32
    %c0_i32_0 = arith.constant 0 : i32
    %c0_i32_1 = arith.constant 0 : i32
    return %arg1, %c0_i32, %c0_i32_0 : i32, i32, i32
  }
  func.func @transform_4(%arg0: i32, %arg1: i32, %arg2: i32) -> (i32, i32, i32) {
    %c0_i32 = arith.constant 0 : i32
    %c0_i32_0 = arith.constant 0 : i32
    %c0_i32_1 = arith.constant 0 : i32
    return %arg1, %c0_i32, %c0_i32_0 : i32, i32, i32
  }
  func.func @transform_5(%arg0: i32, %arg1: i32, %arg2: i32) -> (i32, i32, i32) {
    %c0_i32 = arith.constant 0 : i32
    %c0_i32_0 = arith.constant 0 : i32
    %c0_i32_1 = arith.constant 0 : i32
    return %arg1, %c0_i32, %c0_i32_0 : i32, i32, i32
  }
  func.func @transform_6(%arg0: i32, %arg1: i32, %arg2: i32) -> (i32, i32, i32) {
    %c0_i32 = arith.constant 0 : i32
    %c0_i32_0 = arith.constant 0 : i32
    %c0_i32_1 = arith.constant 0 : i32
    return %arg1, %c0_i32, %c0_i32_0 : i32, i32, i32
  }
  func.func @transform_7(%arg0: i32, %arg1: i32, %arg2: i32) -> (i32, i32, i32) {
    %c0_i32 = arith.constant 0 : i32
    %c0_i32_0 = arith.constant 0 : i32
    %c0_i32_1 = arith.constant 0 : i32
    return %arg1, %c0_i32, %c0_i32_0 : i32, i32, i32
  }
  func.func @transform_8(%arg0: i32, %arg1: i32, %arg2: i32) -> (i32, i32, i32) {
    %c0_i32 = arith.constant 0 : i32
    %c0_i32_0 = arith.constant 0 : i32
    %c0_i32_1 = arith.constant 0 : i32
    return %arg1, %c0_i32, %c0_i32_0 : i32, i32, i32
  }
  func.func @transform_9(%arg0: i32, %arg1: i32, %arg2: i32) -> (i32, i32, i32) {
    %c0_i32 = arith.constant 0 : i32
    %c0_i32_0 = arith.constant 0 : i32
    return %arg1, %c0_i32, %arg2 : i32, i32, i32
  }
  func.func @transform_10(%arg0: i32, %arg1: i32, %arg2: i32) -> (i32, i32, i32) {
    %c0_i32 = arith.constant 0 : i32
    %c0_i32_0 = arith.constant 0 : i32
    return %arg1, %c0_i32, %arg2 : i32, i32, i32
  }
  func.func @transform_11(%arg0: i32, %arg1: i32, %arg2: i32) -> (i32, i32, i32) {
    %c0_i32 = arith.constant 0 : i32
    %c0_i32_0 = arith.constant 0 : i32
    return %arg1, %arg2, %c0_i32 : i32, i32, i32
  }
  func.func @transform_12(%arg0: i32, %arg1: i32, %arg2: i32) -> (i32, i32, i32) {
    %c0_i32 = arith.constant 0 : i32
    %c0_i32_0 = arith.constant 0 : i32
    %c0_i32_1 = arith.constant 0 : i32
    return %arg1, %c0_i32, %c0_i32_0 : i32, i32, i32
  }
  func.func @transform_13(%arg0: i32, %arg1: i32, %arg2: i32) -> (i32, i32) {
    %c0_i32 = arith.constant 0 : i32
    %c0_i32_0 = arith.constant 0 : i32
    %c0_i32_1 = arith.constant 0 : i32
    return %c0_i32, %c0_i32_0 : i32, i32
  }
  func.func @transform_14(%arg0: i32, %arg1: i32, %arg2: i32) -> (i32, i32) {
    %c0_i32 = arith.constant 0 : i32
    %c0_i32_0 = arith.constant 0 : i32
    %c0_i32_1 = arith.constant 0 : i32
    return %c0_i32, %c0_i32_0 : i32, i32
  }
  func.func @transform_15(%arg0: i32, %arg1: i32, %arg2: i32) -> (i32, i32) {
    %c0_i32 = arith.constant 0 : i32
    %c0_i32_0 = arith.constant 0 : i32
    %c0_i32_1 = arith.constant 0 : i32
    return %c0_i32, %c0_i32_0 : i32, i32
  }
  func.func @transform_16(%arg0: i32, %arg1: i32, %arg2: i32) -> (i32, i32) {
    %c0_i32 = arith.constant 0 : i32
    %c0_i32_0 = arith.constant 0 : i32
    %c0_i32_1 = arith.constant 0 : i32
    return %c0_i32, %c0_i32_0 : i32, i32
  }
  func.func @transform_17(%arg0: i32, %arg1: i32, %arg2: i32) -> (i32, i32, i32) {
    %c0_i32 = arith.constant 0 : i32
    %c0_i32_0 = arith.constant 0 : i32
    %c0_i32_1 = arith.constant 0 : i32
    return %arg0, %c0_i32, %c0_i32_0 : i32, i32, i32
  }
}

</mosaic_0001>

<bundles_post_ra>
// kernel: tpu_custom_call.1
= control target key start
LH: loop header
LB: loop body
LE: loop exit
PB: predicated region body
PF: predicated region fallthrough
CT: control target
= control target key end

     0   :  { %s8490_s0 = inlined_call_operand.vmem [shape: f32[2,128,32], index: 0, kind: input, shape index: {}]   ;;  %s8491_s1 = inlined_call_operand.vmem [shape: f32[2,1,32], index: 1, kind: input, shape index: {}]   ;;  %s8492_s2 = inlined_call_operand.vmem [shape: f32[2,1,32], index: 2, kind: input, shape index: {}]   ;;  %s8493_s3 = inlined_call_operand.vmem [shape: bf16[2,32,96], index: 3, kind: input, shape index: {}]   ;;  %s8494_s4 = inlined_call_operand.vmem [shape: f32[2,1,96], index: 4, kind: input, shape index: {}]   ;;  %s8495_s5 = inlined_call_operand.vmem [shape: bf16[2,32,32], index: 5, kind: input, shape index: {}]   ;;  %s8496_s6 = inlined_call_operand.vmem [shape: f32[2,1,32], index: 6, kind: input, shape index: {}]   ;;  %s8497_s7 = inlined_call_operand.vmem [shape: f32[2,1,32], index: 7, kind: input, shape index: {}]   ;;  %s8498_s8 = inlined_call_operand.vmem [shape: f32[2,1,32], index: 8, kind: input, shape index: {}]   ;;  %s8499_s9 = inlined_call_operand.vmem [shape: bf16[2,32,2048], index: 9, kind: input, shape index: {}]   ;;  %s8500_s10 = inlined_call_operand.vmem [shape: f32[2,1,2048], index: 10, kind: input, shape index: {}]   ;;  %s8501_s11 = inlined_call_operand.vmem [shape: bf16[2,2048,32], index: 11, kind: input, shape index: {}]   ;;  %s8502_s12 = inlined_call_operand.vmem [shape: f32[2,1,32], index: 12, kind: input, shape index: {}]   ;;  %s8503_s13 = inlined_call_operand.vmem [shape: f32[1,32], index: 13, kind: input, shape index: {}]   ;;  %s8504_s14 = inlined_call_operand.vmem [shape: f32[1,32], index: 14, kind: input, shape index: {}]   ;;  %s8505_s15 = inlined_call_operand.vmem [shape: bf16[32,16], index: 15, kind: input, shape index: {}]   ;;  %s8506_s16 = inlined_call_operand.vmem [shape: f32[1,16], index: 16, kind: input, shape index: {}]   ;;  %s8507_s17 = inlined_call_operand.hbm [shape: f32[2,1,16], index: 17, kind: output, shape index: {}]  }
   0x1   :  { %8528 = sst [smem:[#allocation27_spill]] %s8490_s0 }
   0x2   :  { %8529 = sst [smem:[#allocation28_spill]] %s8491_s1 }
   0x3   :  { %8530 = sst [smem:[#allocation29_spill]] %s8493_s3 }
   0x4   :  { %8531 = sst [smem:[#allocation30_spill]] %s8495_s5 }
   0x5   :  { %8532 = sst [smem:[#allocation31_spill]] %s8496_s6 }
   0x6   :  { %8533 = sst [smem:[#allocation32_spill]] %s8497_s7 }
   0x7   :  { %8534 = sst [smem:[#allocation33_spill]] %s8498_s8 }
   0x8   :  { %8535 = sst [smem:[#allocation34_spill]] %s8499_s9 }
   0x9   :  { %8536 = sst [smem:[#allocation35_spill]] %s8500_s10 }
   0xa   :  { %8537 = sst [smem:[#allocation36_spill]] %s8501_s11 }
   0xb   :  { %8538 = sst [smem:[#allocation37_spill]] %s8502_s12 }
   0xc   :  { %8539 = sst [smem:[#allocation38_spill]] %s8503_s13 }
   0xd   :  { %8540 = sst [smem:[#allocation39_spill]] %s8504_s14 }
   0xe   :  { %8541 = sst [smem:[#allocation40_spill]] %s8505_s15 }
   0xf   :  { %8542 = sst [smem:[#allocation41_spill]] %s8506_s16 }
  0x10   :  { %8543 = sst [smem:[#allocation42_spill]] %s8507_s17 }
  0x11   :  { %22 = vsyncpa [#allocation7], 0 }
  0x12   :  { %24 = vsyncpa [#allocation7 + $0x1], 0  ;;  %s6504_s24 = smov 0   ;;  %s6506_s25 = smov 0  }
  0x13   :  { %s6508_s26 = smov 0   ;;  %s6510_s27 = smov 0  }
  0x14   :  { %s6512_s28 = smov 0   ;;  %s6514_s29 = smov 0  }
  0x15   :  { %s6516_s0 = smov 0   ;;  %s6518_s30 = smov 0  }
  0x16   :  { %s6520_s18 = smov 0   ;;  %s6522_s19 = smov 0  }
  0x17   :  { %s6524_s1 = smov 0   ;;  %s6526_s20 = smov 0  }
  0x18 LB: > { %8544 = sst [smem:[#allocation9_spill]] %s6349_s24  ;;  %s4980_s21 = sadd.s32 4294967295, %s6393_s20   ;;  %s6393_s20 = sphi %s6526_s20, %s30_s20   ;;  %s6389_s1 = sphi %s6524_s1, %s8628_s1   ;;  %s6385_s19 = sphi %s6522_s19, %s8627_s19   ;;  %s6381_s18 = sphi %s6520_s18, %s8626_s18   ;;  %s6377_s30 = sphi %s6518_s30, %s8625_s30   ;;  %s6373_s0 = sphi %s6516_s0, %s8624_s0   ;;  %s6369_s29 = sphi %s6514_s29, %s8623_s29   ;;  %s6365_s28 = sphi %s6512_s28, %s8622_s28   ;;  %s6361_s27 = sphi %s6510_s27, %s8621_s27   ;;  %s6357_s26 = sphi %s6508_s26, %s8620_s26   ;;  %s6353_s25 = sphi %s6506_s25, %s8630_s25   ;;  %s6349_s24 = sphi %s6504_s24, %s8629_s24  }
  0x19   : > { %8545 = sst [smem:[#allocation10_spill]] %s6357_s26  ;;  %s4981_s22 = sadd.s32 4294967294, %s6393_s20  }
  0x1a   : > { %8546 = sst [smem:[#allocation11_spill]] %s6365_s28  ;;  %s42_s23 = sadd.s32 1, %s6381_s18 }
  0x1b   : > { %8547 = sst [smem:[#allocation12_spill]] %s6377_s30  ;;  %s45_s17 = sadd.s32 1, %s6385_s19 }
  0x1c   : > { %8548 = sst [smem:[#allocation13_spill]] %s6381_s18  ;;  %p43_p0 = scmp.ge.s32.totalorder %s42_s23, 4 }
  0x1d   : > { %8549 = sst [smem:[#allocation14_spill]] %s6385_s19  ;;  %s49_s16 = sadd.s32 1, %s6389_s1 }
  0x1e   : > { %8550 = sst [smem:[#allocation15_spill]] %s6389_s1  ;;  %s292_s14 = sadd.s32 1, %s6365_s28 }
  0x1f   : > { %8551 = sst [smem:[#allocation16_spill]] %s6393_s20  ;;  %p299_p1 = scmp.ne.s32.totalorder %s6365_s28, %s6361_s27 }
  0x20   : > { %s8632_s23 = smov (%p43_p0, %s42_s23), 0  ;;  %s8634_s17 = smov (!%p43_p0, %s45_s17), %s6385_s19 }
  0x21   : > { %8552 = sst [smem:[#allocation17_spill]] %s8632_s23  ;;  %s288_s13 = ssub.s32 %s6381_s18, %s8632_s23 }
  0x22   : > { %p300_p2 = scmp.eq.s32.totalorder %s6393_s20, 0  ;;  %p47_p3 = scmp.ge.s32.totalorder %s8634_s17, 2 }
  0x23   : > { %s484_s15 = sadd.s32 1, %s6357_s26  ;;  %p494_p5 = scmp.ne.s32.totalorder %s6357_s26, %s6353_s25 }
  0x24   : > { %p6579_p4 = por %p300_p2, %p299_p1  ;;  %s8636_s17 = smov (%p47_p3, %s8634_s17), 0 }
  0x25   : > { %8554 = sst [smem:[#allocation18_spill]] %s8636_s17  ;;  %s8638_s16 = smov (!%p47_p3, %s49_s16), %s6389_s1 }
  0x26   : > { %s287_s12 = ssub.s32 %s6385_s19, %s8636_s17  ;;  %p495_p6 = scmp.eq.s32.totalorder %s4980_s21, 15 }
  0x27   : > { %p51_p7 = scmp.ge.s32.totalorder %s8638_s16, 2  ;;  %s289_s23 = sor.u32 %s288_s13, %s287_s12 }
  0x28   : > { %p290_p8 = scmp.eq.s32.totalorder %s289_s23, 0  ;;  %p6590_p9 = por %p495_p6, %p494_p5 }
  0x29   : > { %s8640_s16 = smov (%p51_p7, %s8638_s16), 0  ;;  %p500_p10 = scmp.ne.s32.totalorder %s6353_s25, %s6349_s24 }
  0x2a   : > { %s8555_s10 = scalar_select %p6590_p9, 1, 0 }
  0x2b   : > { %8557 = sst [smem:[#allocation20_spill]] %s8640_s16  ;;  %s481_s7 = ssub.s32 %s6389_s1, %s8640_s16 }
  0x2c   : > { %8556 = sst [smem:[#allocation19_spill]] %s8555_s10  ;;  %p482_p11 = scmp.eq.s32.totalorder %s481_s7, 0 }
  0x2d   : > { %s6597_s8 = scalar_select %p290_p8, %s6365_s28, %s292_s14  }
  0x2e   : > { %p501_p12 = scmp.eq.s32.totalorder %s4981_s22, 15  ;;  %p4983_p0 = scmp.ge.s32.totalorder %s6393_s20, 16 }
  0x2f   : > { %8558 = sst [smem:[#allocation21_spill]] %s6597_s8 }
  0x30   : > { %s6604_s6 = scalar_select %p482_p11, %s6357_s26, %s484_s15  }
  0x31   : > { %p6606_p13 = por %p501_p12, %p500_p10  ;;  %529 = sbr.rel (%p4983_p0) target bundleno = 70 (0x46), region = 32 }
  0x32   : > { %8559 = sst [smem:[#allocation22_spill]] %s6604_s6 }
  0x33   : > { %s8560_s21 = scalar_select %p6606_p13, 1, 0 }
  0x35   : > { %8561 = sst [smem:[#allocation23_spill]] %s8560_s21 }
  0x38   : > { %592 = sbr.rel (!%p6579_p4) target bundleno = 70 (0x46), region = 72  ;;  %s594_s12 = sand.u32 (%p6579_p4), 1, %s6365_s28  }
  0x39   : > { %s4985_s13 = sshll.u32 (%p6579_p4), %s6381_s18, 2  ;;  %s4984_s14 = sshll.u32 (%p6579_p4), %s594_s12, 6 }
  0x3a   : > { %s4986_s7 = sshll.u32 (%p6579_p4), %s6385_s19, 6  ;;  %s8562_s9 = sld [smem:[#allocation34_spill]] (%p6579_p4) }
  0x3b   : > { %s599_s22 = sadd.s32 (%p6579_p4), %s4986_s7, %s4985_s13  ;;  %s596_s1 = scalar_lea.vmem (%p6579_p4), [#allocation5], %s4984_s14 }
  0x3c   : > { %s4987_s15 = sshll.u32 (%p6579_p4), %s599_s22, 2 }
  0x40   : > { %s601_s17 = scalar_lea.vmem %s8562_s9, %s4987_s15 }
  0x41   : > { %v614_v0 = vld [vmem:[%s601_s17] sm:$0xff]  ;;  %v616_v1 = vld [vmem:[%s601_s17 + $0x8] sm:$0xff] }
  0x42   : > { %v618_v2 = vld [vmem:[%s601_s17 + $0x40] sm:$0xff]  ;;  %615 = vst [vmem:[%s596_s1] sm:$0xff] %v614_v0  ;;  %617 = vst [vmem:[%s596_s1 + $0x8] sm:$0xff] %v616_v1  ;;  %v620_v3 = vld [vmem:[%s601_s17 + $0x48] sm:$0xff] }
  0x43   : > { %619 = vst [vmem:[%s596_s1 + $0x10] sm:$0xff] %v618_v2  ;;  %v622_v4 = vld [vmem:[%s601_s17 + $0x80] sm:$0xff]  ;;  %v624_v5 = vld [vmem:[%s601_s17 + $0x88] sm:$0xff]  ;;  %621 = vst [vmem:[%s596_s1 + $0x18] sm:$0xff] %v620_v3 }
  0x44   : > { %623 = vst [vmem:[%s596_s1 + $0x20] sm:$0xff] %v622_v4  ;;  %625 = vst [vmem:[%s596_s1 + $0x28] sm:$0xff] %v624_v5  ;;  %v626_v6 = vld [vmem:[%s601_s17 + $0xc0] sm:$0xff]  ;;  %v628_v7 = vld [vmem:[%s601_s17 + $0xc8] sm:$0xff] }
  0x45   : > { %627 = vst [vmem:[%s596_s1 + $0x30] sm:$0xff] %v626_v6  ;;  %629 = vst [vmem:[%s596_s1 + $0x38] sm:$0xff] %v628_v7 }
  0x46 PF: > { %p4988_p1 = scmp.ge.s32.totalorder %s6393_s20, 1  ;;  %p665_p2 = scmp.lt.s32.totalorder %s6393_s20, 17 }
  0x48   : > { %p666_p3 = pnand %p4988_p1, %p665_p2 }
  0x49   : > { %s672_s11 = sand.u32 (!%p666_p3), 1, %s6361_s27   ;;  %p775_p4 = scmp.lt.s32.totalorder (!%p666_p3), %s6377_s30, 1 }
  0x4a   : > { %669 = sbr.rel (%p666_p3) target bundleno = 5235 (0x1473), region = 107  ;;  %s6623_s17 = sshll.u32 (!%p666_p3), %s672_s11, 6 }
  0x4b   : > { %p780_p5 = scmp.lt.s32.totalorder (!%p666_p3), %s6373_s0, 1  ;;  %s4996_s1 = sshll.u32 (!%p666_p3), %s6369_s29, 2 }
  0x4c   : > { %p812_p6 = scmp.lt.s32.totalorder (!%p666_p3), %s4996_s1, 15  ;;  %s8563_s22 = sld [smem:[#allocation27_spill]] (!%p666_p3) }
  0x4d   : > { %s8565_s3 = sld [smem:[#allocation29_spill]] (!%p666_p3)  ;;  %s8566_s5 = sld [smem:[#allocation30_spill]] (!%p666_p3) }
  0x4e   : > { %s8568_s6 = sld [smem:[#allocation32_spill]] (!%p666_p3)  ;;  %s4998_s21 = sshll.u32 (!%p666_p3), %s6369_s29, 6 }
  0x4f   : > { %p821_p7 = scmp.lt.s32.totalorder (!%p666_p3), %s4998_s21, 255  ;;  %s8570_s10 = sld [smem:[#allocation35_spill]] (!%p666_p3) }
  0x50   : > { %s8571_s18 = sld [smem:[#allocation37_spill]] (!%p666_p3)  ;;  %s8572_s9 = sld [smem:[#allocation36_spill]] (!%p666_p3) }
  0x51   : > { %s776_s12 = scalar_select %p775_p4, %s6377_s30, 1 }
  0x52   : > { %s6630_s13 = scalar_select %p780_p5, %s6373_s0, 1 }
  0x53   : > { %s5124_s14 = sshll.u32 %s776_s12, 7  ;;  %s8642_s1 = smov (!%p812_p6, %s4996_s1), 15 }
  0x54   : > { %s6635_s15 = scalar_lea.vmem %s8563_s22, %s5124_s14  ;;  %s5125_s28 = sshll.u32 %s6630_s13, 4 }
  0x55   : > { %s6649_s12 = scalar_lea.vmem %s8565_s3, %s5125_s28  ;;  %s6658_s22 = scalar_lea.vmem %s8566_s5, %s5125_s28 }
  0x56   : > { %s804_s26 = scalar_lea.vmem %s8568_s6, %s6630_s13  ;;  %s4999_s14 = sshll.u32 %s6630_s13, 8 }
  0x57   : > { %s815_s27 = sadd.s32 %s5125_s28, %s8642_s1  ;;  %s830_s19 = scalar_lea.vmem %s8571_s18, %s6630_s13 }
  0x58   : > { %s6677_s30 = scalar_lea.vmem %s8570_s10, %s815_s27  ;;  %s8644_s21 = smov (!%p821_p7, %s4998_s21), 255 }
  0x59   : > { %s824_s8 = sadd.s32 %s4999_s14, %s8644_s21  ;;  %s6689_s24 = scalar_lea.vmem [#allocation5], %s6623_s17 }
  0x5a   : > { %s5000_s11 = sshll.u32 %s824_s8, 2  ;;  %s8573_s28 = sand.u32 1, %s6353_s25  }
  0x5b   : > { %s6686_s20 = scalar_lea.vmem %s8572_s9, %s5000_s11  ;;  %s6693_s1 = scalar_lea.vmem [#allocation6], %s8573_s28 }
  0x5c   : > { %p5001_p8 = scmp.ne.s32.totalorder %s6369_s29, 0 }
  0x5e   : > { %835 = sbr.rel (%p5001_p8) target bundleno = 4196 (0x1064), region = 115 }
  0x65   : > { %p5002_p10 = scmp.ne.s32.totalorder %s6373_s0, 0 }
  0x66   : > { %v840_v8 = vld [vmem:[%s6635_s15] sm:$0xff] (!%p5002_p10)  ;;  %vm856_vm0 = vcmask (!%p5002_p10), 261120   ;;  %v841_v9 = vld [vmem:[%s6635_s15 + $0x8] sm:$0xff] (!%p5002_p10)  ;;  %v842_v10 = vld [vmem:[%s6635_s15 + $0x10] sm:$0xff] (!%p5002_p10) }
  0x67   : > { %839 = sbr.rel (%p5002_p10) target bundleno = 111 (0x6f), region = 119  ;;  %857 = vst.msk [vmem:[#allocation2] sm:$0xff] (!%p5002_p10), %vm856_vm0, %v840_v8  ;;  %858 = vst.msk [vmem:[#allocation2 + $0x8] sm:$0xff] (!%p5002_p10), %vm856_vm0, %v841_v9  ;;  %v843_v11 = vld [vmem:[%s6635_s15 + $0x18] sm:$0xff] (!%p5002_p10)  ;;  %v844_v12 = vld [vmem:[%s6635_s15 + $0x20] sm:$0xff] (!%p5002_p10) }
  0x68   : > { %859 = vst.msk [vmem:[#allocation2 + $0x10] sm:$0xff] (!%p5002_p10), %vm856_vm0, %v842_v10  ;;  %v845_v13 = vld [vmem:[%s6635_s15 + $0x28] sm:$0xff] (!%p5002_p10)  ;;  %860 = vst.msk [vmem:[#allocation2 + $0x18] sm:$0xff] (!%p5002_p10), %vm856_vm0, %v843_v11  ;;  %v846_v14 = vld [vmem:[%s6635_s15 + $0x30] sm:$0xff] (!%p5002_p10) }
  0x69   : > { %861 = vst.msk [vmem:[#allocation2 + $0x20] sm:$0xff] (!%p5002_p10), %vm856_vm0, %v844_v12  ;;  %862 = vst.msk [vmem:[#allocation2 + $0x28] sm:$0xff] (!%p5002_p10), %vm856_vm0, %v845_v13  ;;  %v847_v15 = vld [vmem:[%s6635_s15 + $0x38] sm:$0xff] (!%p5002_p10)  ;;  %v848_v16 = vld [vmem:[%s6635_s15 + $0x40] sm:$0xff] (!%p5002_p10) }
  0x6a   : > { %863 = vst.msk [vmem:[#allocation2 + $0x30] sm:$0xff] (!%p5002_p10), %vm856_vm0, %v846_v14  ;;  %864 = vst.msk [vmem:[#allocation2 + $0x38] sm:$0xff] (!%p5002_p10), %vm856_vm0, %v847_v15  ;;  %v849_v17 = vld [vmem:[%s6635_s15 + $0x48] sm:$0xff] (!%p5002_p10)  ;;  %v850_v18 = vld [vmem:[%s6635_s15 + $0x50] sm:$0xff] (!%p5002_p10) }
  0x6b   : > { %865 = vst.msk [vmem:[#allocation2 + $0x40] sm:$0xff] (!%p5002_p10), %vm856_vm0, %v848_v16  ;;  %v851_v19 = vld [vmem:[%s6635_s15 + $0x58] sm:$0xff] (!%p5002_p10)  ;;  %866 = vst.msk [vmem:[#allocation2 + $0x48] sm:$0xff] (!%p5002_p10), %vm856_vm0, %v849_v17  ;;  %v852_v20 = vld [vmem:[%s6635_s15 + $0x60] sm:$0xff] (!%p5002_p10) }
  0x6c   : > { %867 = vst.msk [vmem:[#allocation2 + $0x50] sm:$0xff] (!%p5002_p10), %vm856_vm0, %v850_v18  ;;  %868 = vst.msk [vmem:[#allocation2 + $0x58] sm:$0xff] (!%p5002_p10), %vm856_vm0, %v851_v19  ;;  %v853_v21 = vld [vmem:[%s6635_s15 + $0x68] sm:$0xff] (!%p5002_p10)  ;;  %v854_v22 = vld [vmem:[%s6635_s15 + $0x70] sm:$0xff] (!%p5002_p10) }
  0x6d   : > { %869 = vst.msk [vmem:[#allocation2 + $0x60] sm:$0xff] (!%p5002_p10), %vm856_vm0, %v852_v20  ;;  %870 = vst.msk [vmem:[#allocation2 + $0x68] sm:$0xff] (!%p5002_p10), %vm856_vm0, %v853_v21  ;;  %v855_v23 = vld [vmem:[%s6635_s15 + $0x78] sm:$0xff] (!%p5002_p10) }
  0x6e   : > { %871 = vst.msk [vmem:[#allocation2 + $0x70] sm:$0xff] %vm856_vm0, %v854_v22  ;;  %872 = vst.msk [vmem:[#allocation2 + $0x78] sm:$0xff] %vm856_vm0, %v855_v23 }
  0x6f PF: > { %v873_v24 = vld [vmem:[#allocation2] sm:$0xff]  ;;  %vm891_vm1 = vcmask 261120   ;;  %v874_v26 = vld [vmem:[#allocation2 + $0x8] sm:$0xff]  ;;  %s8574_s17 = sld [smem:[#allocation28_spill]]  ;;  %s8576_s21 = scalar_lea.vmem %s8492_s2, %s6630_s13  ;;  %vm1333_vm2 = vcmask 64512   ;;  %vm2258_vm4 = vcmask 130112  }
  0x70   : > { %v875_v25 = vld [vmem:[#allocation2 + $0x10] sm:$0xff]  ;;  %v892_v27 = vsel %vm891_vm1, %v873_v24, 0.0  ;;  %v876_v29 = vld [vmem:[#allocation2 + $0x18] sm:$0xff]  ;;  %v895_v31 = vsel %vm891_vm1, %v874_v26, 0.0  ;;  %s8577_s16 = scalar_lea.vmem %s8494_s4, %s6630_s13  ;;  %s6395_s23 = smov 96   ;;  %vm2757_vm5 = vcmask 195712  }
  0x71   : > { %v898_v28 = vsel %vm891_vm1, %v875_v25, 0.0  ;;  %893 = vadd.xlane.f32.xlu0 %v892_v27  ;;  %v6731_v30 = vld [vmem:[#allocation2 + $0x20] sm:$0xff]  ;;  %v901_v32 = vsel %vm891_vm1, %v876_v29, 0.0  ;;  %v878_v33 = vld [vmem:[#allocation2 + $0x28] sm:$0xff]  ;;  %s6396_s18 = smov 64   ;;  %s6397_s8 = smov 88  }
  0x72   : > { %899 = vadd.xlane.f32.xlu1 %v898_v28  ;;  %v904_v34 = vsel %vm891_vm1, %v6731_v30, 0.0  ;;  %v907_v35 = vsel %vm891_vm1, %v878_v33, 0.0  ;;  %v6738_v36 = vld [vmem:[#allocation2 + $0x30] sm:$0xff]  ;;  %v6740_v37 = vld [vmem:[#allocation2 + $0x38] sm:$0xff]  ;;  %s6399_s11 = smov 120   ;;  %s6400_s6 = smov 56  }
  0x73   : > { %v910_v38 = vsel %vm891_vm1, %v6738_v36, 0.0  ;;  %v913_v39 = vsel %vm891_vm1, %v6740_v37, 0.0  ;;  %v6746_v40 = vld [vmem:[#allocation2 + $0x40] sm:$0xff]  ;;  %v6748_v41 = vld [vmem:[#allocation2 + $0x48] sm:$0xff]  ;;  %s6401_s3 = smov 80   ;;  %s6402_s9 = smov 112  }
  0x74   : > { %v916_v42 = vsel %vm891_vm1, %v6746_v40, 0.0  ;;  %v919_v43 = vsel %vm891_vm1, %v6748_v41, 0.0  ;;  %v6754_v44 = vld [vmem:[#allocation2 + $0x50] sm:$0xff]  ;;  %v6756_v45 = vld [vmem:[#allocation2 + $0x58] sm:$0xff]  ;;  %s6403_s28 = smov 48   ;;  %s6404_s5 = smov 72  }
  0x75   : > { %896 = vadd.xlane.f32.xlu0 %v895_v31  ;;  %v922_v46 = vsel %vm891_vm1, %v6754_v44, 0.0  ;;  %v925_v47 = vsel %vm891_vm1, %v6756_v45, 0.0  ;;  %v6762_v48 = vld [vmem:[#allocation2 + $0x60] sm:$0xff]  ;;  %v6764_v49 = vld [vmem:[#allocation2 + $0x68] sm:$0xff]  ;;  %v6770_v52 = vld [vmem:[#allocation2 + $0x70] sm:$0xff]  ;;  %s8575_s15 = scalar_lea.vmem %s8574_s17, %s6630_s13  ;;  %s6405_s10 = smov 104  }
  0x76   : > { %902 = vadd.xlane.f32.xlu1 %v901_v32  ;;  %v928_v50 = vsel %vm891_vm1, %v6762_v48, 0.0  ;;  %v931_v51 = vsel %vm891_vm1, %v6764_v49, 0.0  ;;  %v6772_v53 = vld [vmem:[#allocation2 + $0x78] sm:$0xff]  ;;  %v934_v54 = vsel %vm891_vm1, %v6770_v52, 0.0  ;;  %s6406_s17 = smov 40   ;;  %s6409_s14 = smov 24  }
  0x77   : > { %v937_v55 = vsel %vm891_vm1, %v6772_v53, 0.0  ;;  %vm3256_vm6 = vcmask 261312   ;;  %s8600_s27 = sld [smem:[#allocation31_spill]] }
  0x79   : > { %905 = vadd.xlane.f32.xlu0 %v904_v34 }
  0x7a   : > { %908 = vadd.xlane.f32.xlu1 %v907_v35 }
  0x7d   : > { %911 = vadd.xlane.f32.xlu0 %v910_v38  ;;  %s8601_s7 = scalar_lea.vmem %s8600_s27, %s6630_s13 }
  0x7e   : > { %914 = vadd.xlane.f32.xlu1 %v913_v39 }
  0x81   : > { %917 = vadd.xlane.f32.xlu0 %v916_v42 }
  0x82   : > { %920 = vadd.xlane.f32.xlu1 %v919_v43 }
  0x85   : > { %923 = vadd.xlane.f32.xlu0 %v922_v46 }
  0x86   : > { %926 = vadd.xlane.f32.xlu1 %v925_v47 }
  0x89   : > { %929 = vadd.xlane.f32.xlu0 %v928_v50 }
  0x8a   : > { %932 = vadd.xlane.f32.xlu1 %v931_v51 }
  0x8d   : > { %935 = vadd.xlane.f32.xlu0 %v934_v54 }
  0x8e   : > { %938 = vadd.xlane.f32.xlu1 %v937_v55 }
  0xfe   : > { %v894_v56 = vpop.xlane.xlu0 %893 }
  0xff   : > { %v900_v57 = vpop.xlane.xlu1 %899  ;;  %v941_v58 = vmul.f32 0.03125, %v894_v56 }
 0x100   : > { %v943_v59 = vmul.f32 0.03125, %v900_v57 }
 0x101   : > { %v6778_v60 = vsub.f32 %v873_v24, %v941_v58 }
 0x102   : > { %v6780_v61 = vsub.f32 %v875_v25, %v943_v59  ;;  %v897_v62 = vpop.xlane.xlu0 %896 }
 0x103   : > { %v903_v63 = vpop.xlane.xlu1 %902  ;;  %v942_v0 = vmul.f32 0.03125, %v897_v62  ;;  %v973_v2 = vmul.f32 %v6778_v60, %v6778_v60 }
 0x104   : > { %v944_v1 = vmul.f32 0.03125, %v903_v63  ;;  %v975_v3 = vmul.f32 %v6780_v61, %v6780_v61 }
 0x105   : > { %v6786_v4 = vsub.f32 %v874_v26, %v942_v0  ;;  %v989_v6 = vsel %vm891_vm1, %v973_v2, 0.0 }
 0x106   : > { %v6788_v5 = vsub.f32 %v876_v29, %v944_v1  ;;  %990 = vadd.xlane.f32.xlu0 %v989_v6  ;;  %v906_v7 = vpop.xlane.xlu0 %905  ;;  %v995_v9 = vsel %vm891_vm1, %v975_v3, 0.0 }
 0x107   : > { %v909_v8 = vpop.xlane.xlu1 %908  ;;  %v945_v10 = vmul.f32 0.03125, %v906_v7  ;;  %v974_v12 = vmul.f32 %v6786_v4, %v6786_v4 }
 0x108   : > { %v946_v11 = vmul.f32 0.03125, %v909_v8  ;;  %v976_v13 = vmul.f32 %v6788_v5, %v6788_v5 }
 0x109   : > { %v6797_v14 = vsub.f32 %v6731_v30, %v945_v10  ;;  %v992_v16 = vsel %vm891_vm1, %v974_v12, 0.0 }
 0x10a   : > { %v6799_v15 = vsub.f32 %v878_v33, %v946_v11  ;;  %996 = vadd.xlane.f32.xlu0 %v995_v9  ;;  %993 = vadd.xlane.f32.xlu1 %v992_v16  ;;  %v912_v17 = vpop.xlane.xlu0 %911  ;;  %v998_v19 = vsel %vm891_vm1, %v976_v13, 0.0  ;;  %v5880_v13 = vld [vmem:[%s6649_s12 + $0x8] sm:$0xff]  }
 0x10b   : > { %v915_v18 = vpop.xlane.xlu1 %914  ;;  %v947_v20 = vmul.f32 0.03125, %v912_v17  ;;  %v977_v22 = vmul.f32 %v6797_v14, %v6797_v14 }
 0x10c   : > { %v948_v21 = vmul.f32 0.03125, %v915_v18  ;;  %v978_v23 = vmul.f32 %v6799_v15, %v6799_v15 }
 0x10d   : > { %v6808_v24 = vsub.f32 %v6738_v36, %v947_v20  ;;  %v1001_v26 = vsel %vm891_vm1, %v977_v22, 0.0 }
 0x10e   : > { %v6811_v25 = vsub.f32 %v6740_v37, %v948_v21  ;;  %999 = vadd.xlane.f32.xlu1 %v998_v19  ;;  %1002 = vadd.xlane.f32.xlu0 %v1001_v26  ;;  %v918_v27 = vpop.xlane.xlu0 %917  ;;  %v1004_v29 = vsel %vm891_vm1, %v978_v23, 0.0 }
 0x10f   : > { %v921_v28 = vpop.xlane.xlu1 %920  ;;  %v949_v30 = vmul.f32 0.03125, %v918_v27  ;;  %v979_v32 = vmul.f32 %v6808_v24, %v6808_v24 }
 0x110   : > { %v950_v31 = vmul.f32 0.03125, %v921_v28  ;;  %v980_v33 = vmul.f32 %v6811_v25, %v6811_v25 }
 0x111   : > { %v6820_v34 = vsub.f32 %v6746_v40, %v949_v30  ;;  %v1007_v36 = vsel %vm891_vm1, %v979_v32, 0.0 }
 0x112   : > { %v6823_v35 = vsub.f32 %v6748_v41, %v950_v31  ;;  %1005 = vadd.xlane.f32.xlu1 %v1004_v29  ;;  %1008 = vadd.xlane.f32.xlu0 %v1007_v36  ;;  %v924_v37 = vpop.xlane.xlu0 %923  ;;  %v1010_v39 = vsel %vm891_vm1, %v980_v33, 0.0 }
 0x113   : > { %v927_v38 = vpop.xlane.xlu1 %926  ;;  %v951_v42 = vmul.f32 0.03125, %v924_v37  ;;  %v981_v46 = vmul.f32 %v6820_v34, %v6820_v34 }
 0x114   : > { %v952_v43 = vmul.f32 0.03125, %v927_v38  ;;  %v982_v40 = vmul.f32 %v6823_v35, %v6823_v35 }
 0x115   : > { %v6832_v47 = vsub.f32 %v6754_v44, %v951_v42  ;;  %v1013_v50 = vsel %vm891_vm1, %v981_v46, 0.0 }
 0x116   : > { %v6835_v41 = vsub.f32 %v6756_v45, %v952_v43  ;;  %1011 = vadd.xlane.f32.xlu1 %v1010_v39  ;;  %1014 = vadd.xlane.f32.xlu0 %v1013_v50  ;;  %v930_v51 = vpop.xlane.xlu0 %929  ;;  %v1016_v55 = vsel %vm891_vm1, %v982_v40, 0.0 }
 0x117   : > { %v933_v54 = vpop.xlane.xlu1 %932  ;;  %v953_v56 = vmul.f32 0.03125, %v930_v51  ;;  %v983_v58 = vmul.f32 %v6832_v47, %v6832_v47 }
 0x118   : > { %v954_v57 = vmul.f32 0.03125, %v933_v54  ;;  %v984_v44 = vmul.f32 %v6835_v41, %v6835_v41 }
 0x119   : > { %v6844_v59 = vsub.f32 %v6762_v48, %v953_v56  ;;  %v1019_v62 = vsel %vm891_vm1, %v983_v58, 0.0 }
 0x11a   : > { %v6847_v45 = vsub.f32 %v6764_v49, %v954_v57  ;;  %1017 = vadd.xlane.f32.xlu1 %v1016_v55  ;;  %1020 = vadd.xlane.f32.xlu0 %v1019_v62  ;;  %v936_v63 = vpop.xlane.xlu0 %935  ;;  %v1022_v1 = vsel %vm891_vm1, %v984_v44, 0.0  ;;  %v6877_v55 = vld [vmem:[%s8575_s15] ss:$0 sm:$0xff]  ;;  %s6407_s15 = smov 8  }
 0x11b   : > { %v939_v0 = vpop.xlane.xlu1 %938  ;;  %v955_v2 = vmul.f32 0.03125, %v936_v63  ;;  %v985_v6 = vmul.f32 %v6844_v59, %v6844_v59 }
 0x11c   : > { %v956_v3 = vmul.f32 0.03125, %v939_v0  ;;  %v986_v48 = vmul.f32 %v6847_v45, %v6847_v45 }
 0x11d   : > { %v6856_v49 = vsub.f32 %v6770_v52, %v955_v2  ;;  %v1025_v8 = vsel %vm891_vm1, %v985_v6, 0.0 }
 0x11e   : > { %v6859_v7 = vsub.f32 %v6772_v53, %v956_v3  ;;  %1023 = vadd.xlane.f32.xlu1 %v1022_v1  ;;  %1026 = vadd.xlane.f32.xlu0 %v1025_v8  ;;  %v1028_v9 = vsel %vm891_vm1, %v986_v48, 0.0  ;;  %v5879_v53 = vld [vmem:[%s6649_s12] sm:$0xff]   ;;  %s6408_s12 = smov 16  }
 0x11f   : > { %v987_v10 = vmul.f32 %v6856_v49, %v6856_v49  ;;  %5406 = vmatprep.subr.bf16.mxu0 %v5879_v53  ;;  %v6886_v3 = vld [vmem:[%s8576_s21] ss:$0 sm:$0xff] }
 0x120   : > { %v988_v11 = vmul.f32 %v6859_v7, %v6859_v7  ;;  %5407 = vmatpush3.bf16.msra.mxu0 %v5879_v53 }
 0x121   : > { %v1031_v12 = vsel %vm891_vm1, %v987_v10, 0.0  ;;  %5408 = vmatprep.subr.bf16.mxu0 %v5880_v13 }
 0x122   : > { %1029 = vadd.xlane.f32.xlu1 %v1028_v9  ;;  %1032 = vadd.xlane.f32.xlu0 %v1031_v12  ;;  %v1034_v52 = vsel %vm891_vm1, %v988_v11, 0.0 }
 0x124   : > { %5409 = vmatpush3.bf16.msra.mxu0 %v5880_v13 }
 0x126   : > { %1035 = vadd.xlane.f32.xlu1 %v1034_v52 }
 0x193   : > { %v991_v16 = vpop.xlane.xlu0 %990 }
 0x194   : > { %v1037_v17 = vmul.f32 0.03125, %v991_v16 }
 0x196   : > { %v1053_v18 = vadd.f32 1e-05, %v1037_v17 }
 0x197   : > { %v994_v19 = vpop.xlane.xlu1 %993  ;;  %v997_v20 = vpop.xlane.xlu0 %996 }
 0x198   : > { %5883 = vrsqrt.f32 %v1053_v18  ;;  %v1038_v21 = vmul.f32 0.03125, %v994_v19  ;;  %v1039_v22 = vmul.f32 0.03125, %v997_v20 }
 0x19a   : > { %v1054_v23 = vadd.f32 1e-05, %v1038_v21  ;;  %v1055_v26 = vadd.f32 1e-05, %v1039_v22 }
 0x19b   : > { %v1000_v27 = vpop.xlane.xlu1 %999  ;;  %v1003_v28 = vpop.xlane.xlu0 %1002 }
 0x19c   : > { %5885 = vrsqrt.f32 %v1054_v23  ;;  %v1040_v29 = vmul.f32 0.03125, %v1000_v27  ;;  %v1041_v30 = vmul.f32 0.03125, %v1003_v28 }
 0x19d   : > { %5887 = vrsqrt.f32 %v1055_v26 }
 0x19e   : > { %v1056_v31 = vadd.f32 1e-05, %v1040_v29  ;;  %v1057_v32 = vadd.f32 1e-05, %v1041_v30 }
 0x19f   : > { %v1006_v33 = vpop.xlane.xlu1 %1005  ;;  %v1009_v36 = vpop.xlane.xlu0 %1008 }
 0x1a0   : > { %5889 = vrsqrt.f32 %v1056_v31  ;;  %v1042_v37 = vmul.f32 0.03125, %v1006_v33  ;;  %v1043_v38 = vmul.f32 0.03125, %v1009_v36 }
 0x1a1   : > { %5891 = vrsqrt.f32 %v1057_v32 }
 0x1a2   : > { %v5884_v39 = vpop.eup %5883  ;;  %v1058_v42 = vadd.f32 1e-05, %v1042_v37  ;;  %v1059_v43 = vadd.f32 1e-05, %v1043_v38 }
 0x1a3   : > { %v1012_v46 = vpop.xlane.xlu1 %1011  ;;  %v1015_v40 = vpop.xlane.xlu0 %1014  ;;  %v1085_v50 = vmul.f32 %v5884_v39, %v6778_v60 }
 0x1a4   : > { %5893 = vrsqrt.f32 %v1058_v42  ;;  %v1044_v51 = vmul.f32 0.03125, %v1012_v46  ;;  %v1045_v54 = vmul.f32 0.03125, %v1015_v40 }
 0x1a5   : > { %5895 = vrsqrt.f32 %v1059_v43  ;;  %v1107_v60 = vmul.f32 %v6877_v55, %v1085_v50 }
 0x1a6   : > { %v5886_v56 = vpop.eup %5885  ;;  %v1060_v57 = vadd.f32 1e-05, %v1044_v51  ;;  %v1061_v58 = vadd.f32 1e-05, %v1045_v54 }
 0x1a7   : > { %v5888_v44 = vpop.eup %5887  ;;  %v1018_v62 = vpop.xlane.xlu1 %1017  ;;  %v1086_v0 = vmul.f32 %v5886_v56, %v6786_v4  ;;  %v1129_v52 = vadd.f32 %v6886_v3, %v1107_v60 }
 0x1a8   : > { %v1021_v63 = vpop.xlane.xlu0 %1020  ;;  %5897 = vrsqrt.f32 %v1060_v57  ;;  %v1046_v1 = vmul.f32 0.03125, %v1018_v62  ;;  %v1087_v6 = vmul.f32 %v5888_v44, %v6780_v61 }
 0x1a9   : > { %v1047_v2 = vmul.f32 0.03125, %v1021_v63  ;;  %5899 = vrsqrt.f32 %v1061_v58  ;;  %v1108_v48 = vmul.f32 %v6877_v55, %v1086_v0 }
 0x1aa   : > { %v5890_v8 = vpop.eup %5889  ;;  %v1062_v9 = vadd.f32 1e-05, %v1046_v1  ;;  %v1109_v16 = vmul.f32 %v6877_v55, %v1087_v6 }
 0x1ab   : > { %v1063_v10 = vadd.f32 1e-05, %v1047_v2  ;;  %v5892_v4 = vpop.eup %5891  ;;  %v1024_v11 = vpop.xlane.xlu1 %1023  ;;  %v1130_v53 = vadd.f32 %v6886_v3, %v1108_v48  ;;  %v1088_v13 = vmul.f32 %v5890_v8, %v6788_v5 }
 0x1ac   : > { %v1027_v12 = vpop.xlane.xlu0 %1026  ;;  %5901 = vrsqrt.f32 %v1062_v9  ;;  %v1048_v17 = vmul.f32 0.03125, %v1024_v11  ;;  %v1089_v20 = vmul.f32 %v5892_v4, %v6797_v14  ;;  %v1131_v5 = vadd.f32 %v6886_v3, %v1109_v16 }
 0x1ad   : > { %v1049_v61 = vmul.f32 0.03125, %v1027_v12  ;;  %5903 = vrsqrt.f32 %v1063_v10  ;;  %v1145_v18 = vpack.c.bf16 %v1130_v53, %v1129_v52  ;;  %v1110_v19 = vmul.f32 %v6877_v55, %v1088_v13 }
 0x1ae   : > { %v5894_v21 = vpop.eup %5893  ;;  %v1064_v22 = vadd.f32 1e-05, %v1048_v17  ;;  %v1111_v31 = vmul.f32 %v6877_v55, %v1089_v20 }
 0x1af   : > { %v1065_v23 = vadd.f32 1e-05, %v1049_v61  ;;  %v5896_v26 = vpop.eup %5895  ;;  %v1030_v27 = vpop.xlane.xlu1 %1029  ;;  %5410 = vmatprep.mubr.msk.bf16.mxu0 %vm891_vm1, %v1145_v18  ;;  %v1132_v29 = vadd.f32 %v6886_v3, %v1110_v19  ;;  %v1090_v30 = vmul.f32 %v5894_v21, %v6799_v15 }
 0x1b0   : > { %v1033_v28 = vpop.xlane.xlu0 %1032  ;;  %5905 = vrsqrt.f32 %v1064_v22  ;;  %v1050_v32 = vmul.f32 0.03125, %v1030_v27  ;;  %v1091_v14 = vmul.f32 %v5896_v26, %v6808_v24  ;;  %v1133_v15 = vadd.f32 %v6886_v3, %v1111_v31 }
 0x1b1   : > { %v1051_v33 = vmul.f32 0.03125, %v1033_v28  ;;  %5907 = vrsqrt.f32 %v1065_v23  ;;  %v1146_v36 = vpack.c.bf16 %v1132_v29, %v1131_v5  ;;  %v1112_v37 = vmul.f32 %v6877_v55, %v1090_v30 }
 0x1b2   : > { %v5898_v38 = vpop.eup %5897  ;;  %v1066_v39 = vadd.f32 1e-05, %v1050_v32  ;;  %v1113_v51 = vmul.f32 %v6877_v55, %v1091_v14 }
 0x1b3   : > { %v1067_v42 = vadd.f32 1e-05, %v1051_v33  ;;  %v5900_v43 = vpop.eup %5899  ;;  %v1036_v46 = vpop.xlane.xlu1 %1035  ;;  %5411 = vmatmul.mubr.msk.bf16.vlgmr.msra.gmra.mrb[0].mxu0 %vm891_vm1, %v1146_v36  ;;  %v1134_v40 = vadd.f32 %v6886_v3, %v1112_v37  ;;  %v1092_v50 = vmul.f32 %v5898_v38, %v6811_v25 }
 0x1b4   : > { %5909 = vrsqrt.f32 %v1066_v39  ;;  %v1052_v24 = vmul.f32 0.03125, %v1036_v46  ;;  %v1093_v54 = vmul.f32 %v5900_v43, %v6820_v34  ;;  %v1135_v63 = vadd.f32 %v6886_v3, %v1113_v51 }
 0x1b5   : > { %5911 = vrsqrt.f32 %v1067_v42  ;;  %v1147_v56 = vpack.c.bf16 %v1134_v40, %v1133_v15  ;;  %v1114_v57 = vmul.f32 %v6877_v55, %v1092_v50 }
 0x1b6   : > { %v5902_v58 = vpop.eup %5901  ;;  %v1068_v44 = vadd.f32 1e-05, %v1052_v24  ;;  %v1115_v60 = vmul.f32 %v6877_v55, %v1093_v54 }
 0x1b7   : > { %v5904_v62 = vpop.eup %5903  ;;  %5414 = vmatprep.mubr.msk.bf16.mxu0 %vm891_vm1, %v1147_v56  ;;  %v1136_v0 = vadd.f32 %v6886_v3, %v1114_v57  ;;  %v1094_v25 = vmul.f32 %v5902_v58, %v6823_v35 }
 0x1b8   : > { %5913 = vrsqrt.f32 %v1068_v44  ;;  %v1095_v34 = vmul.f32 %v5904_v62, %v6832_v47  ;;  %v1137_v8 = vadd.f32 %v6886_v3, %v1115_v60 }
 0x1b9   : > { %v1148_v1 = vpack.c.bf16 %v1136_v0, %v1135_v63  ;;  %v1116_v2 = vmul.f32 %v6877_v55, %v1094_v25 }
 0x1ba   : > { %v5906_v6 = vpop.eup %5905  ;;  %v1117_v35 = vmul.f32 %v6877_v55, %v1095_v34 }
 0x1bb   : > { %v5908_v48 = vpop.eup %5907  ;;  %5415 = vmatmul.mubr.msk.bf16.gmra.mrb[4].mxu0 %vm891_vm1, %v1148_v1  ;;  %v1138_v9 = vadd.f32 %v6886_v3, %v1116_v2  ;;  %v1096_v10 = vmul.f32 %v5906_v6, %v6835_v41 }
 0x1bc   : > { %v1097_v4 = vmul.f32 %v5908_v48, %v6844_v59  ;;  %v1139_v53 = vadd.f32 %v6886_v3, %v1117_v35 }
 0x1bd   : > { %v1149_v11 = vpack.c.bf16 %v1138_v9, %v1137_v8  ;;  %v1118_v47 = vmul.f32 %v6877_v55, %v1096_v10 }
 0x1be   : > { %v5910_v12 = vpop.eup %5909  ;;  %v1119_v17 = vmul.f32 %v6877_v55, %v1097_v4 }
 0x1bf   : > { %v5912_v52 = vpop.eup %5911  ;;  %5418 = vmatprep.mubr.msk.bf16.mxu0 %vm891_vm1, %v1149_v11  ;;  %v1140_v13 = vadd.f32 %v6886_v3, %v1118_v47  ;;  %v1098_v16 = vmul.f32 %v5910_v12, %v6847_v45 }
 0x1c0   : > { %v1099_v41 = vmul.f32 %v5912_v52, %v6856_v49  ;;  %v1141_v19 = vadd.f32 %v6886_v3, %v1119_v17 }
 0x1c1   : > { %v1150_v61 = vpack.c.bf16 %v1140_v13, %v1139_v53  ;;  %v1120_v59 = vmul.f32 %v6877_v55, %v1098_v16 }
 0x1c2   : > { %v5914_v18 = vpop.eup %5913  ;;  %v1121_v22 = vmul.f32 %v6877_v55, %v1099_v41 }
 0x1c3   : > { %5419 = vmatmul.mubr.msk.bf16.gmra.mrb[8].mxu0 %vm891_vm1, %v1150_v61  ;;  %v1142_v20 = vadd.f32 %v6886_v3, %v1120_v59  ;;  %v1100_v21 = vmul.f32 %v5914_v18, %v6859_v7  ;;  %v5005_v7 = vld [vmem:[%s8577_s16] ss:$0 sm:$0xff] }
 0x1c4   : > { %v1143_v49 = vadd.f32 %v6886_v3, %v1121_v22 }
 0x1c5   : > { %v1151_v45 = vpack.c.bf16 %v1142_v20, %v1141_v19  ;;  %v1122_v23 = vmul.f32 %v6877_v55, %v1100_v21 }
 0x1c7   : > { %5422 = vmatprep.mubr.msk.bf16.mxu0 %vm891_vm1, %v1151_v45  ;;  %v1144_v26 = vadd.f32 %v6886_v3, %v1122_v23 }
 0x1c9   : > { %v1152_v27 = vpack.c.bf16 %v1144_v26, %v1143_v49 }
 0x1cb   : > { %5423 = vmatmul.mubr.msk.bf16.gmra.mrb[12].mxu0 %vm891_vm1, %v1152_v27 }
 0x286   : > { %v5412_v28 = vpop.f32.mrb[0].mxu0 }
 0x287   : > { %v1234_v5 = vpop.f32.mrb[1].mxu0  ;;  %v1243_v30 = vadd.f32 %v5412_v28, %v5005_v7 }
 0x288   : > { %v5413_v29 = vpop.f32.mrb[2].mxu0  ;;  %v1235_v32 = vadd.f32 %v5005_v7, %v1234_v5  ;;  %v1305_v5 = vlaneseq }
 0x289   : > { %v1246_v31 = vadd.f32 %v5413_v29, %v5005_v7  ;;  %v1237_v55 = vpop.f32.mrb[3].mxu0 }
 0x28a   : > { %v1238_v33 = vadd.f32 %v5005_v7, %v1237_v55  ;;  %v1306_v29 = vand.u32 127, %v1305_v5 }
 0x28b   : > { %v6946_v14 = vpack.c.bf16 %v1246_v31, %v1243_v30  ;;  %v6398_v30 = vmov -1e+30  }
 0x28c   : > { %v6948_v3 = vpack.c.bf16 %v1238_v33, %v1235_v32  ;;  %vm1307_vm3 = vcmp.lt.s32.totalorder %v1306_v29, 17 }
 0x28d   : > { %1319 = vrot.lane.b32.xlu1 %v6946_v14, %s6395_s23  ;;  %v7026_v31 = vsel %vm1307_vm3, 0.0, %v6398_v30 }
 0x28e   : > { %1317 = vrot.lane.b32.xlu0 %v6948_v3, %s6395_s23  ;;  %v5416_v36 = vpop.f32.mrb[4].mxu0  ;;  %5442 = vmatprep.mubr.msk.bf16.mxu1 %vm1333_vm2, %v6948_v3 }
 0x28f   : > { %v1250_v37 = vpop.f32.mrb[5].mxu0  ;;  %v1259_v39 = vadd.f32 %v5416_v36, %v5005_v7 }
 0x290   : > { %v5417_v38 = vpop.f32.mrb[6].mxu0  ;;  %v1251_v46 = vadd.f32 %v5005_v7, %v1250_v37 }
 0x291   : > { %v1262_v42 = vadd.f32 %v5417_v38, %v5005_v7  ;;  %v1253_v43 = vpop.f32.mrb[7].mxu0 }
 0x292   : > { %v1254_v15 = vadd.f32 %v5005_v7, %v1253_v43 }
 0x293   : > { %v6956_v40 = vpack.c.bf16 %v1262_v42, %v1259_v39 }
 0x294   : > { %v6958_v50 = vpack.c.bf16 %v1254_v15, %v1251_v46 }
 0x296   : > { %1321 = vrot.lane.b32.xlu1 %v6958_v50, %s6395_s23  ;;  %v5420_v51 = vpop.f32.mrb[8].mxu0 }
 0x297   : > { %v1266_v24 = vpop.f32.mrb[9].mxu0  ;;  %v1275_v56 = vadd.f32 %v5420_v51, %v5005_v7 }
 0x298   : > { %v5421_v54 = vpop.f32.mrb[10].mxu0  ;;  %v1267_v44 = vadd.f32 %v5005_v7, %v1266_v24 }
 0x299   : > { %v1278_v57 = vadd.f32 %v5421_v54, %v5005_v7  ;;  %v1269_v58 = vpop.f32.mrb[11].mxu0 }
 0x29a   : > { %v1270_v62 = vadd.f32 %v5005_v7, %v1269_v58  ;;  %1323 = vrot.lane.b32.xlu1 %v6956_v40, %s6395_s23 }
 0x29b   : > { %v6964_v63 = vpack.c.bf16 %v1278_v57, %v1275_v56 }
 0x29c   : > { %v6966_v0 = vpack.c.bf16 %v1270_v62, %v1267_v44 }
 0x29e   : > { %1327 = vrot.lane.b32.xlu1 %v6964_v63, %s6395_s23  ;;  %1325 = vrot.lane.b32.xlu0 %v6966_v0, %s6395_s23  ;;  %v5424_v25 = vpop.f32.mrb[12].mxu0 }
 0x29f   : > { %v1282_v60 = vpop.f32.mrb[13].mxu0  ;;  %v1291_v1 = vadd.f32 %v5424_v25, %v5005_v7 }
 0x2a0   : > { %v5425_v34 = vpop.f32.mrb[14].mxu0  ;;  %v1283_v48 = vadd.f32 %v5005_v7, %v1282_v60 }
 0x2a1   : > { %v1294_v2 = vadd.f32 %v5425_v34, %v5005_v7  ;;  %v1285_v6 = vpop.f32.mrb[15].mxu0 }
 0x2a2   : > { %v1286_v8 = vadd.f32 %v5005_v7, %v1285_v6 }
 0x2a3   : > { %v6972_v9 = vpack.c.bf16 %v1294_v2, %v1291_v1 }
 0x2a4   : > { %v6974_v10 = vpack.c.bf16 %v1286_v8, %v1283_v48 }
 0x2a5   : > { %1331 = vrot.lane.b32.xlu1 %v6972_v9, %s6395_s23 }
 0x2a6   : > { %1329 = vrot.lane.b32.xlu0 %v6974_v10, %s6395_s23 }
 0x2a9   : > { %1633 = vrot.lane.b32.xlu1 %v6946_v14, %s6396_s18 }
 0x2aa   : > { %1631 = vrot.lane.b32.xlu0 %v6948_v3, %s6396_s18 }
 0x2ad   : > { %1637 = vrot.lane.b32.xlu1 %v6956_v40, %s6396_s18 }
 0x2ae   : > { %1635 = vrot.lane.b32.xlu0 %v6958_v50, %s6396_s18 }
 0x2b1   : > { %1641 = vrot.lane.b32.xlu1 %v6964_v63, %s6396_s18 }
 0x2b2   : > { %1639 = vrot.lane.b32.xlu0 %v6966_v0, %s6396_s18 }
 0x2b5   : > { %1645 = vrot.lane.b32.xlu1 %v6972_v9, %s6396_s18 }
 0x2b6   : > { %1784 = vrot.lane.b32.xlu0 %v6948_v3, %s6397_s8 }
 0x2b9   : > { %1786 = vrot.lane.b32.xlu1 %v6946_v14, %s6397_s8 }
 0x2ba   : > { %1643 = vrot.lane.b32.xlu0 %v6974_v10, %s6396_s18 }
 0x2ff   : > { %v1320_v11 = vpop.permute.xlu1 %1319 }
 0x300   : > { %v1318_v35 = vpop.permute.xlu0 %1317  ;;  %v1362_v12 = vsel %vm1333_vm2, %v1320_v11, 0 }
 0x301   : > { %5726 = vmatprep.subr.msk.bf16.mxu1 %vm1333_vm2, %v1318_v35  ;;  %v1359_v4 = vsel %vm1333_vm2, %v1318_v35, 0 }
 0x302   : > { %5427 = vmatpush3.bf16.xpose.msra.mxu1 %v1359_v4 }
 0x303   : > { %5727 = vmatprep.subr.msk.bf16.mxu1 %vm1333_vm2, %v1320_v11 }
 0x308   : > { %v1322_v47 = vpop.permute.xlu1 %1321 }
 0x309   : > { %v1365_v53 = vsel %vm1333_vm2, %v1322_v47, 0 }
 0x30a   : > { %5429 = vmatpush3.bf16.xpose.msra.mxu1 %v1362_v12 }
 0x30b   : > { %5728 = vmatprep.subr.msk.bf16.mxu1 %vm1333_vm2, %v1322_v47 }
 0x30c   : > { %v1324_v52 = vpop.permute.xlu1 %1323 }
 0x30d   : > { %v1368_v61 = vsel %vm1333_vm2, %v1324_v52, 0 }
 0x310   : > { %v1328_v13 = vpop.permute.xlu1 %1327  ;;  %v1326_v16 = vpop.permute.xlu0 %1325 }
 0x311   : > { %v1371_v20 = vsel %vm1333_vm2, %v1326_v16, 0  ;;  %v1374_v45 = vsel %vm1333_vm2, %v1328_v13, 0 }
 0x312   : > { %5431 = vmatpush3.bf16.xpose.msra.mxu1 %v1365_v53 }
 0x313   : > { %5729 = vmatprep.subr.msk.bf16.mxu1 %vm1333_vm2, %v1324_v52 }
 0x317   : > { %v1332_v17 = vpop.permute.xlu1 %1331 }
 0x318   : > { %v1330_v41 = vpop.permute.xlu0 %1329  ;;  %v1380_v7 = vsel %vm1333_vm2, %v1332_v17, 0 }
 0x319   : > { %v1377_v26 = vsel %vm1333_vm2, %v1330_v41, 0 }
 0x31a   : > { %5433 = vmatpush3.bf16.xpose.msra.mxu1 %v1368_v61 }
 0x31b   : > { %5730 = vmatprep.subr.msk.bf16.mxu1 %vm1333_vm2, %v1326_v16  ;;  %v1634_v18 = vpop.permute.xlu1 %1633 }
 0x31c   : > { %v1632_v59 = vpop.permute.xlu0 %1631 }
 0x31d   : > { %5458 = vmatprep.subr.bf16.mxu0 %v1632_v59 }
 0x31e   : > { %5459 = vmatpush3.bf16.msra.mxu0 %v1632_v59 }
 0x31f   : > { %5460 = vmatprep.subr.bf16.mxu0 %v1634_v18  ;;  %v1638_v21 = vpop.permute.xlu1 %1637 }
 0x320   : > { %v1636_v19 = vpop.permute.xlu0 %1635 }
 0x322   : > { %5435 = vmatpush3.bf16.xpose.msra.mxu1 %v1371_v20  ;;  %5461 = vmatpush3.bf16.msra.mxu0 %v1634_v18 }
 0x323   : > { %5731 = vmatprep.subr.msk.bf16.mxu1 %vm1333_vm2, %v1328_v13  ;;  %5462 = vmatprep.subr.bf16.mxu0 %v1636_v19  ;;  %v1642_v49 = vpop.permute.xlu1 %1641 }
 0x324   : > { %v1640_v22 = vpop.permute.xlu0 %1639 }
 0x326   : > { %5463 = vmatpush3.bf16.msra.mxu0 %v1636_v19 }
 0x327   : > { %5464 = vmatprep.subr.bf16.mxu0 %v1638_v21  ;;  %v1646_v28 = vpop.permute.xlu1 %1645 }
 0x328   : > { %v7005_v23 = vpop.permute.xlu0 %1784 }
 0x32a   : > { %5437 = vmatpush3.bf16.xpose.msra.mxu1 %v1374_v45  ;;  %5465 = vmatpush3.bf16.msra.mxu0 %v1638_v21 }
 0x32b   : > { %5732 = vmatprep.subr.msk.bf16.mxu1 %vm1333_vm2, %v1330_v41  ;;  %5466 = vmatprep.subr.bf16.mxu0 %v1640_v22  ;;  %v7084_v52 = vpop.permute.xlu1 %1786 }
 0x32c   : > { %v1644_v27 = vpop.permute.xlu0 %1643 }
 0x32e   : > { %5467 = vmatpush3.bf16.msra.mxu0 %v1640_v22 }
 0x32f   : > { %5468 = vmatprep.subr.bf16.mxu0 %v1642_v49 }
 0x332   : > { %5439 = vmatpush3.bf16.xpose.msra.mxu1 %v1377_v26  ;;  %5469 = vmatpush3.bf16.msra.mxu0 %v1642_v49 }
 0x333   : > { %5733 = vmatprep.subr.msk.bf16.mxu1 %vm1333_vm2, %v1332_v17  ;;  %5470 = vmatprep.subr.bf16.mxu0 %v1644_v27 }
 0x336   : > { %5471 = vmatpush3.bf16.msra.mxu0 %v1644_v27 }
 0x337   : > { %5472 = vmatprep.subr.bf16.mxu0 %v1646_v28 }
 0x33a   : > { %5441 = vmatpush3.bf16.xpose.msra.mxu1 %v1380_v7  ;;  %5473 = vmatpush3.bf16.msra.mxu0 %v1646_v28 }
 0x33b   : > { %5734 = vmatprep.subr.msk.bf16.mxu0 %vm1333_vm2, %v7005_v23 }
 0x341   : > { %5443 = vmatmul.mubr.msk.bf16.vlgmr.msra.gmra.mrb[0].mxu1 %vm1333_vm2, %v6946_v14 }
 0x342   : > { %5446 = vmatprep.mubr.msk.bf16.mxu1 %vm1333_vm2, %v6958_v50 }
 0x349   : > { %5447 = vmatmul.mubr.msk.bf16.gmra.mrb[4].mxu1 %vm1333_vm2, %v6956_v40 }
 0x34a   : > { %5450 = vmatprep.mubr.msk.bf16.mxu1 %vm1333_vm2, %v6966_v0 }
 0x351   : > { %5451 = vmatmul.mubr.msk.bf16.gmra.mrb[8].mxu1 %vm1333_vm2, %v6964_v63 }
 0x352   : > { %5454 = vmatprep.mubr.msk.bf16.mxu1 %vm1333_vm2, %v6974_v10 }
 0x359   : > { %5455 = vmatmul.mubr.msk.bf16.gmra.mrb[12].mxu1 %vm1333_vm2, %v6972_v9 }
 0x414   : > { %v5444_v55 = vpop.f32.mrb[0].mxu1 }
 0x415   : > { %v1425_v32 = vadd.f32 %v5444_v55, %v7026_v31  ;;  %v1416_v33 = vpop.f32.mrb[1].mxu1 }
 0x416   : > { %v5445_v36 = vpop.f32.mrb[2].mxu1  ;;  %v1417_v39 = vadd.f32 %v1416_v33, %v7026_v31 }
 0x417   : > { %1483 = vmax.xlane.f32.xlu0 %v1425_v32  ;;  %v1419_v37 = vpop.f32.mrb[3].mxu1  ;;  %v1428_v43 = vadd.f32 %v5445_v36, %v7026_v31 }
 0x418   : > { %v1420_v38 = vadd.f32 %v1419_v37, %v7026_v31 }
 0x41a   : > { %1481 = vmax.xlane.f32.xlu1 %v1420_v38 }
 0x41b   : > { %1479 = vmax.xlane.f32.xlu0 %v1417_v39 }
 0x41c   : > { %v5448_v42 = vpop.f32.mrb[4].mxu1 }
 0x41d   : > { %v1432_v46 = vpop.f32.mrb[5].mxu1  ;;  %v7036_v54 = vadd.f32 %v5448_v42, %v7026_v31 }
 0x41e   : > { %v5449_v15 = vpop.f32.mrb[6].mxu1  ;;  %v7044_v58 = vadd.f32 %v1432_v46, %v7026_v31 }
 0x41f   : > { %v7033_v51 = vadd.f32 %v5449_v15, %v7026_v31  ;;  %v1435_v24 = vpop.f32.mrb[7].mxu1  ;;  %1485 = vmax.xlane.f32.xlu0 %v1428_v43 }
 0x420   : > { %v7040_v56 = vadd.f32 %v1435_v24, %v7026_v31 }
 0x421   : > { %1493 = vmax.xlane.f32.xlu1 %v7033_v51 }
 0x423   : > { %1491 = vmax.xlane.f32.xlu0 %v7036_v54 }
 0x424   : > { %v5452_v57 = vpop.f32.mrb[8].mxu1 }
 0x425   : > { %v1448_v44 = vpop.f32.mrb[9].mxu1  ;;  %1489 = vmax.xlane.f32.xlu1 %v7040_v56  ;;  %v7052_v34 = vadd.f32 %v5452_v57, %v7026_v31 }
 0x426   : > { %v5453_v62 = vpop.f32.mrb[10].mxu1  ;;  %v7060_v6 = vadd.f32 %v1448_v44, %v7026_v31 }
 0x427   : > { %v7048_v25 = vadd.f32 %v5453_v62, %v7026_v31  ;;  %v1451_v60 = vpop.f32.mrb[11].mxu1  ;;  %1487 = vmax.xlane.f32.xlu0 %v7044_v58 }
 0x428   : > { %v7056_v1 = vadd.f32 %v1451_v60, %v7026_v31 }
 0x429   : > { %1501 = vmax.xlane.f32.xlu1 %v7048_v25 }
 0x42b   : > { %1499 = vmax.xlane.f32.xlu0 %v7052_v34 }
 0x42c   : > { %v5456_v2 = vpop.f32.mrb[12].mxu1 }
 0x42d   : > { %v1464_v48 = vpop.f32.mrb[13].mxu1  ;;  %1497 = vmax.xlane.f32.xlu1 %v7056_v1  ;;  %v7065_v4 = vadd.f32 %v5456_v2, %v7026_v31 }
 0x42e   : > { %v5457_v8 = vpop.f32.mrb[14].mxu1  ;;  %v7069_v11 = vadd.f32 %v1464_v48, %v7026_v31 }
 0x42f   : > { %v1467_v35 = vpop.f32.mrb[15].mxu1  ;;  %1495 = vmax.xlane.f32.xlu0 %v7060_v6  ;;  %v7077_v47 = vadd.f32 %v5457_v8, %v7026_v31 }
 0x430   : > { %v7081_v12 = vadd.f32 %v1467_v35, %v7026_v31 }
 0x433   : > { %1507 = vmax.xlane.f32.xlu0 %v7065_v4 }
 0x437   : > { %1503 = vmax.xlane.f32.xlu0 %v7069_v11 }
 0x43e   : > { %1790 = vrot.lane.b32.xlu1 %v6956_v40, %s6397_s8 }
 0x44d   : > { %1788 = vrot.lane.b32.xlu0 %v6958_v50, %s6397_s8 }
 0x462   : > { %1509 = vmax.xlane.f32.xlu1 %v7077_v47 }
 0x466   : > { %1505 = vmax.xlane.f32.xlu1 %v7081_v12 }
 0x4a4   : > { %v1484_v53 = vpop.xlane.xlu0 %1483 }
 0x4a5   : > { %v1513_v13 = vsub.f32 %v1425_v32, %v1484_v53 }
 0x4a7   : > { %v1531_v16 = vmul.f32 1.442695, %v1513_v13  ;;  %v1482_v17 = vpop.xlane.xlu1 %1481 }
 0x4a8   : > { %v1512_v41 = vsub.f32 %v1420_v38, %v1482_v17  ;;  %v1480_v61 = vpop.xlane.xlu0 %1479 }
 0x4a9   : > { %5915 = vpow2.f32 %v1531_v16  ;;  %v1511_v59 = vsub.f32 %v1417_v39, %v1480_v61 }
 0x4aa   : > { %v1529_v18 = vmul.f32 1.442695, %v1512_v41 }
 0x4ab   : > { %v1527_v19 = vmul.f32 1.442695, %v1511_v59 }
 0x4ac   : > { %5917 = vpow2.f32 %v1529_v18  ;;  %v1486_v20 = vpop.xlane.xlu0 %1485 }
 0x4ad   : > { %5919 = vpow2.f32 %v1527_v19  ;;  %v1514_v21 = vsub.f32 %v1428_v43, %v1486_v20 }
 0x4ae   : > { %v1494_v5 = vpop.xlane.xlu1 %1493 }
 0x4af   : > { %v1533_v22 = vmul.f32 1.442695, %v1514_v21  ;;  %v1518_v42 = vsub.f32 %v7033_v51, %v1494_v5 }
 0x4b0   : > { %v1492_v28 = vpop.xlane.xlu0 %1491 }
 0x4b1   : > { %5921 = vpow2.f32 %v1533_v22  ;;  %v1517_v30 = vsub.f32 %v7036_v54, %v1492_v28  ;;  %v1541_v24 = vmul.f32 1.442695, %v1518_v42 }
 0x4b2   : > { %v1490_v55 = vpop.xlane.xlu1 %1489 }
 0x4b3   : > { %v7086_v45 = vpop.eup %5915  ;;  %v1539_v33 = vmul.f32 1.442695, %v1517_v30  ;;  %v1516_v37 = vsub.f32 %v7040_v56, %v1490_v55 }
 0x4b4   : > { %1563 = vadd.xlane.f32.xlu1 %v7086_v45  ;;  %v1488_v7 = vpop.xlane.xlu0 %1487 }
 0x4b5   : > { %v1515_v36 = vsub.f32 %v7044_v58, %v1488_v7  ;;  %5923 = vpow2.f32 %v1539_v33  ;;  %v1537_v46 = vmul.f32 1.442695, %v1516_v37 }
 0x4b6   : > { %v7089_v49 = vpop.eup %5917  ;;  %v1502_v38 = vpop.xlane.xlu1 %1501 }
 0x4b7   : > { %v7091_v26 = vpop.eup %5919  ;;  %1561 = vadd.xlane.f32.xlu0 %v7089_v49  ;;  %v1535_v43 = vmul.f32 1.442695, %v1515_v36  ;;  %v1522_v51 = vsub.f32 %v7048_v25, %v1502_v38 }
 0x4b8   : > { %1559 = vadd.xlane.f32.xlu1 %v7091_v26  ;;  %v1500_v29 = vpop.xlane.xlu0 %1499 }
 0x4b9   : > { %v1521_v15 = vsub.f32 %v7052_v34, %v1500_v29  ;;  %5925 = vpow2.f32 %v1535_v43  ;;  %v1549_v35 = vmul.f32 1.442695, %v1522_v51 }
 0x4ba   : > { %v1498_v57 = vpop.xlane.xlu1 %1497  ;;  %5927 = vpow2.f32 %v1537_v46 }
 0x4bb   : > { %v7095_v27 = vpop.eup %5921  ;;  %v1547_v44 = vmul.f32 1.442695, %v1521_v15  ;;  %5929 = vpow2.f32 %v1541_v24  ;;  %v1825_v15 = vsel %vm1333_vm2, %v7005_v23, 0 }
 0x4bc   : > { %1565 = vadd.xlane.f32.xlu1 %v7095_v27  ;;  %v1496_v32 = vpop.xlane.xlu0 %1495 }
 0x4bd   : > { %v1519_v58 = vsub.f32 %v7060_v6, %v1496_v32  ;;  %5931 = vpow2.f32 %v1547_v44  ;;  %v1520_v6 = vsub.f32 %v7056_v1, %v1498_v57 }
 0x4be   : > { %v7113_v34 = vpop.permute.xlu1 %1790 }
 0x4bf   : > { %v1543_v2 = vmul.f32 1.442695, %v1519_v58  ;;  %v7111_v48 = vpop.eup %5923  ;;  %v1545_v13 = vmul.f32 1.442695, %v1520_v6 }
 0x4c0   : > { %v1508_v39 = vpop.xlane.xlu0 %1507 }
 0x4c1   : > { %v1525_v54 = vsub.f32 %v7065_v4, %v1508_v39 }
 0x4c3   : > { %v1555_v56 = vmul.f32 1.442695, %v1525_v54  ;;  %v7117_v4 = vpop.eup %5925 }
 0x4c4   : > { %v1504_v62 = vpop.xlane.xlu0 %1503 }
 0x4c5   : > { %v1523_v60 = vsub.f32 %v7069_v11, %v1504_v62  ;;  %5933 = vpow2.f32 %v1555_v56  ;;  %v7119_v11 = vpop.eup %5927 }
 0x4c6   : > { %5935 = vpow2.f32 %v1543_v2  ;;  %v7124_v17 = vpop.eup %5929 }
 0x4c7   : > { %v1551_v8 = vmul.f32 1.442695, %v1523_v60  ;;  %v7126_v1 = vpop.eup %5931 }
 0x4c8   : > { %v1789_v28 = vpop.permute.xlu0 %1788 }
 0x4c9   : > { %5937 = vpow2.f32 %v1551_v8 }
 0x4ca   : > { %5939 = vpow2.f32 %v1549_v35 }
 0x4cd   : > { %1792 = vrot.lane.b32.xlu0 %v6966_v0, %s6397_s8  ;;  %1794 = vrot.lane.b32.xlu1 %v6964_v63, %s6397_s8 }
 0x4cf   : > { %v7131_v59 = vpop.eup %5933 }
 0x4d0   : > { %v7133_v18 = vpop.eup %5935 }
 0x4d3   : > { %v7137_v19 = vpop.eup %5937 }
 0x4d4   : > { %v7139_v20 = vpop.eup %5939 }
 0x4ec   : > { %1571 = vadd.xlane.f32.xlu0 %v7111_v48 }
 0x4ef   : > { %v1510_v53 = vpop.xlane.xlu1 %1509 }
 0x4f0   : > { %v1526_v25 = vsub.f32 %v7077_v47, %v1510_v53  ;;  %1567 = vadd.xlane.f32.xlu0 %v7117_v4 }
 0x4f1   : > { %1569 = vadd.xlane.f32.xlu1 %v7119_v11 }
 0x4f2   : > { %v1557_v16 = vmul.f32 1.442695, %v1526_v25 }
 0x4f3   : > { %v1506_v41 = vpop.xlane.xlu1 %1505 }
 0x4f4   : > { %5941 = vpow2.f32 %v1557_v16  ;;  %v1524_v61 = vsub.f32 %v7081_v12, %v1506_v41  ;;  %1573 = vadd.xlane.f32.xlu0 %v7124_v17 }
 0x4f5   : > { %1579 = vadd.xlane.f32.xlu1 %v7126_v1  ;;  %5943 = vpow2.f32 %v1545_v13 }
 0x4f6   : > { %v1553_v47 = vmul.f32 1.442695, %v1524_v61 }
 0x4f8   : > { %1587 = vadd.xlane.f32.xlu0 %v7131_v59  ;;  %5945 = vpow2.f32 %v1553_v47 }
 0x4f9   : > { %1575 = vadd.xlane.f32.xlu1 %v7133_v18 }
 0x4fc   : > { %1583 = vadd.xlane.f32.xlu0 %v7137_v19 }
 0x4fd   : > { %1581 = vadd.xlane.f32.xlu1 %v7139_v20 }
 0x4fe   : > { %v7143_v12 = vpop.eup %5941 }
 0x4ff   : > { %v7145_v21 = vpop.eup %5943 }
 0x500   : > { %1589 = vadd.xlane.f32.xlu0 %v7143_v12 }
 0x501   : > { %1577 = vadd.xlane.f32.xlu1 %v7145_v21 }
 0x502   : > { %v7149_v22 = vpop.eup %5945 }
 0x505   : > { %1585 = vadd.xlane.f32.xlu1 %v7149_v22 }
 0x516   : > { %1798 = vrot.lane.b32.xlu1 %v6972_v9, %s6397_s8  ;;  %1796 = vrot.lane.b32.xlu0 %v6974_v10, %s6397_s8 }
 0x51a   : > { %1770 = vrot.lane.b32.xlu1 %v6946_v14, %s6399_s11  ;;  %1768 = vrot.lane.b32.xlu0 %v6948_v3, %s6399_s11 }
 0x51e   : > { %1774 = vrot.lane.b32.xlu1 %v6956_v40, %s6399_s11  ;;  %1772 = vrot.lane.b32.xlu0 %v6958_v50, %s6399_s11 }
 0x522   : > { %1778 = vrot.lane.b32.xlu1 %v6964_v63, %s6399_s11  ;;  %1776 = vrot.lane.b32.xlu0 %v6966_v0, %s6399_s11 }
 0x526   : > { %1782 = vrot.lane.b32.xlu1 %v6972_v9, %s6399_s11  ;;  %1780 = vrot.lane.b32.xlu0 %v6974_v10, %s6399_s11 }
 0x52a   : > { %2099 = vrot.lane.b32.xlu1 %v6946_v14, %s6400_s6  ;;  %2097 = vrot.lane.b32.xlu0 %v6948_v3, %s6400_s6 }
 0x52e   : > { %2103 = vrot.lane.b32.xlu1 %v6956_v40, %s6400_s6  ;;  %2101 = vrot.lane.b32.xlu0 %v6958_v50, %s6400_s6 }
 0x532   : > { %2107 = vrot.lane.b32.xlu1 %v6964_v63, %s6400_s6  ;;  %2105 = vrot.lane.b32.xlu0 %v6966_v0, %s6400_s6 }
 0x536   : > { %2111 = vrot.lane.b32.xlu1 %v6972_v9, %s6400_s6  ;;  %2109 = vrot.lane.b32.xlu0 %v6974_v10, %s6400_s6 }
 0x53a   : > { %2285 = vrot.lane.b32.xlu1 %v6946_v14, %s6401_s3  ;;  %2283 = vrot.lane.b32.xlu0 %v6948_v3, %s6401_s3 }
 0x541   : > { %v1564_v7 = vpop.xlane.xlu1 %1563 }
 0x544   : > { %v1562_v5 = vpop.xlane.xlu0 %1561 }
 0x545   : > { %5947 = vrcp.f32 %v1562_v5  ;;  %v1560_v29 = vpop.xlane.xlu1 %1559 }
 0x546   : > { %5949 = vrcp.f32 %v1560_v29 }
 0x547   : > { %5951 = vrcp.f32 %v1564_v7 }
 0x548   : > { %v1793_v23 = vpop.permute.xlu0 %1792 }
 0x549   : > { %v1566_v30 = vpop.xlane.xlu1 %1565 }
 0x54a   : > { %5953 = vrcp.f32 %v1566_v30 }
 0x54f   : > { %v5948_v55 = vpop.eup %5947 }
 0x550   : > { %v5950_v32 = vpop.eup %5949  ;;  %v1608_v33 = vmul.f32 %v5948_v55, %v7089_v49  ;;  %v1828_v49 = vsel %vm1333_vm2, %v7084_v52, 0 }
 0x551   : > { %v1607_v36 = vmul.f32 %v5950_v32, %v7091_v26  ;;  %v5952_v37 = vpop.eup %5951  ;;  %v1834_v26 = vsel %vm1333_vm2, %v7113_v34, 0 }
 0x552   : > { %v1609_v42 = vmul.f32 %v5952_v37, %v7086_v45  ;;  %v1831_v45 = vsel %vm1333_vm2, %v1789_v28, 0 }
 0x553   : > { %v1623_v38 = vpack.c.bf16 %v1608_v33, %v1607_v36 }
 0x554   : > { %v5954_v39 = vpop.eup %5953 }
 0x555   : > { %v1610_v43 = vmul.f32 %v5954_v39, %v7095_v27  ;;  %5474 = vmatprep.mubr.bf16.mxu0 %v1623_v38  ;;  %v1837_v27 = vsel %vm1333_vm2, %v1793_v23, 0 }
 0x557   : > { %v1624_v46 = vpack.c.bf16 %v1610_v43, %v1609_v42 }
 0x559   : > { %5475 = vmatmul.mubr.bf16.vlgmr.msra.gmra.mrb[16].mxu0 %v1624_v46 }
 0x55a   : > { %5491 = vmatpush3.bf16.xpose.msra.mxu0 %v1825_v15 }
 0x55b   : > { %5735 = vmatprep.subr.msk.bf16.mxu0 %vm1333_vm2, %v7084_v52  ;;  %v1795_v52 = vpop.permute.xlu1 %1794 }
 0x55c   : > { %v1840_v44 = vsel %vm1333_vm2, %v1795_v52, 0 }
 0x562   : > { %5493 = vmatpush3.bf16.xpose.msra.mxu0 %v1828_v49 }
 0x563   : > { %5736 = vmatprep.subr.msk.bf16.mxu0 %vm1333_vm2, %v1789_v28 }
 0x56a   : > { %5495 = vmatpush3.bf16.xpose.msra.mxu0 %v1831_v45 }
 0x56b   : > { %5737 = vmatprep.subr.msk.bf16.mxu0 %vm1333_vm2, %v7113_v34 }
 0x572   : > { %5497 = vmatpush3.bf16.xpose.msra.mxu0 %v1834_v26 }
 0x573   : > { %5738 = vmatprep.subr.msk.bf16.mxu0 %vm1333_vm2, %v1793_v23 }
 0x579   : > { %v1572_v24 = vpop.xlane.xlu0 %1571 }
 0x57a   : > { %5499 = vmatpush3.bf16.xpose.msra.mxu0 %v1837_v27 }
 0x57b   : > { %5739 = vmatprep.subr.msk.bf16.mxu0 %vm1333_vm2, %v1795_v52 }
 0x57d   : > { %v1568_v57 = vpop.xlane.xlu0 %1567 }
 0x57e   : > { %5955 = vrcp.f32 %v1568_v57  ;;  %v1570_v54 = vpop.xlane.xlu1 %1569 }
 0x57f   : > { %5957 = vrcp.f32 %v1570_v54 }
 0x580   : > { %5959 = vrcp.f32 %v1572_v24 }
 0x581   : > { %v1574_v58 = vpop.xlane.xlu0 %1573 }
 0x582   : > { %5501 = vmatpush3.bf16.xpose.msra.mxu0 %v1840_v44  ;;  %5961 = vrcp.f32 %v1574_v58  ;;  %v1580_v62 = vpop.xlane.xlu1 %1579 }
 0x585   : > { %v1588_v56 = vpop.xlane.xlu0 %1587 }
 0x586   : > { %v1576_v60 = vpop.xlane.xlu1 %1575 }
 0x588   : > { %v5956_v51 = vpop.eup %5955 }
 0x589   : > { %v5958_v2 = vpop.eup %5957  ;;  %v1584_v34 = vpop.xlane.xlu0 %1583  ;;  %v1611_v8 = vmul.f32 %v5956_v51, %v7117_v4 }
 0x58a   : > { %v5960_v35 = vpop.eup %5959  ;;  %v1582_v6 = vpop.xlane.xlu1 %1581  ;;  %v1612_v53 = vmul.f32 %v5958_v2, %v7119_v11 }
 0x58b   : > { %5963 = vrcp.f32 %v1582_v6  ;;  %v1613_v41 = vmul.f32 %v5960_v35, %v7111_v48 }
 0x58c   : > { %v5962_v25 = vpop.eup %5961  ;;  %v1625_v13 = vpack.c.bf16 %v1612_v53, %v1611_v8  ;;  %5965 = vrcp.f32 %v1576_v60 }
 0x58d   : > { %v1590_v16 = vpop.xlane.xlu0 %1589  ;;  %v1614_v61 = vmul.f32 %v5962_v25, %v7124_v17  ;;  %5967 = vrcp.f32 %v1580_v62 }
 0x58e   : > { %v1578_v47 = vpop.xlane.xlu1 %1577  ;;  %5478 = vmatprep.mubr.bf16.mxu0 %v1625_v13 }
 0x58f   : > { %5969 = vrcp.f32 %v1578_v47  ;;  %v1626_v28 = vpack.c.bf16 %v1614_v61, %v1613_v41 }
 0x590   : > { %5971 = vrcp.f32 %v1584_v34 }
 0x591   : > { %5479 = vmatmul.mubr.bf16.gmra.mrb[20].mxu0 %v1626_v28  ;;  %v1797_v4 = vpop.permute.xlu0 %1796 }
 0x592   : > { %v1586_v7 = vpop.xlane.xlu1 %1585  ;;  %5740 = vmatprep.subr.msk.bf16.mxu0 %vm1333_vm2, %v1797_v4  ;;  %v1843_v11 = vsel %vm1333_vm2, %v1797_v4, 0 }
 0x593   : > { %5973 = vrcp.f32 %v1586_v7  ;;  %5503 = vmatpush3.bf16.xpose.msra.mxu0 %v1843_v11 }
 0x594   : > { %5975 = vrcp.f32 %v1590_v16 }
 0x595   : > { %v1769_v5 = vpop.permute.xlu0 %1768  ;;  %v5964_v48 = vpop.eup %5963  ;;  %5977 = vrcp.f32 %v1588_v56 }
 0x596   : > { %v1799_v17 = vpop.permute.xlu1 %1798  ;;  %v5966_v29 = vpop.eup %5965  ;;  %v1618_v33 = vmul.f32 %v5964_v48, %v7139_v20 }
 0x597   : > { %5741 = vmatprep.subr.msk.bf16.mxu0 %vm1333_vm2, %v1799_v17  ;;  %v5968_v30 = vpop.eup %5967  ;;  %v1846_v37 = vsel %vm1333_vm2, %v1799_v17, 0  ;;  %v1615_v38 = vmul.f32 %v5966_v29, %v7133_v18 }
 0x598   : > { %v1617_v43 = vmul.f32 %v5968_v30, %v7126_v1 }
 0x599   : > { %v5970_v55 = vpop.eup %5969  ;;  %v1773_v32 = vpop.permute.xlu0 %1772 }
 0x59a   : > { %v1771_v36 = vpop.permute.xlu1 %1770  ;;  %v1616_v39 = vmul.f32 %v5970_v55, %v7145_v21  ;;  %v5972_v42 = vpop.eup %5971  ;;  %v1628_v45 = vpack.c.bf16 %v1618_v33, %v1617_v43 }
 0x59b   : > { %5505 = vmatpush3.bf16.xpose.msra.mxu0 %v1846_v37  ;;  %v1619_v20 = vmul.f32 %v5972_v42, %v7137_v19 }
 0x59c   : > { %v1627_v46 = vpack.c.bf16 %v1616_v39, %v1615_v38 }
 0x59d   : > { %v5974_v15 = vpop.eup %5973  ;;  %v1777_v49 = vpop.permute.xlu0 %1776 }
 0x59e   : > { %v5976_v26 = vpop.eup %5975  ;;  %v1775_v23 = vpop.permute.xlu1 %1774  ;;  %5482 = vmatprep.mubr.bf16.mxu0 %v1627_v46  ;;  %v1620_v27 = vmul.f32 %v5974_v15, %v7149_v22 }
 0x59f   : > { %5483 = vmatmul.mubr.bf16.gmra.mrb[24].mxu0 %v1628_v45  ;;  %v5978_v24 = vpop.eup %5977  ;;  %v1622_v21 = vmul.f32 %v5976_v26, %v7143_v12 }
 0x5a0   : > { %v1629_v18 = vpack.c.bf16 %v1620_v27, %v1619_v20  ;;  %v1621_v1 = vmul.f32 %v5978_v24, %v7131_v59 }
 0x5a1   : > { %v1781_v52 = vpop.permute.xlu0 %1780 }
 0x5a2   : > { %v1779_v57 = vpop.permute.xlu1 %1778  ;;  %5486 = vmatprep.mubr.bf16.mxu0 %v1629_v18  ;;  %v1630_v44 = vpack.c.bf16 %v1622_v21, %v1621_v1 }
 0x5a5   : > { %v2098_v54 = vpop.permute.xlu0 %2097 }
 0x5a6   : > { %v1783_v58 = vpop.permute.xlu1 %1782  ;;  %5522 = vmatprep.subr.bf16.mxu1 %v2098_v54 }
 0x5a7   : > { %5487 = vmatmul.mubr.bf16.gmra.mrb[28].mxu0 %v1630_v44  ;;  %5523 = vmatpush3.bf16.msra.mxu1 %v2098_v54 }
 0x5a8   : > { %5506 = vmatprep.mubr.msk.bf16.mxu0 %vm1333_vm2, %v1769_v5 }
 0x5a9   : > { %v2102_v22 = vpop.permute.xlu0 %2101 }
 0x5aa   : > { %v2100_v19 = vpop.permute.xlu1 %2099 }
 0x5ab   : > { %5524 = vmatprep.subr.bf16.mxu1 %v2100_v19 }
 0x5ac   : > { %5525 = vmatpush3.bf16.msra.mxu1 %v2100_v19 }
 0x5ad   : > { %5526 = vmatprep.subr.bf16.mxu1 %v2102_v22  ;;  %v2106_v59 = vpop.permute.xlu0 %2105 }
 0x5ae   : > { %v2104_v12 = vpop.permute.xlu1 %2103 }
 0x5af   : > { %5507 = vmatmul.mubr.msk.bf16.vlgmr.msra.gmra.mrb[32].mxu0 %vm1333_vm2, %v1771_v36 }
 0x5b0   : > { %5510 = vmatprep.mubr.msk.bf16.mxu0 %vm1333_vm2, %v1773_v32  ;;  %5527 = vmatpush3.bf16.msra.mxu1 %v2102_v22 }
 0x5b1   : > { %5528 = vmatprep.subr.bf16.mxu1 %v2104_v12  ;;  %v2110_v56 = vpop.permute.xlu0 %2109 }
 0x5b2   : > { %v2108_v62 = vpop.permute.xlu1 %2107 }
 0x5b4   : > { %5529 = vmatpush3.bf16.msra.mxu1 %v2104_v12 }
 0x5b5   : > { %5530 = vmatprep.subr.bf16.mxu1 %v2106_v59  ;;  %v7219_v51 = vpop.permute.xlu0 %2283 }
 0x5b6   : > { %v2112_v60 = vpop.permute.xlu1 %2111 }
 0x5b7   : > { %5511 = vmatmul.mubr.msk.bf16.gmra.mrb[36].mxu0 %vm1333_vm2, %v1775_v23 }
 0x5b8   : > { %5514 = vmatprep.mubr.msk.bf16.mxu0 %vm1333_vm2, %v1777_v49  ;;  %5531 = vmatpush3.bf16.msra.mxu1 %v2106_v59 }
 0x5b9   : > { %5532 = vmatprep.subr.bf16.mxu1 %v2108_v62 }
 0x5bc   : > { %5533 = vmatpush3.bf16.msra.mxu1 %v2108_v62 }
 0x5bd   : > { %5534 = vmatprep.subr.bf16.mxu1 %v2110_v56 }
 0x5bf   : > { %5515 = vmatmul.mubr.msk.bf16.gmra.mrb[40].mxu0 %vm1333_vm2, %v1779_v57 }
 0x5c0   : > { %5518 = vmatprep.mubr.msk.bf16.mxu0 %vm1333_vm2, %v1781_v52  ;;  %5535 = vmatpush3.bf16.msra.mxu1 %v2110_v56 }
 0x5c1   : > { %5536 = vmatprep.subr.bf16.mxu1 %v2112_v60 }
 0x5c4   : > { %5537 = vmatpush3.bf16.msra.mxu1 %v2112_v60 }
 0x5c5   : > { %5742 = vmatprep.subr.msk.bf16.mxu1 %vm1333_vm2, %v7219_v51 }
 0x5c7   : > { %5519 = vmatmul.mubr.msk.bf16.gmra.mrb[44].mxu0 %vm1333_vm2, %v1783_v58 }
 0x62c   : > { %v5476_v2 = vpop.f32.mrb[16].mxu0 }
 0x62d   : > { %v1689_v34 = vpop.f32.mrb[17].mxu0 }
 0x62e   : > { %v5477_v8 = vpop.f32.mrb[18].mxu0 }
 0x62f   : > { %v1753_v35 = vpack.c.bf16 %v5477_v8, %v5476_v2  ;;  %v1692_v6 = vpop.f32.mrb[19].mxu0  ;;  %v7288_v8 = vpop.permute.xlu1 %2285 }
 0x630   : > { %v1752_v53 = vpack.c.bf16 %v1692_v6, %v1689_v34 }
 0x631   : > { %1761 = vst.msk [vmem:[#allocation3 + $0x8] sm:$0xff] %vm1333_vm2, %v1753_v35 }
 0x632   : > { %1760 = vst.msk [vmem:[#allocation3] sm:$0xff] %vm1333_vm2, %v1752_v53 }
 0x664   : > { %v5480_v25 = vpop.f32.mrb[20].mxu0 }
 0x665   : > { %v1705_v13 = vpop.f32.mrb[21].mxu0 }
 0x666   : > { %v5481_v16 = vpop.f32.mrb[22].mxu0 }
 0x667   : > { %v1755_v41 = vpack.c.bf16 %v5481_v16, %v5480_v25  ;;  %v1708_v61 = vpop.f32.mrb[23].mxu0 }
 0x668   : > { %v1754_v47 = vpack.c.bf16 %v1708_v61, %v1705_v13 }
 0x669   : > { %1763 = vst.msk [vmem:[#allocation3 + $0x18] sm:$0xff] %vm1333_vm2, %v1755_v41 }
 0x66a   : > { %1762 = vst.msk [vmem:[#allocation3 + $0x10] sm:$0xff] %vm1333_vm2, %v1754_v47 }
 0x672   : > { %v5484_v28 = vpop.f32.mrb[24].mxu0 }
 0x673   : > { %v1721_v4 = vpop.f32.mrb[25].mxu0 }
 0x674   : > { %v5485_v7 = vpop.f32.mrb[26].mxu0 }
 0x675   : > { %v1757_v11 = vpack.c.bf16 %v5485_v7, %v5484_v28  ;;  %v1724_v5 = vpop.f32.mrb[27].mxu0 }
 0x676   : > { %v1756_v48 = vpack.c.bf16 %v1724_v5, %v1721_v4 }
 0x677   : > { %1765 = vst.msk [vmem:[#allocation3 + $0x28] sm:$0xff] %vm1333_vm2, %v1757_v11 }
 0x678   : > { %1764 = vst.msk [vmem:[#allocation3 + $0x20] sm:$0xff] %vm1333_vm2, %v1756_v48 }
 0x67a   : > { %v5488_v17 = vpop.f32.mrb[28].mxu0 }
 0x67b   : > { %v1737_v29 = vpop.f32.mrb[29].mxu0 }
 0x67c   : > { %v5489_v30 = vpop.f32.mrb[30].mxu0 }
 0x67d   : > { %v1759_v55 = vpack.c.bf16 %v5489_v30, %v5488_v17  ;;  %v1740_v32 = vpop.f32.mrb[31].mxu0 }
 0x67e   : > { %v1758_v33 = vpack.c.bf16 %v1740_v32, %v1737_v29 }
 0x67f   : > { %1767 = vst.msk [vmem:[#allocation3 + $0x38] sm:$0xff] %vm1333_vm2, %v1759_v55 }
 0x680   : > { %1766 = vst.msk [vmem:[#allocation3 + $0x30] sm:$0xff] %vm1333_vm2, %v1758_v33 }
 0x682   : > { %v5508_v36 = vpop.f32.mrb[32].mxu0 }
 0x683   : > { %v1891_v37 = vadd.f32 %v5508_v36, %v7026_v31  ;;  %v1882_v38 = vpop.f32.mrb[33].mxu0 }
 0x684   : > { %v5509_v39 = vpop.f32.mrb[34].mxu0  ;;  %v1883_v46 = vadd.f32 %v1882_v38, %v7026_v31 }
 0x685   : > { %1949 = vmax.xlane.f32.xlu0 %v1891_v37  ;;  %v1885_v42 = vpop.f32.mrb[35].mxu0  ;;  %v1894_v49 = vadd.f32 %v5509_v39, %v7026_v31 }
 0x686   : > { %v1886_v43 = vadd.f32 %v1885_v42, %v7026_v31 }
 0x688   : > { %1947 = vmax.xlane.f32.xlu1 %v1886_v43 }
 0x689   : > { %1945 = vmax.xlane.f32.xlu0 %v1883_v46 }
 0x68a   : > { %v5512_v15 = vpop.f32.mrb[36].mxu0 }
 0x68b   : > { %v1898_v45 = vpop.f32.mrb[37].mxu0  ;;  %v7240_v27 = vadd.f32 %v5512_v15, %v7026_v31 }
 0x68c   : > { %v5513_v26 = vpop.f32.mrb[38].mxu0  ;;  %v7248_v52 = vadd.f32 %v1898_v45, %v7026_v31 }
 0x68d   : > { %v7237_v23 = vadd.f32 %v5513_v26, %v7026_v31  ;;  %1951 = vmax.xlane.f32.xlu0 %v1894_v49  ;;  %v1901_v20 = vpop.f32.mrb[39].mxu0 }
 0x68e   : > { %v7244_v24 = vadd.f32 %v1901_v20, %v7026_v31 }
 0x68f   : > { %1959 = vmax.xlane.f32.xlu1 %v7237_v23 }
 0x691   : > { %1957 = vmax.xlane.f32.xlu0 %v7240_v27 }
 0x692   : > { %v5516_v18 = vpop.f32.mrb[40].mxu0 }
 0x693   : > { %1955 = vmax.xlane.f32.xlu1 %v7244_v24  ;;  %v1914_v21 = vpop.f32.mrb[41].mxu0  ;;  %v7256_v44 = vadd.f32 %v5516_v18, %v7026_v31 }
 0x694   : > { %v5517_v57 = vpop.f32.mrb[42].mxu0  ;;  %v7264_v22 = vadd.f32 %v1914_v21, %v7026_v31 }
 0x695   : > { %v7252_v1 = vadd.f32 %v5517_v57, %v7026_v31  ;;  %1953 = vmax.xlane.f32.xlu0 %v7248_v52  ;;  %v1917_v54 = vpop.f32.mrb[43].mxu0 }
 0x696   : > { %v7260_v58 = vadd.f32 %v1917_v54, %v7026_v31 }
 0x697   : > { %1967 = vmax.xlane.f32.xlu1 %v7252_v1 }
 0x699   : > { %1965 = vmax.xlane.f32.xlu0 %v7256_v44 }
 0x69a   : > { %v5520_v19 = vpop.f32.mrb[44].mxu0 }
 0x69b   : > { %1963 = vmax.xlane.f32.xlu1 %v7260_v58  ;;  %v1930_v12 = vpop.f32.mrb[45].mxu0  ;;  %v7269_v56 = vadd.f32 %v5520_v19, %v7026_v31 }
 0x69c   : > { %v5521_v59 = vpop.f32.mrb[46].mxu0  ;;  %v7273_v60 = vadd.f32 %v1930_v12, %v7026_v31 }
 0x69d   : > { %1961 = vmax.xlane.f32.xlu0 %v7264_v22  ;;  %v1933_v62 = vpop.f32.mrb[47].mxu0  ;;  %v7281_v2 = vadd.f32 %v5521_v59, %v7026_v31 }
 0x69e   : > { %v7285_v34 = vadd.f32 %v1933_v62, %v7026_v31 }
 0x6a1   : > { %1973 = vmax.xlane.f32.xlu0 %v7269_v56 }
 0x6a5   : > { %1969 = vmax.xlane.f32.xlu0 %v7273_v60 }
 0x6ac   : > { %2289 = vrot.lane.b32.xlu1 %v6956_v40, %s6401_s3 }
 0x6bb   : > { %2287 = vrot.lane.b32.xlu0 %v6958_v50, %s6401_s3 }
 0x6d0   : > { %1975 = vmax.xlane.f32.xlu1 %v7281_v2 }
 0x6d4   : > { %1971 = vmax.xlane.f32.xlu1 %v7285_v34 }
 0x712   : > { %v1950_v35 = vpop.xlane.xlu0 %1949 }
 0x713   : > { %v1979_v6 = vsub.f32 %v1891_v37, %v1950_v35 }
 0x715   : > { %v1997_v53 = vmul.f32 1.442695, %v1979_v6  ;;  %v1948_v25 = vpop.xlane.xlu1 %1947 }
 0x716   : > { %v1978_v13 = vsub.f32 %v1886_v43, %v1948_v25  ;;  %v1946_v16 = vpop.xlane.xlu0 %1945 }
 0x717   : > { %5979 = vpow2.f32 %v1997_v53  ;;  %v1977_v41 = vsub.f32 %v1883_v46, %v1946_v16 }
 0x718   : > { %v1995_v61 = vmul.f32 1.442695, %v1978_v13 }
 0x719   : > { %v1993_v47 = vmul.f32 1.442695, %v1977_v41 }
 0x71a   : > { %5981 = vpow2.f32 %v1995_v61  ;;  %v1952_v28 = vpop.xlane.xlu0 %1951 }
 0x71b   : > { %5983 = vpow2.f32 %v1993_v47  ;;  %v1980_v4 = vsub.f32 %v1894_v49, %v1952_v28 }
 0x71c   : > { %v1960_v55 = vpop.xlane.xlu1 %1959 }
 0x71d   : > { %v1999_v7 = vmul.f32 1.442695, %v1980_v4  ;;  %v1984_v15 = vsub.f32 %v7237_v23, %v1960_v55 }
 0x71e   : > { %v1958_v29 = vpop.xlane.xlu0 %1957 }
 0x71f   : > { %5985 = vpow2.f32 %v1999_v7  ;;  %v1983_v33 = vsub.f32 %v7240_v27, %v1958_v29  ;;  %v2007_v20 = vmul.f32 1.442695, %v1984_v15 }
 0x720   : > { %v1956_v36 = vpop.xlane.xlu1 %1955 }
 0x721   : > { %v7290_v11 = vpop.eup %5979  ;;  %v2005_v38 = vmul.f32 1.442695, %v1983_v33  ;;  %v1982_v42 = vsub.f32 %v7244_v24, %v1956_v36 }
 0x722   : > { %2029 = vadd.xlane.f32.xlu1 %v7290_v11  ;;  %v1954_v30 = vpop.xlane.xlu0 %1953 }
 0x723   : > { %v1981_v39 = vsub.f32 %v7248_v52, %v1954_v30  ;;  %5987 = vpow2.f32 %v2005_v38  ;;  %v2003_v45 = vmul.f32 1.442695, %v1982_v42 }
 0x724   : > { %v7293_v5 = vpop.eup %5981  ;;  %v1968_v43 = vpop.xlane.xlu1 %1967 }
 0x725   : > { %v7295_v48 = vpop.eup %5983  ;;  %2027 = vadd.xlane.f32.xlu0 %v7293_v5  ;;  %v2001_v49 = vmul.f32 1.442695, %v1981_v39  ;;  %v1988_v23 = vsub.f32 %v7252_v1, %v1968_v43 }
 0x726   : > { %2025 = vadd.xlane.f32.xlu1 %v7295_v48  ;;  %v1966_v32 = vpop.xlane.xlu0 %1965 }
 0x727   : > { %v1987_v26 = vsub.f32 %v7256_v44, %v1966_v32  ;;  %5989 = vpow2.f32 %v2001_v49  ;;  %v2015_v62 = vmul.f32 1.442695, %v1988_v23 }
 0x728   : > { %v1964_v18 = vpop.xlane.xlu1 %1963  ;;  %5991 = vpow2.f32 %v2003_v45 }
 0x729   : > { %v7299_v17 = vpop.eup %5985  ;;  %v2013_v21 = vmul.f32 1.442695, %v1987_v26  ;;  %5993 = vpow2.f32 %v2007_v20  ;;  %v2324_v26 = vsel %vm1333_vm2, %v7219_v51, 0 }
 0x72a   : > { %2031 = vadd.xlane.f32.xlu1 %v7299_v17  ;;  %v1962_v37 = vpop.xlane.xlu0 %1961 }
 0x72b   : > { %v1985_v52 = vsub.f32 %v7264_v22, %v1962_v37  ;;  %5995 = vpow2.f32 %v2013_v21  ;;  %v1986_v22 = vsub.f32 %v7260_v58, %v1964_v18 }
 0x72c   : > { %v7317_v44 = vpop.permute.xlu1 %2289 }
 0x72d   : > { %v2009_v19 = vmul.f32 1.442695, %v1985_v52  ;;  %v7315_v12 = vpop.eup %5987  ;;  %v2011_v6 = vmul.f32 1.442695, %v1986_v22 }
 0x72e   : > { %v1974_v46 = vpop.xlane.xlu0 %1973 }
 0x72f   : > { %v1991_v27 = vsub.f32 %v7269_v56, %v1974_v46 }
 0x731   : > { %v2021_v24 = vmul.f32 1.442695, %v1991_v27  ;;  %v7321_v56 = vpop.eup %5989 }
 0x732   : > { %v1970_v57 = vpop.xlane.xlu0 %1969 }
 0x733   : > { %v1989_v54 = vsub.f32 %v7273_v60, %v1970_v57  ;;  %5997 = vpow2.f32 %v2021_v24  ;;  %v7323_v60 = vpop.eup %5991 }
 0x734   : > { %5999 = vpow2.f32 %v2009_v19  ;;  %v7328_v25 = vpop.eup %5993 }
 0x735   : > { %v2017_v59 = vmul.f32 1.442695, %v1989_v54  ;;  %v7330_v58 = vpop.eup %5995 }
 0x736   : > { %v2288_v29 = vpop.permute.xlu0 %2287 }
 0x737   : > { %6001 = vpow2.f32 %v2017_v59 }
 0x738   : > { %6003 = vpow2.f32 %v2015_v62 }
 0x73b   : > { %2291 = vrot.lane.b32.xlu0 %v6966_v0, %s6401_s3  ;;  %2293 = vrot.lane.b32.xlu1 %v6964_v63, %s6401_s3 }
 0x73d   : > { %v7335_v41 = vpop.eup %5997 }
 0x73e   : > { %v7337_v61 = vpop.eup %5999 }
 0x741   : > { %v7341_v47 = vpop.eup %6001 }
 0x742   : > { %v7343_v28 = vpop.eup %6003 }
 0x75a   : > { %2037 = vadd.xlane.f32.xlu0 %v7315_v12 }
 0x75d   : > { %v1976_v35 = vpop.xlane.xlu1 %1975 }
 0x75e   : > { %v1992_v1 = vsub.f32 %v7281_v2, %v1976_v35  ;;  %2033 = vadd.xlane.f32.xlu0 %v7321_v56 }
 0x75f   : > { %2035 = vadd.xlane.f32.xlu1 %v7323_v60 }
 0x760   : > { %v2023_v53 = vmul.f32 1.442695, %v1992_v1 }
 0x761   : > { %v1972_v13 = vpop.xlane.xlu1 %1971 }
 0x762   : > { %6005 = vpow2.f32 %v2023_v53  ;;  %v1990_v16 = vsub.f32 %v7285_v34, %v1972_v13  ;;  %2039 = vadd.xlane.f32.xlu0 %v7328_v25 }
 0x763   : > { %2045 = vadd.xlane.f32.xlu1 %v7330_v58  ;;  %6007 = vpow2.f32 %v2011_v6 }
 0x764   : > { %v2019_v2 = vmul.f32 1.442695, %v1990_v16 }
 0x766   : > { %2053 = vadd.xlane.f32.xlu0 %v7335_v41  ;;  %6009 = vpow2.f32 %v2019_v2 }
 0x767   : > { %2041 = vadd.xlane.f32.xlu1 %v7337_v61 }
 0x76a   : > { %2049 = vadd.xlane.f32.xlu0 %v7341_v47 }
 0x76b   : > { %2047 = vadd.xlane.f32.xlu1 %v7343_v28 }
 0x76c   : > { %v7347_v34 = vpop.eup %6005 }
 0x76d   : > { %v7349_v4 = vpop.eup %6007 }
 0x76e   : > { %2055 = vadd.xlane.f32.xlu0 %v7347_v34 }
 0x76f   : > { %2043 = vadd.xlane.f32.xlu1 %v7349_v4 }
 0x770   : > { %v7353_v7 = vpop.eup %6009 }
 0x773   : > { %2051 = vadd.xlane.f32.xlu1 %v7353_v7 }
 0x784   : > { %2297 = vrot.lane.b32.xlu1 %v6972_v9, %s6401_s3  ;;  %2295 = vrot.lane.b32.xlu0 %v6974_v10, %s6401_s3 }
 0x788   : > { %2269 = vrot.lane.b32.xlu1 %v6946_v14, %s6402_s9  ;;  %2267 = vrot.lane.b32.xlu0 %v6948_v3, %s6402_s9 }
 0x78c   : > { %2273 = vrot.lane.b32.xlu1 %v6956_v40, %s6402_s9  ;;  %2271 = vrot.lane.b32.xlu0 %v6958_v50, %s6402_s9 }
 0x790   : > { %2277 = vrot.lane.b32.xlu1 %v6964_v63, %s6402_s9  ;;  %2275 = vrot.lane.b32.xlu0 %v6966_v0, %s6402_s9 }
 0x794   : > { %2281 = vrot.lane.b32.xlu1 %v6972_v9, %s6402_s9  ;;  %2279 = vrot.lane.b32.xlu0 %v6974_v10, %s6402_s9  ;;  %s8604_s9 = sld [smem:[#allocation33_spill]] }
 0x798   : > { %2598 = vrot.lane.b32.xlu1 %v6946_v14, %s6403_s28  ;;  %2596 = vrot.lane.b32.xlu0 %v6948_v3, %s6403_s28 }
 0x79c   : > { %2602 = vrot.lane.b32.xlu1 %v6956_v40, %s6403_s28  ;;  %2600 = vrot.lane.b32.xlu0 %v6958_v50, %s6403_s28 }
 0x7a0   : > { %2606 = vrot.lane.b32.xlu1 %v6964_v63, %s6403_s28  ;;  %2604 = vrot.lane.b32.xlu0 %v6966_v0, %s6403_s28 }
 0x7a4   : > { %2610 = vrot.lane.b32.xlu1 %v6972_v9, %s6403_s28  ;;  %2608 = vrot.lane.b32.xlu0 %v6974_v10, %s6403_s28 }
 0x7a8   : > { %2784 = vrot.lane.b32.xlu1 %v6946_v14, %s6404_s5  ;;  %2782 = vrot.lane.b32.xlu0 %v6948_v3, %s6404_s5 }
 0x7af   : > { %v2030_v30 = vpop.xlane.xlu1 %2029 }
 0x7b2   : > { %v2028_v55 = vpop.xlane.xlu0 %2027 }
 0x7b3   : > { %6011 = vrcp.f32 %v2028_v55  ;;  %v2026_v32 = vpop.xlane.xlu1 %2025 }
 0x7b4   : > { %6013 = vrcp.f32 %v2026_v32 }
 0x7b5   : > { %6015 = vrcp.f32 %v2030_v30 }
 0x7b6   : > { %v2292_v51 = vpop.permute.xlu0 %2291 }
 0x7b7   : > { %v2032_v33 = vpop.xlane.xlu1 %2031 }
 0x7b8   : > { %6017 = vrcp.f32 %v2032_v33 }
 0x7bd   : > { %v6012_v36 = vpop.eup %6011 }
 0x7be   : > { %v6014_v37 = vpop.eup %6013  ;;  %v2074_v38 = vmul.f32 %v6012_v36, %v7293_v5  ;;  %v2327_v5 = vsel %vm1333_vm2, %v7288_v8, 0 }
 0x7bf   : > { %v2073_v39 = vmul.f32 %v6014_v37, %v7295_v48  ;;  %v6016_v42 = vpop.eup %6015  ;;  %v2333_v48 = vsel %vm1333_vm2, %v7317_v44, 0 }
 0x7c0   : > { %v2075_v15 = vmul.f32 %v6016_v42, %v7290_v11  ;;  %v2330_v11 = vsel %vm1333_vm2, %v2288_v29, 0 }
 0x7c1   : > { %v2089_v43 = vpack.c.bf16 %v2074_v38, %v2073_v39 }
 0x7c2   : > { %v6018_v46 = vpop.eup %6017 }
 0x7c3   : > { %v2076_v49 = vmul.f32 %v6018_v46, %v7299_v17  ;;  %5538 = vmatprep.mubr.bf16.mxu1 %v2089_v43  ;;  %v2336_v17 = vsel %vm1333_vm2, %v2292_v51, 0 }
 0x7c5   : > { %v2090_v45 = vpack.c.bf16 %v2076_v49, %v2075_v15 }
 0x7c7   : > { %5539 = vmatmul.mubr.bf16.vlgmr.msra.gmra.mrb[16].mxu1 %v2090_v45 }
 0x7c8   : > { %5555 = vmatpush3.bf16.xpose.msra.mxu1 %v2324_v26 }
 0x7c9   : > { %5743 = vmatprep.subr.msk.bf16.mxu1 %vm1333_vm2, %v7288_v8  ;;  %v2294_v8 = vpop.permute.xlu1 %2293 }
 0x7ca   : > { %v2339_v21 = vsel %vm1333_vm2, %v2294_v8, 0 }
 0x7d0   : > { %5557 = vmatpush3.bf16.xpose.msra.mxu1 %v2327_v5 }
 0x7d1   : > { %5744 = vmatprep.subr.msk.bf16.mxu1 %vm1333_vm2, %v2288_v29 }
 0x7d8   : > { %5559 = vmatpush3.bf16.xpose.msra.mxu1 %v2330_v11 }
 0x7d9   : > { %5745 = vmatprep.subr.msk.bf16.mxu1 %vm1333_vm2, %v7317_v44 }
 0x7e0   : > { %5561 = vmatpush3.bf16.xpose.msra.mxu1 %v2333_v48 }
 0x7e1   : > { %5746 = vmatprep.subr.msk.bf16.mxu1 %vm1333_vm2, %v2292_v51 }
 0x7e7   : > { %v2038_v20 = vpop.xlane.xlu0 %2037 }
 0x7e8   : > { %5563 = vmatpush3.bf16.xpose.msra.mxu1 %v2336_v17 }
 0x7e9   : > { %5747 = vmatprep.subr.msk.bf16.mxu1 %vm1333_vm2, %v2294_v8 }
 0x7eb   : > { %v2034_v18 = vpop.xlane.xlu0 %2033 }
 0x7ec   : > { %6019 = vrcp.f32 %v2034_v18  ;;  %v2036_v27 = vpop.xlane.xlu1 %2035 }
 0x7ed   : > { %6021 = vrcp.f32 %v2036_v27 }
 0x7ee   : > { %6023 = vrcp.f32 %v2038_v20 }
 0x7ef   : > { %v2040_v52 = vpop.xlane.xlu0 %2039 }
 0x7f0   : > { %5565 = vmatpush3.bf16.xpose.msra.mxu1 %v2339_v21  ;;  %6025 = vrcp.f32 %v2040_v52  ;;  %v2046_v57 = vpop.xlane.xlu1 %2045 }
 0x7f3   : > { %v2054_v24 = vpop.xlane.xlu0 %2053 }
 0x7f4   : > { %v2042_v54 = vpop.xlane.xlu1 %2041 }
 0x7f6   : > { %v6020_v23 = vpop.eup %6019 }
 0x7f7   : > { %v6022_v19 = vpop.eup %6021  ;;  %v2050_v44 = vpop.xlane.xlu0 %2049  ;;  %v2077_v59 = vmul.f32 %v6020_v23, %v7321_v56 }
 0x7f8   : > { %v6024_v62 = vpop.eup %6023  ;;  %v2048_v22 = vpop.xlane.xlu1 %2047  ;;  %v2078_v35 = vmul.f32 %v6022_v19, %v7323_v60 }
 0x7f9   : > { %6027 = vrcp.f32 %v2048_v22  ;;  %v2079_v13 = vmul.f32 %v6024_v62, %v7315_v12 }
 0x7fa   : > { %v6026_v1 = vpop.eup %6025  ;;  %v2091_v6 = vpack.c.bf16 %v2078_v35, %v2077_v59  ;;  %6029 = vrcp.f32 %v2042_v54 }
 0x7fb   : > { %v2056_v53 = vpop.xlane.xlu0 %2055  ;;  %v2080_v16 = vmul.f32 %v6026_v1, %v7328_v25  ;;  %6031 = vrcp.f32 %v2046_v57 }
 0x7fc   : > { %v2044_v2 = vpop.xlane.xlu1 %2043  ;;  %5542 = vmatprep.mubr.bf16.mxu1 %v2091_v6 }
 0x7fd   : > { %6033 = vrcp.f32 %v2044_v2  ;;  %v2092_v29 = vpack.c.bf16 %v2080_v16, %v2079_v13 }
 0x7fe   : > { %6035 = vrcp.f32 %v2050_v44 }
 0x7ff   : > { %5543 = vmatmul.mubr.bf16.gmra.mrb[20].mxu1 %v2092_v29  ;;  %v2296_v56 = vpop.permute.xlu0 %2295 }
 0x800   : > { %v2052_v30 = vpop.xlane.xlu1 %2051  ;;  %5748 = vmatprep.subr.msk.bf16.mxu1 %vm1333_vm2, %v2296_v56  ;;  %v2342_v60 = vsel %vm1333_vm2, %v2296_v56, 0 }
 0x801   : > { %6037 = vrcp.f32 %v2052_v30  ;;  %5567 = vmatpush3.bf16.xpose.msra.mxu1 %v2342_v60 }
 0x802   : > { %6039 = vrcp.f32 %v2056_v53 }
 0x803   : > { %v2268_v55 = vpop.permute.xlu0 %2267  ;;  %v6028_v12 = vpop.eup %6027  ;;  %6041 = vrcp.f32 %v2054_v24 }
 0x804   : > { %v2298_v25 = vpop.permute.xlu1 %2297  ;;  %v6030_v32 = vpop.eup %6029  ;;  %v2084_v38 = vmul.f32 %v6028_v12, %v7343_v28 }
 0x805   : > { %5749 = vmatprep.subr.msk.bf16.mxu1 %vm1333_vm2, %v2298_v25  ;;  %v6032_v33 = vpop.eup %6031  ;;  %v2345_v42 = vsel %vm1333_vm2, %v2298_v25, 0  ;;  %v2081_v43 = vmul.f32 %v6030_v32, %v7337_v61 }
 0x806   : > { %v2083_v49 = vmul.f32 %v6032_v33, %v7330_v58 }
 0x807   : > { %v6034_v36 = vpop.eup %6033  ;;  %v2272_v37 = vpop.permute.xlu0 %2271 }
 0x808   : > { %v2270_v39 = vpop.permute.xlu1 %2269  ;;  %v2082_v46 = vmul.f32 %v6034_v36, %v7349_v4  ;;  %v6036_v15 = vpop.eup %6035  ;;  %v2094_v11 = vpack.c.bf16 %v2084_v38, %v2083_v49 }
 0x809   : > { %5569 = vmatpush3.bf16.xpose.msra.mxu1 %v2345_v42  ;;  %v2085_v28 = vmul.f32 %v6036_v15, %v7341_v47 }
 0x80a   : > { %v2093_v45 = vpack.c.bf16 %v2082_v46, %v2081_v43 }
 0x80b   : > { %v6038_v26 = vpop.eup %6037  ;;  %v2276_v5 = vpop.permute.xlu0 %2275 }
 0x80c   : > { %v6040_v48 = vpop.eup %6039  ;;  %v2274_v51 = vpop.permute.xlu1 %2273  ;;  %5546 = vmatprep.mubr.bf16.mxu1 %v2093_v45  ;;  %v2086_v17 = vmul.f32 %v6038_v26, %v7353_v7 }
 0x80d   : > { %5547 = vmatmul.mubr.bf16.gmra.mrb[24].mxu1 %v2094_v11  ;;  %v6042_v20 = vpop.eup %6041  ;;  %v2088_v4 = vmul.f32 %v6040_v48, %v7347_v34 }
 0x80e   : > { %v2095_v61 = vpack.c.bf16 %v2086_v17, %v2085_v28  ;;  %v2087_v58 = vmul.f32 %v6042_v20, %v7335_v41 }
 0x80f   : > { %v2280_v8 = vpop.permute.xlu0 %2279 }
 0x810   : > { %v2278_v18 = vpop.permute.xlu1 %2277  ;;  %5550 = vmatprep.mubr.bf16.mxu1 %v2095_v61  ;;  %v2096_v21 = vpack.c.bf16 %v2088_v4, %v2087_v58 }
 0x813   : > { %v2597_v27 = vpop.permute.xlu0 %2596 }
 0x814   : > { %v2282_v52 = vpop.permute.xlu1 %2281  ;;  %5586 = vmatprep.subr.bf16.mxu0 %v2597_v27 }
 0x815   : > { %5551 = vmatmul.mubr.bf16.gmra.mrb[28].mxu1 %v2096_v21  ;;  %5587 = vmatpush3.bf16.msra.mxu0 %v2597_v27 }
 0x816   : > { %5570 = vmatprep.mubr.msk.bf16.mxu1 %vm1333_vm2, %v2268_v55 }
 0x817   : > { %v2601_v7 = vpop.permute.xlu0 %2600 }
 0x818   : > { %v2599_v47 = vpop.permute.xlu1 %2598 }
 0x819   : > { %5588 = vmatprep.subr.bf16.mxu0 %v2599_v47 }
 0x81a   : > { %5589 = vmatpush3.bf16.msra.mxu0 %v2599_v47 }
 0x81b   : > { %5590 = vmatprep.subr.bf16.mxu0 %v2601_v7  ;;  %v2605_v41 = vpop.permute.xlu0 %2604 }
 0x81c   : > { %v2603_v34 = vpop.permute.xlu1 %2602 }
 0x81d   : > { %5571 = vmatmul.mubr.msk.bf16.vlgmr.msra.gmra.mrb[32].mxu1 %vm1333_vm2, %v2270_v39 }
 0x81e   : > { %5574 = vmatprep.mubr.msk.bf16.mxu1 %vm1333_vm2, %v2272_v37  ;;  %5591 = vmatpush3.bf16.msra.mxu0 %v2601_v7 }
 0x81f   : > { %5592 = vmatprep.subr.bf16.mxu0 %v2603_v34  ;;  %v2609_v24 = vpop.permute.xlu0 %2608 }
 0x820   : > { %v2607_v57 = vpop.permute.xlu1 %2606 }
 0x822   : > { %5593 = vmatpush3.bf16.msra.mxu0 %v2603_v34 }
 0x823   : > { %5594 = vmatprep.subr.bf16.mxu0 %v2605_v41  ;;  %v7423_v23 = vpop.permute.xlu0 %2782 }
 0x824   : > { %v2611_v54 = vpop.permute.xlu1 %2610 }
 0x825   : > { %5575 = vmatmul.mubr.msk.bf16.gmra.mrb[36].mxu1 %vm1333_vm2, %v2274_v51 }
 0x826   : > { %5578 = vmatprep.mubr.msk.bf16.mxu1 %vm1333_vm2, %v2276_v5  ;;  %5595 = vmatpush3.bf16.msra.mxu0 %v2605_v41 }
 0x827   : > { %5596 = vmatprep.subr.bf16.mxu0 %v2607_v57 }
 0x82a   : > { %5597 = vmatpush3.bf16.msra.mxu0 %v2607_v57 }
 0x82b   : > { %5598 = vmatprep.subr.bf16.mxu0 %v2609_v24 }
 0x82d   : > { %5579 = vmatmul.mubr.msk.bf16.gmra.mrb[40].mxu1 %vm1333_vm2, %v2278_v18 }
 0x82e   : > { %5582 = vmatprep.mubr.msk.bf16.mxu1 %vm1333_vm2, %v2280_v8  ;;  %5599 = vmatpush3.bf16.msra.mxu0 %v2609_v24 }
 0x82f   : > { %5600 = vmatprep.subr.bf16.mxu0 %v2611_v54 }
 0x832   : > { %5601 = vmatpush3.bf16.msra.mxu0 %v2611_v54 }
 0x833   : > { %5750 = vmatprep.subr.msk.bf16.mxu0 %vm1333_vm2, %v7423_v23 }
 0x835   : > { %5583 = vmatmul.mubr.msk.bf16.gmra.mrb[44].mxu1 %vm1333_vm2, %v2282_v52 }
 0x89a   : > { %v7428_v19 = vpop.f32.mrb[16].mxu1 }
 0x89b   : > { %v7430_v44 = vpop.f32.mrb[17].mxu1 }
 0x89c   : > { %v7432_v59 = vpop.f32.mrb[18].mxu1 }
 0x89d   : > { %v7436_v22 = vpop.f32.mrb[19].mxu1 }
 0x8d2   : > { %v7440_v1 = vpop.f32.mrb[20].mxu1 }
 0x8d3   : > { %v7442_v6 = vpop.f32.mrb[21].mxu1 }
 0x8d4   : > { %v7444_v53 = vpop.f32.mrb[22].mxu1 }
 0x8d5   : > { %v7448_v16 = vpop.f32.mrb[23].mxu1 }
 0x8e0   : > { %v7452_v29 = vpop.f32.mrb[24].mxu1 }
 0x8e1   : > { %v7454_v56 = vpop.f32.mrb[25].mxu1 }
 0x8e2   : > { %v7456_v30 = vpop.f32.mrb[26].mxu1 }
 0x8e3   : > { %v7460_v55 = vpop.f32.mrb[27].mxu1 }
 0x8e8   : > { %v7464_v25 = vpop.f32.mrb[28].mxu1 }
 0x8e9   : > { %v7466_v32 = vpop.f32.mrb[29].mxu1 }
 0x8ea   : > { %v7468_v33 = vpop.f32.mrb[30].mxu1 }
 0x8eb   : > { %v7472_v37 = vpop.f32.mrb[31].mxu1 }
 0x8f0   : > { %v5572_v39 = vpop.f32.mrb[32].mxu1 }
 0x8f1   : > { %v2390_v42 = vadd.f32 %v5572_v39, %v7026_v31  ;;  %v2381_v43 = vpop.f32.mrb[33].mxu1 }
 0x8f2   : > { %v5573_v46 = vpop.f32.mrb[34].mxu1  ;;  %v2382_v45 = vadd.f32 %v2381_v43, %v7026_v31 }
 0x8f3   : > { %2448 = vmax.xlane.f32.xlu0 %v2390_v42  ;;  %v2384_v15 = vpop.f32.mrb[35].mxu1  ;;  %v2393_v5 = vadd.f32 %v5573_v46, %v7026_v31  ;;  %v7532_v46 = vpop.permute.xlu1 %2784 }
 0x8f4   : > { %v2385_v49 = vadd.f32 %v2384_v15, %v7026_v31 }
 0x8f6   : > { %2446 = vmax.xlane.f32.xlu1 %v2385_v49 }
 0x8f7   : > { %2444 = vmax.xlane.f32.xlu0 %v2382_v45 }
 0x8f8   : > { %v5576_v26 = vpop.f32.mrb[36].mxu1 }
 0x8f9   : > { %v2397_v11 = vpop.f32.mrb[37].mxu1  ;;  %v7484_v17 = vadd.f32 %v5576_v26, %v7026_v31 }
 0x8fa   : > { %v5577_v48 = vpop.f32.mrb[38].mxu1  ;;  %v7492_v8 = vadd.f32 %v2397_v11, %v7026_v31 }
 0x8fb   : > { %v7481_v51 = vadd.f32 %v5577_v48, %v7026_v31  ;;  %2450 = vmax.xlane.f32.xlu0 %v2393_v5  ;;  %v2400_v28 = vpop.f32.mrb[39].mxu1 }
 0x8fc   : > { %v7488_v20 = vadd.f32 %v2400_v28, %v7026_v31 }
 0x8fd   : > { %2458 = vmax.xlane.f32.xlu1 %v7481_v51 }
 0x8ff   : > { %2456 = vmax.xlane.f32.xlu0 %v7484_v17 }
 0x900   : > { %v5580_v61 = vpop.f32.mrb[40].mxu1 }
 0x901   : > { %2454 = vmax.xlane.f32.xlu1 %v7488_v20  ;;  %v2413_v4 = vpop.f32.mrb[41].mxu1  ;;  %v7500_v21 = vadd.f32 %v5580_v61, %v7026_v31 }
 0x902   : > { %v5581_v18 = vpop.f32.mrb[42].mxu1  ;;  %v7508_v7 = vadd.f32 %v2413_v4, %v7026_v31 }
 0x903   : > { %v7496_v58 = vadd.f32 %v5581_v18, %v7026_v31  ;;  %2452 = vmax.xlane.f32.xlu0 %v7492_v8  ;;  %v2416_v27 = vpop.f32.mrb[43].mxu1 }
 0x904   : > { %v7504_v52 = vadd.f32 %v2416_v27, %v7026_v31 }
 0x905   : > { %2466 = vmax.xlane.f32.xlu1 %v7496_v58 }
 0x907   : > { %2464 = vmax.xlane.f32.xlu0 %v7500_v21 }
 0x908   : > { %v5584_v47 = vpop.f32.mrb[44].mxu1 }
 0x909   : > { %2462 = vmax.xlane.f32.xlu1 %v7504_v52  ;;  %v2429_v34 = vpop.f32.mrb[45].mxu1  ;;  %v7513_v24 = vadd.f32 %v5584_v47, %v7026_v31 }
 0x90a   : > { %v5585_v41 = vpop.f32.mrb[46].mxu1  ;;  %v7517_v54 = vadd.f32 %v2429_v34, %v7026_v31 }
 0x90b   : > { %2460 = vmax.xlane.f32.xlu0 %v7508_v7  ;;  %v2432_v57 = vpop.f32.mrb[47].mxu1  ;;  %v7525_v39 = vadd.f32 %v5585_v41, %v7026_v31 }
 0x90c   : > { %v7529_v43 = vadd.f32 %v2432_v57, %v7026_v31 }
 0x90f   : > { %2472 = vmax.xlane.f32.xlu0 %v7513_v24 }
 0x913   : > { %2468 = vmax.xlane.f32.xlu0 %v7517_v54 }
 0x91a   : > { %2788 = vrot.lane.b32.xlu1 %v6956_v40, %s6404_s5 }
 0x929   : > { %2786 = vrot.lane.b32.xlu0 %v6958_v50, %s6404_s5 }
 0x93e   : > { %2474 = vmax.xlane.f32.xlu1 %v7525_v39 }
 0x942   : > { %2470 = vmax.xlane.f32.xlu1 %v7529_v43 }
 0x980   : > { %v2449_v15 = vpop.xlane.xlu0 %2448 }
 0x981   : > { %v2478_v26 = vsub.f32 %v2390_v42, %v2449_v15 }
 0x983   : > { %v2496_v11 = vmul.f32 1.442695, %v2478_v26  ;;  %v2447_v48 = vpop.xlane.xlu1 %2446 }
 0x984   : > { %v2477_v28 = vsub.f32 %v2385_v49, %v2447_v48  ;;  %v2445_v61 = vpop.xlane.xlu0 %2444 }
 0x985   : > { %6043 = vpow2.f32 %v2496_v11  ;;  %v2476_v4 = vsub.f32 %v2382_v45, %v2445_v61 }
 0x986   : > { %v2494_v18 = vmul.f32 1.442695, %v2477_v28 }
 0x987   : > { %v2492_v27 = vmul.f32 1.442695, %v2476_v4 }
 0x988   : > { %6045 = vpow2.f32 %v2494_v18  ;;  %v2451_v47 = vpop.xlane.xlu0 %2450 }
 0x989   : > { %6047 = vpow2.f32 %v2492_v27  ;;  %v2479_v34 = vsub.f32 %v2393_v5, %v2451_v47 }
 0x98a   : > { %v2459_v15 = vpop.xlane.xlu1 %2458 }
 0x98b   : > { %v2498_v41 = vmul.f32 1.442695, %v2479_v34  ;;  %v2483_v34 = vsub.f32 %v7481_v51, %v2459_v15 }
 0x98c   : > { %v2457_v45 = vpop.xlane.xlu0 %2456 }
 0x98d   : > { %6049 = vpow2.f32 %v2498_v41  ;;  %v2482_v11 = vsub.f32 %v7484_v17, %v2457_v45  ;;  %v2506_v2 = vmul.f32 1.442695, %v2483_v34 }
 0x98e   : > { %v2455_v48 = vpop.xlane.xlu1 %2454 }
 0x98f   : > { %v7534_v57 = vpop.eup %6043  ;;  %v2504_v61 = vmul.f32 1.442695, %v2482_v11  ;;  %v2481_v18 = vsub.f32 %v7488_v20, %v2455_v48 }
 0x990   : > { %2528 = vadd.xlane.f32.xlu1 %v7534_v57  ;;  %v2453_v5 = vpop.xlane.xlu0 %2452 }
 0x991   : > { %v2480_v4 = vsub.f32 %v7492_v8, %v2453_v5  ;;  %6051 = vpow2.f32 %v2504_v61  ;;  %v2502_v36 = vmul.f32 1.442695, %v2481_v18 }
 0x992   : > { %v7537_v38 = vpop.eup %6045  ;;  %v2467_v27 = vpop.xlane.xlu1 %2466 }
 0x993   : > { %v7539_v42 = vpop.eup %6047  ;;  %2526 = vadd.xlane.f32.xlu0 %v7537_v38  ;;  %v2500_v41 = vmul.f32 1.442695, %v2480_v4  ;;  %v2487_v51 = vsub.f32 %v7496_v58, %v2467_v27 }
 0x994   : > { %2524 = vadd.xlane.f32.xlu1 %v7539_v42  ;;  %v2465_v26 = vpop.xlane.xlu0 %2464 }
 0x995   : > { %v2486_v12 = vsub.f32 %v7500_v21, %v2465_v26  ;;  %6053 = vpow2.f32 %v2500_v41 }
 0x996   : > { %v2463_v35 = vpop.xlane.xlu1 %2462  ;;  %6055 = vpow2.f32 %v2502_v36 }
 0x997   : > { %v7543_v49 = vpop.eup %6049  ;;  %v2512_v45 = vmul.f32 1.442695, %v2486_v12  ;;  %6057 = vpow2.f32 %v2506_v2  ;;  %v2514_v12 = vmul.f32 1.442695, %v2487_v51 }
 0x998   : > { %2530 = vadd.xlane.f32.xlu1 %v7543_v49  ;;  %v2461_v28 = vpop.xlane.xlu0 %2460 }
 0x999   : > { %v2484_v8 = vsub.f32 %v7508_v7, %v2461_v28  ;;  %6059 = vpow2.f32 %v2512_v45  ;;  %v2485_v7 = vsub.f32 %v7504_v52, %v2463_v35 }
 0x99a   : > { %v7561_v21 = vpop.permute.xlu1 %2788 }
 0x99b   : > { %v2508_v15 = vmul.f32 1.442695, %v2484_v8  ;;  %v7559_v48 = vpop.eup %6051  ;;  %v2510_v26 = vmul.f32 1.442695, %v2485_v7 }
 0x99c   : > { %v2473_v47 = vpop.xlane.xlu0 %2472 }
 0x99d   : > { %v2490_v17 = vsub.f32 %v7513_v24, %v2473_v47 }
 0x99f   : > { %v2520_v20 = vmul.f32 1.442695, %v2490_v17  ;;  %v7565_v2 = vpop.eup %6053 }
 0x9a0   : > { %v2469_v5 = vpop.xlane.xlu0 %2468 }
 0x9a1   : > { %v2488_v11 = vsub.f32 %v7517_v54, %v2469_v5  ;;  %6061 = vpow2.f32 %v2520_v20  ;;  %v7567_v54 = vpop.eup %6055 }
 0x9a2   : > { %6063 = vpow2.f32 %v2508_v15  ;;  %v7572_v61 = vpop.eup %6057 }
 0x9a3   : > { %v2516_v36 = vmul.f32 1.442695, %v2488_v11  ;;  %v7574_v35 = vpop.eup %6059 }
 0x9a4   : > { %v2787_v45 = vpop.permute.xlu0 %2786 }
 0x9a5   : > { %6065 = vpow2.f32 %v2516_v36 }
 0x9a6   : > { %6067 = vpow2.f32 %v2514_v12 }
 0x9a9   : > { %2790 = vrot.lane.b32.xlu0 %v6966_v0, %s6404_s5  ;;  %2792 = vrot.lane.b32.xlu1 %v6964_v63, %s6404_s5 }
 0x9ab   : > { %v7579_v18 = vpop.eup %6061 }
 0x9ac   : > { %v7581_v27 = vpop.eup %6063 }
 0x9af   : > { %v7585_v47 = vpop.eup %6065 }
 0x9b0   : > { %v7587_v34 = vpop.eup %6067 }
 0x9c8   : > { %2536 = vadd.xlane.f32.xlu0 %v7559_v48 }
 0x9cb   : > { %v2475_v24 = vpop.xlane.xlu1 %2474 }
 0x9cc   : > { %v2491_v58 = vsub.f32 %v7525_v39, %v2475_v24  ;;  %2532 = vadd.xlane.f32.xlu0 %v7565_v2 }
 0x9cd   : > { %2534 = vadd.xlane.f32.xlu1 %v7567_v54 }
 0x9ce   : > { %v2522_v28 = vmul.f32 1.442695, %v2491_v58 }
 0x9cf   : > { %v2471_v4 = vpop.xlane.xlu1 %2470 }
 0x9d0   : > { %6069 = vpow2.f32 %v2522_v28  ;;  %v2489_v52 = vsub.f32 %v7529_v43, %v2471_v4  ;;  %2538 = vadd.xlane.f32.xlu0 %v7572_v61 }
 0x9d1   : > { %2544 = vadd.xlane.f32.xlu1 %v7574_v35  ;;  %6071 = vpow2.f32 %v2510_v26  ;;  %v2823_v26 = vsel %vm1333_vm2, %v7423_v23, 0 }
 0x9d2   : > { %v2518_v39 = vmul.f32 1.442695, %v2489_v52 }
 0x9d4   : > { %2552 = vadd.xlane.f32.xlu0 %v7579_v18  ;;  %6073 = vpow2.f32 %v2518_v39 }
 0x9d5   : > { %2540 = vadd.xlane.f32.xlu1 %v7581_v27 }
 0x9d8   : > { %2548 = vadd.xlane.f32.xlu0 %v7585_v47 }
 0x9d9   : > { %2546 = vadd.xlane.f32.xlu1 %v7587_v34 }
 0x9da   : > { %v7591_v43 = vpop.eup %6069 }
 0x9db   : > { %v7593_v41 = vpop.eup %6071 }
 0x9dc   : > { %2554 = vadd.xlane.f32.xlu0 %v7591_v43 }
 0x9dd   : > { %2542 = vadd.xlane.f32.xlu1 %v7593_v41 }
 0x9de   : > { %v7597_v17 = vpop.eup %6073 }
 0x9e1   : > { %2550 = vadd.xlane.f32.xlu1 %v7597_v17 }
 0x9f2   : > { %2796 = vrot.lane.b32.xlu1 %v6972_v9, %s6404_s5  ;;  %2794 = vrot.lane.b32.xlu0 %v6974_v10, %s6404_s5 }
 0x9f6   : > { %2768 = vrot.lane.b32.xlu1 %v6946_v14, %s6405_s10  ;;  %2766 = vrot.lane.b32.xlu0 %v6948_v3, %s6405_s10 }
 0x9fa   : > { %2772 = vrot.lane.b32.xlu1 %v6956_v40, %s6405_s10  ;;  %2770 = vrot.lane.b32.xlu0 %v6958_v50, %s6405_s10 }
 0x9fe   : > { %2776 = vrot.lane.b32.xlu1 %v6964_v63, %s6405_s10  ;;  %2774 = vrot.lane.b32.xlu0 %v6966_v0, %s6405_s10 }
 0xa02   : > { %2780 = vrot.lane.b32.xlu1 %v6972_v9, %s6405_s10  ;;  %2778 = vrot.lane.b32.xlu0 %v6974_v10, %s6405_s10 }
 0xa06   : > { %3097 = vrot.lane.b32.xlu1 %v6946_v14, %s6406_s17  ;;  %3095 = vrot.lane.b32.xlu0 %v6948_v3, %s6406_s17 }
 0xa0a   : > { %3099 = vrot.lane.b32.xlu0 %v6958_v50, %s6406_s17 }
 0xa1d   : > { %v2529_v8 = vpop.xlane.xlu1 %2528 }
 0xa20   : > { %v2527_v5 = vpop.xlane.xlu0 %2526 }
 0xa21   : > { %6075 = vrcp.f32 %v2527_v5  ;;  %v2525_v20 = vpop.xlane.xlu1 %2524 }
 0xa22   : > { %6077 = vrcp.f32 %v2525_v20 }
 0xa23   : > { %6079 = vrcp.f32 %v2529_v8 }
 0xa24   : > { %v2791_v23 = vpop.permute.xlu0 %2790 }
 0xa25   : > { %v2531_v11 = vpop.xlane.xlu1 %2530 }
 0xa26   : > { %6081 = vrcp.f32 %v2531_v11 }
 0xa2b   : > { %v6076_v51 = vpop.eup %6075 }
 0xa2c   : > { %v6078_v15 = vpop.eup %6077  ;;  %v2573_v36 = vmul.f32 %v6076_v51, %v7537_v38  ;;  %v2826_v38 = vsel %vm1333_vm2, %v7532_v46, 0 }
 0xa2d   : > { %v2572_v14 = vmul.f32 %v6078_v15, %v7539_v42  ;;  %v6080_v12 = vpop.eup %6079  ;;  %v2832_v42 = vsel %vm1333_vm2, %v7561_v21, 0 }
 0xa2e   : > { %v2574_v50 = vmul.f32 %v6080_v12, %v7534_v57  ;;  %v2829_v57 = vsel %vm1333_vm2, %v2787_v45, 0 }
 0xa2f   : > { %v2588_v3 = vpack.c.bf16 %v2573_v36, %v2572_v14 }
 0xa30   : > { %v6082_v7 = vpop.eup %6081 }
 0xa31   : > { %v2575_v24 = vmul.f32 %v6082_v7, %v7543_v49  ;;  %5602 = vmatprep.mubr.bf16.mxu0 %v2588_v3  ;;  %v2835_v49 = vsel %vm1333_vm2, %v2791_v23, 0 }
 0xa33   : > { %v2589_v58 = vpack.c.bf16 %v2575_v24, %v2574_v50 }
 0xa35   : > { %5603 = vmatmul.mubr.bf16.vlgmr.msra.gmra.mrb[48].mxu0 %v2589_v58 }
 0xa36   : > { %5619 = vmatpush3.bf16.xpose.msra.mxu0 %v2823_v26 }
 0xa37   : > { %5751 = vmatprep.subr.msk.bf16.mxu0 %vm1333_vm2, %v7532_v46  ;;  %v2793_v46 = vpop.permute.xlu1 %2792 }
 0xa38   : > { %v2838_v39 = vsel %vm1333_vm2, %v2793_v46, 0 }
 0xa3e   : > { %5621 = vmatpush3.bf16.xpose.msra.mxu0 %v2826_v38 }
 0xa3f   : > { %5752 = vmatprep.subr.msk.bf16.mxu0 %vm1333_vm2, %v2787_v45 }
 0xa46   : > { %5623 = vmatpush3.bf16.xpose.msra.mxu0 %v2829_v57 }
 0xa47   : > { %5753 = vmatprep.subr.msk.bf16.mxu0 %vm1333_vm2, %v7561_v21 }
 0xa4e   : > { %5625 = vmatpush3.bf16.xpose.msra.mxu0 %v2832_v42 }
 0xa4f   : > { %5754 = vmatprep.subr.msk.bf16.mxu0 %vm1333_vm2, %v2791_v23 }
 0xa55   : > { %v2537_v28 = vpop.xlane.xlu0 %2536 }
 0xa56   : > { %5627 = vmatpush3.bf16.xpose.msra.mxu0 %v2835_v49 }
 0xa57   : > { %5755 = vmatprep.subr.msk.bf16.mxu0 %vm1333_vm2, %v2793_v46 }
 0xa59   : > { %v2533_v4 = vpop.xlane.xlu0 %2532 }
 0xa5a   : > { %6083 = vrcp.f32 %v2533_v4  ;;  %v2535_v52 = vpop.xlane.xlu1 %2534 }
 0xa5b   : > { %6085 = vrcp.f32 %v2535_v52 }
 0xa5c   : > { %6087 = vrcp.f32 %v2537_v28 }
 0xa5d   : > { %v2539_v45 = vpop.xlane.xlu0 %2538 }
 0xa5e   : > { %5629 = vmatpush3.bf16.xpose.msra.mxu0 %v2838_v39  ;;  %6089 = vrcp.f32 %v2539_v45  ;;  %v2545_v21 = vpop.xlane.xlu1 %2544 }
 0xa61   : > { %v2553_v8 = vpop.xlane.xlu0 %2552 }
 0xa62   : > { %v2541_v5 = vpop.xlane.xlu1 %2540 }
 0xa64   : > { %v6084_v20 = vpop.eup %6083 }
 0xa65   : > { %v6086_v11 = vpop.eup %6085  ;;  %v2549_v51 = vpop.xlane.xlu0 %2548  ;;  %v2576_v15 = vmul.f32 %v6084_v20, %v7565_v2 }
 0xa66   : > { %v6088_v36 = vpop.eup %6087  ;;  %v2547_v14 = vpop.xlane.xlu1 %2546  ;;  %v2577_v12 = vmul.f32 %v6086_v11, %v7567_v54 }
 0xa67   : > { %6091 = vrcp.f32 %v2547_v14  ;;  %v2578_v24 = vmul.f32 %v6088_v36, %v7559_v48 }
 0xa68   : > { %v6090_v3 = vpop.eup %6089  ;;  %v2590_v7 = vpack.c.bf16 %v2577_v12, %v2576_v15  ;;  %6093 = vrcp.f32 %v2541_v5 }
 0xa69   : > { %v2555_v50 = vpop.xlane.xlu0 %2554  ;;  %v2579_v58 = vmul.f32 %v6090_v3, %v7572_v61  ;;  %6095 = vrcp.f32 %v2545_v21 }
 0xa6a   : > { %v2543_v26 = vpop.xlane.xlu1 %2542  ;;  %5606 = vmatprep.mubr.bf16.mxu0 %v2590_v7 }
 0xa6b   : > { %6097 = vrcp.f32 %v2543_v26  ;;  %v2591_v38 = vpack.c.bf16 %v2579_v58, %v2578_v24 }
 0xa6c   : > { %6099 = vrcp.f32 %v2549_v51 }
 0xa6d   : > { %5607 = vmatmul.mubr.bf16.gmra.mrb[52].mxu0 %v2591_v38  ;;  %v2795_v2 = vpop.permute.xlu0 %2794 }
 0xa6e   : > { %v2551_v57 = vpop.xlane.xlu1 %2550  ;;  %5756 = vmatprep.subr.msk.bf16.mxu0 %vm1333_vm2, %v2795_v2  ;;  %v2841_v54 = vsel %vm1333_vm2, %v2795_v2, 0 }
 0xa6f   : > { %6101 = vrcp.f32 %v2551_v57  ;;  %5631 = vmatpush3.bf16.xpose.msra.mxu0 %v2841_v54 }
 0xa70   : > { %6103 = vrcp.f32 %v2555_v50 }
 0xa71   : > { %v2767_v42 = vpop.permute.xlu0 %2766  ;;  %v6092_v48 = vpop.eup %6091  ;;  %6105 = vrcp.f32 %v2553_v8 }
 0xa72   : > { %v2797_v61 = vpop.permute.xlu1 %2796  ;;  %v6094_v23 = vpop.eup %6093  ;;  %v2583_v4 = vmul.f32 %v6092_v48, %v7587_v34 }
 0xa73   : > { %5757 = vmatprep.subr.msk.bf16.mxu0 %vm1333_vm2, %v2797_v61  ;;  %v6096_v49 = vpop.eup %6095  ;;  %v2844_v39 = vsel %vm1333_vm2, %v2797_v61, 0  ;;  %v2580_v45 = vmul.f32 %v6094_v23, %v7581_v27 }
 0xa74   : > { %v2582_v8 = vmul.f32 %v6096_v49, %v7574_v35 }
 0xa75   : > { %v6098_v28 = vpop.eup %6097  ;;  %v2771_v46 = vpop.permute.xlu0 %2770 }
 0xa76   : > { %v2769_v52 = vpop.permute.xlu1 %2768  ;;  %v2581_v21 = vmul.f32 %v6098_v28, %v7593_v41  ;;  %v6100_v5 = vpop.eup %6099  ;;  %v2593_v15 = vpack.c.bf16 %v2583_v4, %v2582_v8 }
 0xa77   : > { %5633 = vmatpush3.bf16.xpose.msra.mxu0 %v2844_v39  ;;  %v2584_v34 = vmul.f32 %v6100_v5, %v7585_v47 }
 0xa78   : > { %v2592_v20 = vpack.c.bf16 %v2581_v21, %v2580_v45 }
 0xa79   : > { %v6102_v11 = vpop.eup %6101  ;;  %v2775_v51 = vpop.permute.xlu0 %2774 }
 0xa7a   : > { %v6104_v36 = vpop.eup %6103  ;;  %v2773_v14 = vpop.permute.xlu1 %2772  ;;  %5610 = vmatprep.mubr.bf16.mxu0 %v2592_v20  ;;  %v2585_v12 = vmul.f32 %v6102_v11, %v7597_v17 }
 0xa7b   : > { %5611 = vmatmul.mubr.bf16.gmra.mrb[56].mxu0 %v2593_v15  ;;  %v6106_v3 = vpop.eup %6105  ;;  %v2587_v41 = vmul.f32 %v6104_v36, %v7591_v43 }
 0xa7c   : > { %v2594_v27 = vpack.c.bf16 %v2585_v12, %v2584_v34  ;;  %v2586_v35 = vmul.f32 %v6106_v3, %v7579_v18 }
 0xa7d   : > { %v2779_v7 = vpop.permute.xlu0 %2778 }
 0xa7e   : > { %v2777_v50 = vpop.permute.xlu1 %2776  ;;  %5614 = vmatprep.mubr.bf16.mxu0 %v2594_v27  ;;  %v2595_v58 = vpack.c.bf16 %v2587_v41, %v2586_v35 }
 0xa81   : > { %v3096_v24 = vpop.permute.xlu0 %3095 }
 0xa82   : > { %v2781_v26 = vpop.permute.xlu1 %2780  ;;  %5650 = vmatprep.subr.bf16.mxu0 %v3096_v24  ;;  %5710 = vmatprep.subr.bf16.mxu1 %v3096_v24 }
 0xa83   : > { %5615 = vmatmul.mubr.bf16.gmra.mrb[60].mxu0 %v2595_v58  ;;  %5718 = vmatpush3.bf16.msra.mxu1 %v3096_v24 }
 0xa84   : > { %5634 = vmatprep.mubr.msk.bf16.mxu0 %vm1333_vm2, %v2767_v42 }
 0xa85   : > { %v3100_v17 = vpop.permute.xlu0 %3099 }
 0xa86   : > { %v3098_v47 = vpop.permute.xlu1 %3097 }
 0xa87   : > { %5711 = vmatprep.subr.bf16.mxu1 %v3098_v47 }
 0xa88   : > { %5719 = vmatpush3.bf16.msra.mxu1 %v3098_v47 }
 0xa89   : > { %5712 = vmatprep.subr.bf16.mxu1 %v3100_v17 }
 0xa8b   : > { %5635 = vmatmul.mubr.msk.bf16.vlgmr.msra.gmra.mrb[64].mxu0 %vm1333_vm2, %v2769_v52 }
 0xa8c   : > { %5651 = vmatpush3.bf16.msra.mxu0 %v3096_v24  ;;  %5638 = vmatprep.mubr.msk.bf16.mxu0 %vm1333_vm2, %v2771_v46 }
 0xa8d   : > { %5652 = vmatprep.subr.bf16.mxu0 %v3098_v47  ;;  %5720 = vmatpush3.bf16.msra.mxu1 %v3100_v17 }
 0xa90   : > { %5653 = vmatpush3.bf16.msra.mxu0 %v3098_v47 }
 0xa91   : > { %5654 = vmatprep.subr.bf16.mxu0 %v3100_v17 }
 0xa93   : > { %5639 = vmatmul.mubr.msk.bf16.gmra.mrb[68].mxu0 %vm1333_vm2, %v2773_v14 }
 0xa94   : > { %5655 = vmatpush3.bf16.msra.mxu0 %v3100_v17  ;;  %5642 = vmatprep.mubr.msk.bf16.mxu0 %vm1333_vm2, %v2775_v51 }
 0xa9b   : > { %5643 = vmatmul.mubr.msk.bf16.gmra.mrb[72].mxu0 %vm1333_vm2, %v2777_v50 }
 0xa9c   : > { %5646 = vmatprep.mubr.msk.bf16.mxu0 %vm1333_vm2, %v2779_v7 }
 0xaa3   : > { %5647 = vmatmul.mubr.msk.bf16.gmra.mrb[76].mxu0 %vm1333_vm2, %v2781_v26 }
 0xb08   : > { %v7662_v18 = vpop.f32.mrb[48].mxu0 }
 0xb09   : > { %v7664_v43 = vpop.f32.mrb[49].mxu0 }
 0xb0a   : > { %v7666_v38 = vpop.f32.mrb[50].mxu0 }
 0xb0b   : > { %v7670_v57 = vpop.f32.mrb[51].mxu0 }
 0xb40   : > { %v7674_v42 = vpop.f32.mrb[52].mxu0 }
 0xb41   : > { %v7676_v48 = vpop.f32.mrb[53].mxu0 }
 0xb42   : > { %v7678_v61 = vpop.f32.mrb[54].mxu0 }
 0xb43   : > { %v7682_v49 = vpop.f32.mrb[55].mxu0 }
 0xb4e   : > { %v7686_v46 = vpop.f32.mrb[56].mxu0 }
 0xb4f   : > { %v7688_v4 = vpop.f32.mrb[57].mxu0 }
 0xb50   : > { %v7690_v52 = vpop.f32.mrb[58].mxu0 }
 0xb51   : > { %v7694_v45 = vpop.f32.mrb[59].mxu0 }
 0xb56   : > { %v7698_v5 = vpop.f32.mrb[60].mxu0 }
 0xb57   : > { %8578 = vst [vmem:[#allocation24_spill] sm:$0xff] %v7698_v5  ;;  %v7700_v8 = vpop.f32.mrb[61].mxu0 }
 0xb58   : > { %8579 = vst [vmem:[#allocation25_spill] sm:$0xff] %v7700_v8  ;;  %v7702_v20 = vpop.f32.mrb[62].mxu0 }
 0xb59   : > { %v7706_v51 = vpop.f32.mrb[63].mxu0 }
 0xb5a   : > { %8580 = vst [vmem:[#allocation26_spill] sm:$0xff] %v7706_v51 }
 0xb5e   : > { %v5636_v36 = vpop.f32.mrb[64].mxu0 }
 0xb5f   : > { %v2889_v14 = vadd.f32 %v5636_v36, %v7026_v31  ;;  %v2880_v34 = vpop.f32.mrb[65].mxu0 }
 0xb60   : > { %v5637_v12 = vpop.f32.mrb[66].mxu0  ;;  %v2881_v7 = vadd.f32 %v2880_v34, %v7026_v31 }
 0xb61   : > { %2947 = vmax.xlane.f32.xlu0 %v2889_v14  ;;  %v2883_v3 = vpop.f32.mrb[67].mxu0  ;;  %v2892_v50 = vadd.f32 %v5637_v12, %v7026_v31 }
 0xb62   : > { %v2884_v27 = vadd.f32 %v2883_v3, %v7026_v31 }
 0xb64   : > { %2945 = vmax.xlane.f32.xlu1 %v2884_v27 }
 0xb65   : > { %2943 = vmax.xlane.f32.xlu0 %v2881_v7 }
 0xb66   : > { %v5640_v41 = vpop.f32.mrb[68].mxu0 }
 0xb67   : > { %v2896_v35 = vpop.f32.mrb[69].mxu0  ;;  %v2905_v47 = vadd.f32 %v5640_v41, %v7026_v31 }
 0xb68   : > { %v5641_v24 = vpop.f32.mrb[70].mxu0  ;;  %v2897_v34 = vadd.f32 %v2896_v35, %v7026_v31 }
 0xb69   : > { %v7715_v58 = vadd.f32 %v5641_v24, %v7026_v31  ;;  %2949 = vmax.xlane.f32.xlu0 %v2892_v50  ;;  %v2899_v26 = vpop.f32.mrb[71].mxu0 }
 0xb6a   : > { %v2900_v17 = vadd.f32 %v2899_v26, %v7026_v31 }
 0xb6b   : > { %2957 = vmax.xlane.f32.xlu1 %v7715_v58 }
 0xb6d   : > { %2955 = vmax.xlane.f32.xlu0 %v2905_v47 }
 0xb6e   : > { %v5644_v36 = vpop.f32.mrb[72].mxu0 }
 0xb6f   : > { %2953 = vmax.xlane.f32.xlu1 %v2900_v17  ;;  %v2912_v3 = vpop.f32.mrb[73].mxu0  ;;  %v2921_v11 = vadd.f32 %v5644_v36, %v7026_v31 }
 0xb70   : > { %v5645_v12 = vpop.f32.mrb[74].mxu0  ;;  %v7730_v21 = vadd.f32 %v2912_v3, %v7026_v31 }
 0xb71   : > { %v7722_v15 = vadd.f32 %v5645_v12, %v7026_v31  ;;  %2951 = vmax.xlane.f32.xlu0 %v2897_v34  ;;  %v2915_v24 = vpop.f32.mrb[75].mxu0 }
 0xb72   : > { %v7727_v41 = vadd.f32 %v2915_v24, %v7026_v31 }
 0xb73   : > { %2965 = vmax.xlane.f32.xlu1 %v7722_v15 }
 0xb75   : > { %2963 = vmax.xlane.f32.xlu0 %v2921_v11 }
 0xb76   : > { %v5648_v26 = vpop.f32.mrb[76].mxu0 }
 0xb77   : > { %2961 = vmax.xlane.f32.xlu1 %v7727_v41  ;;  %v2928_v35 = vpop.f32.mrb[77].mxu0  ;;  %v7735_v28 = vadd.f32 %v5648_v26, %v7026_v31 }
 0xb78   : > { %v5649_v39 = vpop.f32.mrb[78].mxu0  ;;  %v7739_v36 = vadd.f32 %v2928_v35, %v7026_v31 }
 0xb79   : > { %2959 = vmax.xlane.f32.xlu0 %v7730_v21  ;;  %v2931_v12 = vpop.f32.mrb[79].mxu0  ;;  %v7747_v3 = vadd.f32 %v5649_v39, %v7026_v31 }
 0xb7a   : > { %v7751_v24 = vadd.f32 %v2931_v12, %v7026_v31 }
 0xb7d   : > { %2971 = vmax.xlane.f32.xlu0 %v7735_v28 }
 0xb81   : > { %2967 = vmax.xlane.f32.xlu0 %v7739_v36 }
 0xb88   : > { %3103 = vrot.lane.b32.xlu1 %v6966_v0, %s6406_s17 }
 0xb97   : > { %3101 = vrot.lane.b32.xlu0 %v6956_v40, %s6406_s17 }
 0xbac   : > { %2973 = vmax.xlane.f32.xlu1 %v7747_v3 }
 0xbb0   : > { %2969 = vmax.xlane.f32.xlu1 %v7751_v24 }
 0xbc1   : > { %3105 = vrot.lane.b32.xlu1 %v6964_v63, %s6406_s17 }
 0xbee   : > { %v2948_v26 = vpop.xlane.xlu0 %2947 }
 0xbef   : > { %v2977_v35 = vsub.f32 %v2889_v14, %v2948_v26 }
 0xbf1   : > { %v2995_v60 = vmul.f32 1.442695, %v2977_v35  ;;  %v2946_v23 = vpop.xlane.xlu1 %2945 }
 0xbf2   : > { %v2944_v0 = vpop.xlane.xlu0 %2943  ;;  %v2976_v39 = vsub.f32 %v2884_v27, %v2946_v23 }
 0xbf3   : > { %6107 = vpow2.f32 %v2995_v60  ;;  %v2975_v40 = vsub.f32 %v2881_v7, %v2944_v0 }
 0xbf4   : > { %v2993_v12 = vmul.f32 1.442695, %v2976_v39 }
 0xbf5   : > { %v2991_v13 = vmul.f32 1.442695, %v2975_v40 }
 0xbf6   : > { %v2950_v2 = vpop.xlane.xlu0 %2949 }
 0xbf7   : > { %6109 = vpow2.f32 %v2991_v13  ;;  %v2978_v54 = vsub.f32 %v2892_v50, %v2950_v2 }
 0xbf8   : > { %v2958_v62 = vpop.xlane.xlu1 %2957 }
 0xbf9   : > { %v2997_v31 = vmul.f32 1.442695, %v2978_v54  ;;  %v2982_v23 = vsub.f32 %v7715_v58, %v2958_v62 }
 0xbfa   : > { %v2956_v8 = vpop.xlane.xlu0 %2955 }
 0xbfb   : > { %6111 = vpow2.f32 %v2997_v31  ;;  %v2981_v51 = vsub.f32 %v2905_v47, %v2956_v8  ;;  %v3005_v50 = vmul.f32 1.442695, %v2982_v23 }
 0xbfc   : > { %v2954_v5 = vpop.xlane.xlu1 %2953  ;;  %6113 = vpow2.f32 %v2993_v12 }
 0xbfd   : > { %v7756_v63 = vpop.eup %6107  ;;  %v3003_v14 = vmul.f32 1.442695, %v2981_v51  ;;  %v2980_v26 = vsub.f32 %v2900_v17, %v2954_v5 }
 0xbfe   : > { %3027 = vadd.xlane.f32.xlu1 %v7756_v63  ;;  %v2952_v60 = vpop.xlane.xlu0 %2951 }
 0xbff   : > { %6115 = vpow2.f32 %v3003_v14  ;;  %v3001_v13 = vmul.f32 1.442695, %v2980_v26  ;;  %v2979_v2 = vsub.f32 %v2897_v34, %v2952_v60 }
 0xc00   : > { %v2966_v7 = vpop.xlane.xlu1 %2965 }
 0xc01   : > { %v7760_v27 = vpop.eup %6109  ;;  %v2999_v54 = vmul.f32 1.442695, %v2979_v2  ;;  %6117 = vpow2.f32 %v3001_v13  ;;  %v2986_v47 = vsub.f32 %v7722_v15, %v2966_v7 }
 0xc02   : > { %3023 = vadd.xlane.f32.xlu1 %v7760_v27  ;;  %v2964_v8 = vpop.xlane.xlu0 %2963 }
 0xc03   : > { %6119 = vpow2.f32 %v2999_v54  ;;  %v2985_v5 = vsub.f32 %v2921_v11, %v2964_v8  ;;  %v3013_v39 = vmul.f32 1.442695, %v2986_v47  ;;  %v8581_v47 = vpack.c.bf16 %v7432_v59, %v7428_v19 }
 0xc04   : > { %6121 = vpow2.f32 %v3005_v50  ;;  %v2962_v58 = vpop.xlane.xlu1 %2961  ;;  %v8584_v19 = vpack.c.bf16 %v7444_v53, %v7440_v1  ;;  %v8586_v1 = vpack.c.bf16 %v7456_v30, %v7452_v29  ;;  %v8588_v29 = vpack.c.bf16 %v7448_v16, %v7442_v6 }
 0xc05   : > { %v7763_v51 = vpop.eup %6111  ;;  %v3011_v17 = vmul.f32 1.442695, %v2985_v5  ;;  %v2984_v11 = vsub.f32 %v7727_v41, %v2962_v58  ;;  %v8589_v30 = vpack.c.bf16 %v7682_v49, %v7676_v48 }
 0xc06   : > { %3029 = vadd.xlane.f32.xlu1 %v7763_v51  ;;  %v2960_v62 = vpop.xlane.xlu0 %2959  ;;  %v7768_v35 = vpop.eup %6113 }
 0xc07   : > { %v2983_v34 = vsub.f32 %v7730_v21, %v2960_v62  ;;  %6123 = vpow2.f32 %v3011_v17  ;;  %v3009_v26 = vmul.f32 1.442695, %v2984_v11  ;;  %v8582_v17 = vpack.c.bf16 %v7670_v57, %v7664_v43 }
 0xc08   : > { %v3104_v54 = vpop.permute.xlu1 %3103  ;;  %v8585_v43 = vpack.c.bf16 %v7678_v61, %v7674_v42  ;;  %v8587_v42 = vpack.c.bf16 %v7436_v22, %v7430_v44  ;;  %v8590_v61 = vpack.c.bf16 %v7460_v55, %v7454_v56 }
 0xc09   : > { %v7770_v0 = vpop.eup %6115  ;;  %v3007_v40 = vmul.f32 1.442695, %v2983_v34 }
 0xc0a   : > { %3025 = vadd.xlane.f32.xlu1 %v7768_v35  ;;  %3035 = vadd.xlane.f32.xlu0 %v7770_v0  ;;  %v2972_v15 = vpop.xlane.xlu0 %2971 }
 0xc0b   : > { %6125 = vpow2.f32 %v3007_v40  ;;  %v2989_v31 = vsub.f32 %v7735_v28, %v2972_v15  ;;  %v7776_v12 = vpop.eup %6117 }
 0xc0c   : > { %6127 = vpow2.f32 %v3013_v39 }
 0xc0d   : > { %v7778_v21 = vpop.eup %6119  ;;  %v3019_v14 = vmul.f32 1.442695, %v2989_v31 }
 0xc0e   : > { %3033 = vadd.xlane.f32.xlu1 %v7776_v12  ;;  %3031 = vadd.xlane.f32.xlu0 %v7778_v21  ;;  %v2968_v41 = vpop.xlane.xlu0 %2967  ;;  %v7783_v23 = vpop.eup %6121 }
 0xc0f   : > { %6129 = vpow2.f32 %v3019_v14  ;;  %v2987_v60 = vsub.f32 %v7739_v36, %v2968_v41 }
 0xc10   : > { %6131 = vpow2.f32 %v3009_v26 }
 0xc11   : > { %v3015_v13 = vmul.f32 1.442695, %v2987_v60  ;;  %v7786_v2 = vpop.eup %6123 }
 0xc12   : > { %3037 = vadd.xlane.f32.xlu0 %v7783_v23  ;;  %v3102_v28 = vpop.permute.xlu0 %3101 }
 0xc13   : > { %6133 = vpow2.f32 %v3015_v13  ;;  %5656 = vmatprep.subr.bf16.mxu0 %v3102_v28  ;;  %5713 = vmatprep.subr.bf16.mxu1 %v3102_v28 }
 0xc14   : > { %5657 = vmatpush3.bf16.msra.mxu0 %v3102_v28  ;;  %5721 = vmatpush3.bf16.msra.mxu1 %v3102_v28 }
 0xc15   : > { %v7788_v7 = vpop.eup %6125  ;;  %5658 = vmatprep.subr.bf16.mxu0 %v3104_v54  ;;  %5714 = vmatprep.subr.bf16.mxu1 %v3104_v54 }
 0xc16   : > { %3043 = vadd.xlane.f32.xlu0 %v7786_v2  ;;  %3039 = vadd.xlane.f32.xlu1 %v7788_v7  ;;  %v7792_v36 = vpop.eup %6127 }
 0xc18   : > { %5659 = vmatpush3.bf16.msra.mxu0 %v3104_v54  ;;  %5722 = vmatpush3.bf16.msra.mxu1 %v3104_v54 }
 0xc19   : > { %v7794_v8 = vpop.eup %6129 }
 0xc1a   : > { %3045 = vadd.xlane.f32.xlu0 %v7792_v36  ;;  %3051 = vadd.xlane.f32.xlu1 %v7794_v8  ;;  %v7798_v50 = vpop.eup %6131 }
 0xc1d   : > { %v7800_v5 = vpop.eup %6133 }
 0xc1e   : > { %3041 = vadd.xlane.f32.xlu0 %v7798_v50  ;;  %3047 = vadd.xlane.f32.xlu1 %v7800_v5 }
 0xc2f   : > { %3109 = vrot.lane.b32.xlu1 %v6972_v9, %s6406_s17  ;;  %v8583_v9 = vpack.c.bf16 %v7666_v38, %v7662_v18 }
 0xc33   : > { %2236 = vrot.lane.b32.xlu1 %v8581_v47, %s6407_s15 }
 0xc34   : > { %3107 = vrot.lane.b32.xlu0 %v6974_v10, %s6406_s17 }
 0xc37   : > { %2733 = vrot.lane.b32.xlu1 %v8582_v17, %s6408_s12 }
 0xc39   : > { %v2974_v62 = vpop.xlane.xlu1 %2973 }
 0xc3a   : > { %v2990_v18 = vsub.f32 %v7747_v3, %v2974_v62 }
 0xc3b   : > { %2735 = vrot.lane.b32.xlu1 %v8583_v9, %s6408_s12 }
 0xc3c   : > { %v3021_v53 = vmul.f32 1.442695, %v2990_v18 }
 0xc3d   : > { %v2970_v58 = vpop.xlane.xlu1 %2969 }
 0xc3e   : > { %v2988_v10 = vsub.f32 %v7751_v24, %v2970_v58 }
 0xc3f   : > { %2240 = vrot.lane.b32.xlu1 %v8584_v19, %s6407_s15 }
 0xc40   : > { %v3017_v38 = vmul.f32 1.442695, %v2988_v10 }
 0xc41   : > { %v3106_v59 = vpop.permute.xlu1 %3105 }
 0xc42   : > { %5660 = vmatprep.subr.bf16.mxu0 %v3106_v59  ;;  %5715 = vmatprep.subr.bf16.mxu1 %v3106_v59  ;;  %6135 = vpow2.f32 %v3017_v38 }
 0xc43   : > { %2739 = vrot.lane.b32.xlu1 %v8585_v43, %s6408_s12  ;;  %5661 = vmatpush3.bf16.msra.mxu0 %v3106_v59  ;;  %6137 = vpow2.f32 %v3021_v53 }
 0xc44   : > { %5723 = vmatpush3.bf16.msra.mxu1 %v3106_v59 }
 0xc47   : > { %2244 = vrot.lane.b32.xlu1 %v8586_v1, %s6407_s15 }
 0xc4c   : > { %v7834_v57 = vpop.eup %6135 }
 0xc4d   : > { %v7837_v24 = vpop.eup %6137 }
 0xc53   : > { %3049 = vadd.xlane.f32.xlu0 %v7834_v57 }
 0xc57   : > { %3053 = vadd.xlane.f32.xlu0 %v7837_v24 }
 0xc6d   : > { %2234 = vrot.lane.b32.xlu0 %v8587_v42, %s6407_s15 }
 0xc71   : > { %2238 = vrot.lane.b32.xlu0 %v8588_v29, %s6407_s15 }
 0xc75   : > { %2737 = vrot.lane.b32.xlu0 %v8589_v30, %s6408_s12 }
 0xc79   : > { %2242 = vrot.lane.b32.xlu0 %v8590_v61, %s6407_s15 }
 0xc8b   : > { %v3028_v3 = vpop.xlane.xlu1 %3027 }
 0xc8f   : > { %v3024_v34 = vpop.xlane.xlu1 %3023 }
 0xc90   : > { %6139 = vrcp.f32 %v3024_v34 }
 0xc93   : > { %v3030_v40 = vpop.xlane.xlu1 %3029 }
 0xc97   : > { %v3026_v44 = vpop.xlane.xlu1 %3025  ;;  %v3036_v22 = vpop.xlane.xlu0 %3035 }
 0xc98   : > { %6141 = vrcp.f32 %v3026_v44 }
 0xc9a   : > { %v6140_v11 = vpop.eup %6139 }
 0xc9b   : > { %v3034_v39 = vpop.xlane.xlu1 %3033  ;;  %v3032_v6 = vpop.xlane.xlu0 %3031  ;;  %v3071_v31 = vmul.f32 %v6140_v11, %v7760_v27 }
 0xc9c   : > { %6143 = vrcp.f32 %v3034_v39 }
 0xc9d   : > { %6145 = vrcp.f32 %v3032_v6 }
 0xc9e   : > { %6147 = vrcp.f32 %v3030_v40 }
 0xc9f   : > { %v3038_v16 = vpop.xlane.xlu0 %3037 }
 0xca0   : > { %6149 = vrcp.f32 %v3038_v16 }
 0xca1   : > { %6151 = vrcp.f32 %v3028_v3 }
 0xca2   : > { %v6142_v48 = vpop.eup %6141  ;;  %6153 = vrcp.f32 %v3036_v22 }
 0xca3   : > { %v3040_v49 = vpop.xlane.xlu1 %3039  ;;  %v3044_v15 = vpop.xlane.xlu0 %3043  ;;  %v3072_v56 = vmul.f32 %v6142_v48, %v7768_v35 }
 0xca4   : > { %6155 = vrcp.f32 %v3040_v49 }
 0xca5   : > { %v3087_v55 = vpack.c.bf16 %v3072_v56, %v3071_v31 }
 0xca6   : > { %v6144_v14 = vpop.eup %6143 }
 0xca7   : > { %v6146_v26 = vpop.eup %6145  ;;  %5666 = vmatprep.mubr.bf16.mxu0 %v3087_v55  ;;  %v3052_v41 = vpop.xlane.xlu1 %3051  ;;  %v3076_v13 = vmul.f32 %v6144_v14, %v7776_v12 }
 0xca8   : > { %v3046_v60 = vpop.xlane.xlu0 %3045  ;;  %v3075_v28 = vmul.f32 %v6146_v26, %v7778_v21  ;;  %v6148_v35 = vpop.eup %6147 }
 0xca9   : > { %6157 = vrcp.f32 %v3046_v60  ;;  %v3074_v12 = vmul.f32 %v6148_v35, %v7763_v51 }
 0xcaa   : > { %v3089_v54 = vpack.c.bf16 %v3076_v13, %v3075_v28  ;;  %v6150_v17 = vpop.eup %6149 }
 0xcab   : > { %v3048_v47 = vpop.xlane.xlu1 %3047  ;;  %v6152_v58 = vpop.eup %6151  ;;  %v3078_v21 = vmul.f32 %v6150_v17, %v7783_v23 }
 0xcac   : > { %v3042_v27 = vpop.xlane.xlu0 %3041  ;;  %5670 = vmatprep.mubr.bf16.mxu1 %v3089_v54  ;;  %v6154_v19 = vpop.eup %6153  ;;  %v3073_v59 = vmul.f32 %v6152_v58, %v7756_v63 }
 0xcad   : > { %6159 = vrcp.f32 %v3042_v27  ;;  %v3077_v43 = vmul.f32 %v6154_v19, %v7770_v0  ;;  %v8591_v19 = vpack.c.bf16 %v7690_v52, %v7686_v46  ;;  %v8594_v46 = vpack.c.bf16 %v7472_v37, %v7466_v32 }
 0xcae   : > { %6161 = vrcp.f32 %v3044_v15  ;;  %v6156_v18 = vpop.eup %6155  ;;  %v3088_v1 = vpack.c.bf16 %v3074_v12, %v3073_v59 }
 0xcaf   : > { %v3110_v62 = vpop.permute.xlu1 %3109  ;;  %v3090_v53 = vpack.c.bf16 %v3078_v21, %v3077_v43  ;;  %v3079_v51 = vmul.f32 %v6156_v18, %v7788_v7  ;;  %6163 = vrcp.f32 %v3048_v47  ;;  %v8592_v21 = vpack.c.bf16 %v7694_v45, %v7688_v4  ;;  %v8595_v4 = vld [vmem:[#allocation24_spill] sm:$0xff]  ;;  %v8597_v45 = vld [vmem:[#allocation26_spill] sm:$0xff] }
 0xcb0   : > { %v3108_v9 = vpop.permute.xlu0 %3107  ;;  %v8593_v18 = vpack.c.bf16 %v7468_v33, %v7464_v25  ;;  %v8596_v52 = vpack.c.bf16 %v7702_v20, %v8595_v4 }
 0xcb1   : > { %5662 = vmatprep.subr.bf16.mxu0 %v3108_v9  ;;  %5716 = vmatprep.subr.bf16.mxu1 %v3108_v9 }
 0xcb2   : > { %5663 = vmatpush3.bf16.msra.mxu0 %v3108_v9  ;;  %5724 = vmatpush3.bf16.msra.mxu1 %v3108_v9 }
 0xcb3   : > { %5664 = vmatprep.subr.bf16.mxu0 %v3110_v62  ;;  %5717 = vmatprep.subr.bf16.mxu1 %v3110_v62  ;;  %v2237_v10 = vpop.permute.xlu1 %2236  ;;  %v6158_v38 = vpop.eup %6157 }
 0xcb4   : > { %2260 = vst.msk [vmem:[#allocation3 + $0x8] sm:$0xff] %vm2258_vm4, %v2237_v10  ;;  %v3082_v0 = vmul.f32 %v6158_v38, %v7792_v36  ;;  %v8598_v38 = vld [vmem:[#allocation25_spill] sm:$0xff] }
 0xcb6   : > { %5665 = vmatpush3.bf16.msra.mxu0 %v3110_v62  ;;  %5725 = vmatpush3.bf16.msra.mxu1 %v3110_v62 }
 0xcb7   : > { %v6160_v42 = vpop.eup %6159  ;;  %v2734_v29 = vpop.permute.xlu1 %2733 }
 0xcb8   : > { %v3080_v23 = vmul.f32 %v6160_v42, %v7798_v50  ;;  %v6162_v30 = vpop.eup %6161 }
 0xcb9   : > { %5667 = vmatmul.mubr.bf16.vlgmr.msra.gmra.mrb[80].mxu0 %v3088_v1  ;;  %5671 = vmatmul.mubr.bf16.vlgmr.msra.gmra.mrb[48].mxu1 %v3090_v53  ;;  %v3081_v3 = vmul.f32 %v6162_v30, %v7786_v2  ;;  %v6164_v39 = vpop.eup %6163  ;;  %v8599_v1 = vpack.c.bf16 %v8597_v45, %v8598_v38  ;;  %v6208_v38 = vld [vmem:[#allocation2 + $0x20] sm:$0xff] }
 0xcba   : > { %v3091_v63 = vpack.c.bf16 %v3080_v23, %v3079_v51  ;;  %v3083_v16 = vmul.f32 %v6164_v39, %v7800_v5  ;;  %v5881_v5 = vld [vmem:[%s6658_s22] sm:$0xff]  }
 0xcbb   : > { %v2736_v61 = vpop.permute.xlu1 %2735  ;;  %v3092_v34 = vpack.c.bf16 %v3082_v0, %v3081_v3  ;;  %5682 = vmatprep.subr.bf16.mxu1 %v5881_v5 }
 0xcbc   : > { %2759 = vst.msk [vmem:[#allocation3 + $0x8] sm:$0xff] %vm2757_vm5, %v2736_v61  ;;  %5674 = vmatprep.mubr.bf16.mxu1 %v3091_v63  ;;  %5683 = vmatpush3.bf16.msra.mxu1 %v5881_v5  ;;  %v6203_v5 = vld [vmem:[#allocation2 + $0x10] sm:$0xff] }
 0xcbf   : > { %v2241_v40 = vpop.permute.xlu1 %2240 }
 0xcc0   : > { %2262 = vst.msk [vmem:[#allocation3 + $0x18] sm:$0xff] %vm2258_vm4, %v2241_v40 }
 0xcc1   : > { %5675 = vmatmul.mubr.bf16.gmra.mrb[52].mxu1 %v3092_v34 }
 0xcc3   : > { %v2740_v44 = vpop.permute.xlu1 %2739 }
 0xcc4   : > { %2761 = vst.msk [vmem:[#allocation3 + $0x18] sm:$0xff] %vm2757_vm5, %v2740_v44 }
 0xcc7   : > { %v2245_v7 = vpop.permute.xlu1 %2244 }
 0xcc8   : > { %2264 = vst.msk [vmem:[#allocation3 + $0x28] sm:$0xff] %vm2258_vm4, %v2245_v7 }
 0xce0   : > { %v3050_v50 = vpop.xlane.xlu0 %3049 }
 0xce1   : > { %6165 = vrcp.f32 %v3050_v50 }
 0xce2   : > { %6167 = vrcp.f32 %v3052_v41 }
 0xce4   : > { %v3054_v36 = vpop.xlane.xlu0 %3053 }
 0xce5   : > { %6169 = vrcp.f32 %v3054_v36 }
 0xce8   : > { %v2235_v22 = vpop.permute.xlu0 %2234 }
 0xce9   : > { %2259 = vst.msk [vmem:[#allocation3] sm:$0xff] %vm2258_vm4, %v2235_v22 }
 0xcea   : > { %2758 = vst.msk [vmem:[#allocation3] sm:$0xff] %vm2757_vm5, %v2734_v29 }
 0xceb   : > { %v6166_v2 = vpop.eup %6165 }
 0xcec   : > { %v2239_v6 = vpop.permute.xlu0 %2238  ;;  %v3084_v11 = vmul.f32 %v6166_v2, %v7834_v57  ;;  %v6168_v48 = vpop.eup %6167  ;;  %v5882_v57 = vld [vmem:[%s6658_s22 + $0x8] sm:$0xff]  }
 0xced   : > { %2261 = vst.msk [vmem:[#allocation3 + $0x10] sm:$0xff] %vm2258_vm4, %v2239_v6  ;;  %v3085_v56 = vmul.f32 %v6168_v48, %v7794_v8  ;;  %5684 = vmatprep.subr.bf16.mxu1 %v5882_v57 }
 0xcee   : > { %v3093_v49 = vpack.c.bf16 %v3084_v11, %v3083_v16  ;;  %5685 = vmatpush3.bf16.msra.mxu1 %v5882_v57 }
 0xcef   : > { %v6170_v15 = vpop.eup %6169 }
 0xcf0   : > { %5678 = vmatprep.mubr.bf16.mxu1 %v3093_v49  ;;  %v2738_v31 = vpop.permute.xlu0 %2737  ;;  %v3086_v55 = vmul.f32 %v6170_v15, %v7837_v24  ;;  %v7935_v49 = vld [vmem:[%s8601_s7] ss:$0 sm:$0xff] }
 0xcf1   : > { %2760 = vst.msk [vmem:[#allocation3 + $0x10] sm:$0xff] %vm2757_vm5, %v2738_v31 }
 0xcf2   : > { %v3094_v14 = vpack.c.bf16 %v3086_v55, %v3085_v56  ;;  %v7943_v55 = vld [vmem:[%s830_s19] ss:$0 sm:$0xff] }
 0xcf4   : > { %5679 = vmatmul.mubr.bf16.gmra.mrb[56].mxu1 %v3094_v14  ;;  %v2243_v26 = vpop.permute.xlu0 %2242 }
 0xcf5   : > { %2263 = vst.msk [vmem:[#allocation3 + $0x20] sm:$0xff] %vm2258_vm4, %v2243_v26 }
 0xd8c   : > { %v5668_v41 = vpop.f32.mrb[80].mxu0  ;;  %v5672_v60 = vpop.f32.mrb[48].mxu1 }
 0xd8d   : > { %v3153_v13 = vpop.f32.mrb[81].mxu0  ;;  %v3169_v28 = vpop.f32.mrb[49].mxu1 }
 0xd8e   : > { %v5669_v8 = vpop.f32.mrb[82].mxu0  ;;  %v5673_v54 = vpop.f32.mrb[50].mxu1 }
 0xd8f   : > { %v3217_v24 = vpack.c.bf16 %v5669_v8, %v5668_v41  ;;  %v3219_v47 = vpack.c.bf16 %v5673_v54, %v5672_v60  ;;  %v3156_v27 = vpop.f32.mrb[83].mxu0  ;;  %v3172_v35 = vpop.f32.mrb[51].mxu1 }
 0xd90   : > { %v3216_v17 = vpack.c.bf16 %v3156_v27, %v3153_v13  ;;  %v3218_v62 = vpack.c.bf16 %v3172_v35, %v3169_v28  ;;  %v6204_v13 = vld [vmem:[#allocation2] sm:$0xff] }
 0xd91   : > { %3234 = vrot.lane.b32.xlu1 %v3217_v24, %s6409_s14  ;;  %v6205_v24 = vld [vmem:[#allocation2 + $0x18] sm:$0xff] }
 0xd92   : > { %3232 = vrot.lane.b32.xlu0 %v3216_v17, %s6409_s14  ;;  %v6206_v17 = vld [vmem:[#allocation2 + $0x8] sm:$0xff] }
 0xd94   : > { %v5676_v9 = vpop.f32.mrb[52].mxu1 }
 0xd95   : > { %v3185_v58 = vpop.f32.mrb[53].mxu1  ;;  %2743 = vrot.lane.b32.xlu1 %v8591_v19, %s6408_s12 }
 0xd96   : > { %v5677_v12 = vpop.f32.mrb[54].mxu1  ;;  %2741 = vrot.lane.b32.xlu0 %v8592_v21, %s6408_s12 }
 0xd97   : > { %v3221_v10 = vpack.c.bf16 %v5677_v12, %v5676_v9  ;;  %v3188_v59 = vpop.f32.mrb[55].mxu1 }
 0xd98   : > { %v3220_v43 = vpack.c.bf16 %v3188_v59, %v3185_v58 }
 0xd99   : > { %3238 = vrot.lane.b32.xlu1 %v3219_v47, %s6409_s14 }
 0xd9a   : > { %3236 = vrot.lane.b32.xlu0 %v3218_v62, %s6409_s14 }
 0xd9d   : > { %2248 = vrot.lane.b32.xlu1 %v8593_v18, %s6407_s15 }
 0xd9e   : > { %2246 = vrot.lane.b32.xlu0 %v8594_v46, %s6407_s15  ;;  %v6207_v46 = vld [vmem:[#allocation2 + $0x30] sm:$0xff] }
 0xda1   : > { %3242 = vrot.lane.b32.xlu1 %v3221_v10, %s6409_s14 }
 0xda2   : > { %3240 = vrot.lane.b32.xlu0 %v3220_v43, %s6409_s14 }
 0xda5   : > { %2747 = vrot.lane.b32.xlu1 %v8596_v52, %s6408_s12 }
 0xda6   : > { %2745 = vrot.lane.b32.xlu0 %v8599_v1, %s6408_s12 }
 0xdc7   : > { %v5680_v53 = vpop.f32.mrb[56].mxu1 }
 0xdc8   : > { %v3201_v25 = vpop.f32.mrb[57].mxu1 }
 0xdc9   : > { %v5681_v33 = vpop.f32.mrb[58].mxu1 }
 0xdca   : > { %v3223_v42 = vpack.c.bf16 %v5681_v33, %v5680_v53  ;;  %v3204_v29 = vpop.f32.mrb[59].mxu1  ;;  %v6209_v33 = vld [vmem:[#allocation2 + $0x38] sm:$0xff] }
 0xdcb   : > { %v3222_v51 = vpack.c.bf16 %v3204_v29, %v3201_v25 }
 0xdcc   : > { %3246 = vrot.lane.b32.xlu1 %v3223_v42, %s6409_s14 }
 0xdcd   : > { %3244 = vrot.lane.b32.xlu0 %v3222_v51, %s6409_s14 }
 0xe03   : > { %v3235_v32 = vpop.permute.xlu1 %3234 }
 0xe04   : > { %3258 = vst.msk [vmem:[#allocation3 + $0x8] sm:$0xff] %vm3256_vm6, %v3235_v32  ;;  %v3233_v37 = vpop.permute.xlu0 %3232  ;;  %v6210_v32 = vld [vmem:[#allocation2 + $0x28] sm:$0xff] }
 0xe05   : > { %3257 = vst.msk [vmem:[#allocation3] sm:$0xff] %vm3256_vm6, %v3233_v37 }
 0xe07   : > { %v2744_v20 = vpop.permute.xlu1 %2743 }
 0xe08   : > { %2763 = vst.msk [vmem:[#allocation3 + $0x28] sm:$0xff] %vm2757_vm5, %v2744_v20  ;;  %v2742_v23 = vpop.permute.xlu0 %2741 }
 0xe09   : > { %2762 = vst.msk [vmem:[#allocation3 + $0x20] sm:$0xff] %vm2757_vm5, %v2742_v23 }
 0xe0b   : > { %v3239_v30 = vpop.permute.xlu1 %3238  ;;  %v3266_v61 = vld [vmem:[#allocation3 + $0x8] sm:$0xff] }
 0xe0c   : > { %3260 = vst.msk [vmem:[#allocation3 + $0x18] sm:$0xff] %vm3256_vm6, %v3239_v30  ;;  %v3237_v63 = vpop.permute.xlu0 %3236  ;;  %v3265_v0 = vld [vmem:[#allocation3] sm:$0xff] }
 0xe0d   : > { %3259 = vst.msk [vmem:[#allocation3 + $0x10] sm:$0xff] %vm3256_vm6, %v3237_v63  ;;  %5686 = vmatprep.mubr.msk.bf16.mxu1 %vm891_vm1, %v3265_v0 }
 0xe0e   : > { %5687 = vmatmul.mubr.msk.bf16.vlgmr.msra.gmra.mrb[60].mxu1 %vm891_vm1, %v3266_v61 }
 0xe0f   : > { %v2249_v3 = vpop.permute.xlu1 %2248 }
 0xe10   : > { %2266 = vst.msk [vmem:[#allocation3 + $0x38] sm:$0xff] %vm2258_vm4, %v2249_v3  ;;  %v2247_v34 = vpop.permute.xlu0 %2246 }
 0xe11   : > { %2265 = vst.msk [vmem:[#allocation3 + $0x30] sm:$0xff] %vm2258_vm4, %v2247_v34 }
 0xe13   : > { %v3243_v40 = vpop.permute.xlu1 %3242  ;;  %v3268_v50 = vld [vmem:[#allocation3 + $0x18] sm:$0xff] }
 0xe14   : > { %3262 = vst.msk [vmem:[#allocation3 + $0x28] sm:$0xff] %vm3256_vm6, %v3243_v40  ;;  %v3241_v44 = vpop.permute.xlu0 %3240  ;;  %v3267_v7 = vld [vmem:[#allocation3 + $0x10] sm:$0xff] }
 0xe15   : > { %3261 = vst.msk [vmem:[#allocation3 + $0x20] sm:$0xff] %vm3256_vm6, %v3241_v44  ;;  %5690 = vmatprep.mubr.msk.bf16.mxu1 %vm891_vm1, %v3267_v7  ;;  %v6211_v44 = vld [vmem:[#allocation2 + $0x50] sm:$0xff] }
 0xe16   : > { %5691 = vmatmul.mubr.msk.bf16.gmra.mrb[64].mxu1 %vm891_vm1, %v3268_v50 }
 0xe17   : > { %v2748_v36 = vpop.permute.xlu1 %2747 }
 0xe18   : > { %2765 = vst.msk [vmem:[#allocation3 + $0x38] sm:$0xff] %vm2757_vm5, %v2748_v36  ;;  %v2746_v22 = vpop.permute.xlu0 %2745 }
 0xe19   : > { %2764 = vst.msk [vmem:[#allocation3 + $0x30] sm:$0xff] %vm2757_vm5, %v2746_v22 }
 0xe1b   : > { %v3270_v2 = vld [vmem:[#allocation3 + $0x28] sm:$0xff] }
 0xe1c   : > { %v3269_v39 = vld [vmem:[#allocation3 + $0x20] sm:$0xff] }
 0xe1d   : > { %5694 = vmatprep.mubr.msk.bf16.mxu1 %vm891_vm1, %v3269_v39  ;;  %v6212_v39 = vld [vmem:[#allocation2 + $0x40] sm:$0xff] }
 0xe1e   : > { %5695 = vmatmul.mubr.msk.bf16.gmra.mrb[68].mxu1 %vm891_vm1, %v3270_v2 }
 0xe3e   : > { %v3247_v6 = vpop.permute.xlu1 %3246 }
 0xe3f   : > { %3264 = vst.msk [vmem:[#allocation3 + $0x38] sm:$0xff] %vm3256_vm6, %v3247_v6  ;;  %v3245_v16 = vpop.permute.xlu0 %3244 }
 0xe40   : > { %3263 = vst.msk [vmem:[#allocation3 + $0x30] sm:$0xff] %vm3256_vm6, %v3245_v16 }
 0xe46   : > { %v3272_v48 = vld [vmem:[#allocation3 + $0x38] sm:$0xff] }
 0xe47   : > { %v3271_v11 = vld [vmem:[#allocation3 + $0x30] sm:$0xff] }
 0xe48   : > { %5698 = vmatprep.mubr.msk.bf16.mxu1 %vm891_vm1, %v3271_v11  ;;  %v6213_v11 = vld [vmem:[#allocation2 + $0x58] sm:$0xff] }
 0xe49   : > { %5699 = vmatmul.mubr.msk.bf16.gmra.mrb[72].mxu1 %vm891_vm1, %v3272_v48 }
 0xee1   : > { %v5688_v15 = vpop.f32.mrb[60].mxu1 }
 0xee2   : > { %v3363_v31 = vadd.f32 %v5688_v15, %v7935_v49  ;;  %v3354_v56 = vpop.f32.mrb[61].mxu1 }
 0xee3   : > { %v3355_v14 = vadd.f32 %v7935_v49, %v3354_v56  ;;  %v5689_v26 = vpop.f32.mrb[62].mxu1  ;;  %v6214_v56 = vld [vmem:[#allocation2 + $0x48] sm:$0xff] }
 0xee4   : > { %v7946_v57 = vadd.f32 %v6203_v5, %v3363_v31  ;;  %v3366_v41 = vadd.f32 %v5689_v26, %v7935_v49  ;;  %v3357_v60 = vpop.f32.mrb[63].mxu1 }
 0xee5   : > { %v7949_v28 = vadd.f32 %v6204_v13, %v3355_v14  ;;  %v3358_v8 = vadd.f32 %v7935_v49, %v3357_v60 }
 0xee6   : > { %v3712_v54 = vadd.f32 %v7943_v55, %v7946_v57  ;;  %v7954_v47 = vadd.f32 %v6205_v24, %v3366_v41  ;;  %v3441_v27 = vsel %vm891_vm1, %v7946_v57, 0.0 }
 0xee7   : > { %v3710_v35 = vadd.f32 %v7943_v55, %v7949_v28  ;;  %v7960_v62 = vadd.f32 %v6206_v17, %v3358_v8  ;;  %3442 = vadd.xlane.f32.xlu0 %v3441_v27  ;;  %v3435_v59 = vsel %vm891_vm1, %v7949_v28, 0.0 }
 0xee8   : > { %3728 = vst.msk [vmem:[#allocation2 + $0x10] sm:$0xff] %vm891_vm1, %v3712_v54  ;;  %v3713_v9 = vadd.f32 %v7943_v55, %v7954_v47  ;;  %v3444_v29 = vsel %vm891_vm1, %v7954_v47, 0.0 }
 0xee9   : > { %3726 = vst.msk [vmem:[#allocation2] sm:$0xff] %vm891_vm1, %v3710_v35  ;;  %v3711_v58 = vadd.f32 %v7943_v55, %v7960_v62  ;;  %v5692_v19 = vpop.f32.mrb[64].mxu1  ;;  %v3438_v12 = vsel %vm891_vm1, %v7960_v62, 0.0 }
 0xeea   : > { %3729 = vst.msk [vmem:[#allocation2 + $0x18] sm:$0xff] %vm891_vm1, %v3713_v9  ;;  %v3379_v21 = vadd.f32 %v5692_v19, %v7935_v49  ;;  %3439 = vadd.xlane.f32.xlu1 %v3438_v12  ;;  %v3370_v10 = vpop.f32.mrb[65].mxu1  ;;  %v6215_v9 = vld [vmem:[#allocation2 + $0x70] sm:$0xff] }
 0xeeb   : > { %3727 = vst.msk [vmem:[#allocation2 + $0x8] sm:$0xff] %vm891_vm1, %v3711_v58  ;;  %v3371_v43 = vadd.f32 %v7935_v49, %v3370_v10  ;;  %3436 = vadd.xlane.f32.xlu0 %v3435_v59  ;;  %v5693_v18 = vpop.f32.mrb[66].mxu1 }
 0xeec   : > { %v7976_v4 = vadd.f32 %v6207_v46, %v3379_v21  ;;  %v3382_v52 = vadd.f32 %v5693_v18, %v7935_v49  ;;  %v3373_v45 = vpop.f32.mrb[67].mxu1  ;;  %v6216_v21 = vld [vmem:[#allocation2 + $0x60] sm:$0xff]  ;;  %v6217_v18 = vld [vmem:[#allocation2 + $0x78] sm:$0xff] }
 0xeed   : > { %v7979_v1 = vadd.f32 %v6208_v38, %v3371_v43  ;;  %v3374_v53 = vadd.f32 %v7935_v49, %v3373_v45  ;;  %v6218_v45 = vld [vmem:[#allocation2 + $0x68] sm:$0xff] }
 0xeee   : > { %v3716_v25 = vadd.f32 %v7943_v55, %v7976_v4  ;;  %v7984_v42 = vadd.f32 %v6209_v33, %v3382_v52  ;;  %v3453_v3 = vsel %vm891_vm1, %v7976_v4, 0.0 }
 0xeef   : > { %v3714_v51 = vadd.f32 %v7943_v55, %v7979_v1  ;;  %v7990_v37 = vadd.f32 %v6210_v32, %v3374_v53  ;;  %3445 = vadd.xlane.f32.xlu0 %v3444_v29  ;;  %v3447_v15 = vsel %vm891_vm1, %v7979_v1, 0.0 }
 0xef0   : > { %3732 = vst.msk [vmem:[#allocation2 + $0x30] sm:$0xff] %vm891_vm1, %v3716_v25  ;;  %v3717_v20 = vadd.f32 %v7943_v55, %v7984_v42  ;;  %v3456_v23 = vsel %vm891_vm1, %v7984_v42, 0.0 }
 0xef1   : > { %3730 = vst.msk [vmem:[#allocation2 + $0x20] sm:$0xff] %vm891_vm1, %v3714_v51  ;;  %v3715_v30 = vadd.f32 %v7943_v55, %v7990_v37  ;;  %3457 = vadd.xlane.f32.xlu1 %v3456_v23  ;;  %v5696_v63 = vpop.f32.mrb[68].mxu1  ;;  %v3450_v22 = vsel %vm891_vm1, %v7990_v37, 0.0 }
 0xef2   : > { %3733 = vst.msk [vmem:[#allocation2 + $0x38] sm:$0xff] %vm891_vm1, %v3717_v20  ;;  %v3395_v0 = vadd.f32 %v5696_v63, %v7935_v49  ;;  %v3386_v61 = vpop.f32.mrb[69].mxu1 }
 0xef3   : > { %3731 = vst.msk [vmem:[#allocation2 + $0x28] sm:$0xff] %vm891_vm1, %v3715_v30  ;;  %v3387_v34 = vadd.f32 %v7935_v49, %v3386_v61  ;;  %3454 = vadd.xlane.f32.xlu0 %v3453_v3  ;;  %v5697_v40 = vpop.f32.mrb[70].mxu1 }
 0xef4   : > { %v8006_v7 = vadd.f32 %v6211_v44, %v3395_v0  ;;  %v3398_v50 = vadd.f32 %v5697_v40, %v7935_v49  ;;  %v3389_v36 = vpop.f32.mrb[71].mxu1 }
 0xef5   : > { %v8011_v2 = vadd.f32 %v6212_v39, %v3387_v34  ;;  %v3390_v6 = vadd.f32 %v7935_v49, %v3389_v36  ;;  %3451 = vadd.xlane.f32.xlu1 %v3450_v22 }
 0xef6   : > { %v3720_v16 = vadd.f32 %v7943_v55, %v8006_v7  ;;  %v8016_v48 = vadd.f32 %v6213_v11, %v3398_v50  ;;  %v3465_v60 = vsel %vm891_vm1, %v8006_v7, 0.0 }
 0xef7   : > { %v3718_v31 = vadd.f32 %v7943_v55, %v8011_v2  ;;  %v8022_v14 = vadd.f32 %v6214_v56, %v3390_v6  ;;  %3448 = vadd.xlane.f32.xlu0 %v3447_v15  ;;  %v3459_v8 = vsel %vm891_vm1, %v8011_v2, 0.0 }
 0xef8   : > { %3736 = vst.msk [vmem:[#allocation2 + $0x50] sm:$0xff] %vm891_vm1, %v3720_v16  ;;  %v3721_v26 = vadd.f32 %v7943_v55, %v8016_v48  ;;  %v3468_v5 = vsel %vm891_vm1, %v8016_v48, 0.0 }
 0xef9   : > { %3734 = vst.msk [vmem:[#allocation2 + $0x40] sm:$0xff] %vm891_vm1, %v3718_v31  ;;  %v3719_v41 = vadd.f32 %v7943_v55, %v8022_v14  ;;  %3469 = vadd.xlane.f32.xlu1 %v3468_v5  ;;  %v3462_v13 = vsel %vm891_vm1, %v8022_v14, 0.0 }
 0xefa   : > { %3737 = vst.msk [vmem:[#allocation2 + $0x58] sm:$0xff] %vm891_vm1, %v3721_v26 }
 0xefb   : > { %3735 = vst.msk [vmem:[#allocation2 + $0x48] sm:$0xff] %vm891_vm1, %v3719_v41  ;;  %3466 = vadd.xlane.f32.xlu0 %v3465_v60 }
 0xefd   : > { %3463 = vadd.xlane.f32.xlu1 %v3462_v13 }
 0xeff   : > { %3460 = vadd.xlane.f32.xlu0 %v3459_v8 }
 0xf1c   : > { %v5700_v54 = vpop.f32.mrb[72].mxu1 }
 0xf1d   : > { %v3411_v24 = vadd.f32 %v5700_v54, %v7935_v49  ;;  %v3402_v27 = vpop.f32.mrb[73].mxu1 }
 0xf1e   : > { %v3403_v35 = vadd.f32 %v7935_v49, %v3402_v27  ;;  %v5701_v17 = vpop.f32.mrb[74].mxu1 }
 0xf1f   : > { %v8042_v58 = vadd.f32 %v6215_v9, %v3411_v24  ;;  %v3414_v19 = vadd.f32 %v5701_v17, %v7935_v49  ;;  %v3405_v12 = vpop.f32.mrb[75].mxu1 }
 0xf20   : > { %v8045_v10 = vadd.f32 %v6216_v21, %v3403_v35  ;;  %v3406_v59 = vadd.f32 %v7935_v49, %v3405_v12 }
 0xf21   : > { %v3724_v43 = vadd.f32 %v7943_v55, %v8042_v58  ;;  %v8050_v46 = vadd.f32 %v6217_v18, %v3414_v19  ;;  %v3477_v29 = vsel %vm891_vm1, %v8042_v58, 0.0 }
 0xf22   : > { %v3722_v52 = vadd.f32 %v7943_v55, %v8045_v10  ;;  %v8054_v38 = vadd.f32 %v6218_v45, %v3406_v59  ;;  %v3471_v53 = vsel %vm891_vm1, %v8045_v10, 0.0 }
 0xf23   : > { %3740 = vst.msk [vmem:[#allocation2 + $0x70] sm:$0xff] %vm891_vm1, %v3724_v43  ;;  %v3725_v49 = vadd.f32 %v7943_v55, %v8050_v46  ;;  %3472 = vadd.xlane.f32.xlu0 %v3471_v53  ;;  %v3480_v51 = vsel %vm891_vm1, %v8050_v46, 0.0 }
 0xf24   : > { %3738 = vst.msk [vmem:[#allocation2 + $0x60] sm:$0xff] %vm891_vm1, %v3722_v52  ;;  %v3723_v25 = vadd.f32 %v7943_v55, %v8054_v38  ;;  %v3474_v33 = vsel %vm891_vm1, %v8054_v38, 0.0 }
 0xf25   : > { %3741 = vst.msk [vmem:[#allocation2 + $0x78] sm:$0xff] %vm891_vm1, %v3725_v49  ;;  %3475 = vadd.xlane.f32.xlu1 %v3474_v33 }
 0xf26   : > { %3739 = vst.msk [vmem:[#allocation2 + $0x68] sm:$0xff] %vm891_vm1, %v3723_v25 }
 0xf27   : > { %3478 = vadd.xlane.f32.xlu0 %v3477_v29 }
 0xf29   : > { %3481 = vadd.xlane.f32.xlu1 %v3480_v51 }
 0xf74   : > { %v3443_v32 = vpop.xlane.xlu0 %3442 }
 0xf75   : > { %v3485_v20 = vmul.f32 0.03125, %v3443_v32 }
 0xf77   : > { %v8073_v55 = vsub.f32 %v7946_v57, %v3485_v20  ;;  %v3440_v23 = vpop.xlane.xlu1 %3439 }
 0xf78   : > { %v3437_v30 = vpop.xlane.xlu0 %3436  ;;  %v3484_v61 = vmul.f32 0.03125, %v3440_v23 }
 0xf79   : > { %v3483_v63 = vmul.f32 0.03125, %v3437_v30  ;;  %v3517_v0 = vmul.f32 %v8073_v55, %v8073_v55 }
 0xf7a   : > { %v8084_v36 = vsub.f32 %v7960_v62, %v3484_v61 }
 0xf7b   : > { %v8078_v3 = vsub.f32 %v7949_v28, %v3483_v63  ;;  %v3537_v34 = vsel %vm891_vm1, %v3517_v0, 0.0 }
 0xf7c   : > { %3538 = vadd.xlane.f32.xlu0 %v3537_v34  ;;  %v3446_v40 = vpop.xlane.xlu0 %3445  ;;  %v3516_v26 = vmul.f32 %v8084_v36, %v8084_v36 }
 0xf7d   : > { %v3486_v44 = vmul.f32 0.03125, %v3446_v40  ;;  %v3515_v50 = vmul.f32 %v8078_v3, %v8078_v3 }
 0xf7e   : > { %v3458_v57 = vpop.xlane.xlu1 %3457  ;;  %v3534_v24 = vsel %vm891_vm1, %v3516_v26, 0.0 }
 0xf7f   : > { %v8087_v22 = vsub.f32 %v7954_v47, %v3486_v44  ;;  %v3490_v39 = vmul.f32 0.03125, %v3458_v57  ;;  %v3531_v6 = vsel %vm891_vm1, %v3515_v50, 0.0 }
 0xf80   : > { %3532 = vadd.xlane.f32.xlu0 %v3531_v6  ;;  %v3455_v28 = vpop.xlane.xlu0 %3454 }
 0xf81   : > { %v3489_v16 = vmul.f32 0.03125, %v3455_v28  ;;  %v3518_v11 = vmul.f32 %v8087_v22, %v8087_v22  ;;  %v8093_v15 = vsub.f32 %v7984_v42, %v3490_v39 }
 0xf82   : > { %v3452_v31 = vpop.xlane.xlu1 %3451 }
 0xf83   : > { %v8096_v56 = vsub.f32 %v7976_v4, %v3489_v16  ;;  %v3488_v62 = vmul.f32 0.03125, %v3452_v31  ;;  %v3540_v47 = vsel %vm891_vm1, %v3518_v11, 0.0  ;;  %v3522_v4 = vmul.f32 %v8093_v15, %v8093_v15 }
 0xf84   : > { %3541 = vadd.xlane.f32.xlu1 %v3540_v47  ;;  %v3449_v5 = vpop.xlane.xlu0 %3448 }
 0xf85   : > { %v3487_v41 = vmul.f32 0.03125, %v3449_v5  ;;  %v3521_v60 = vmul.f32 %v8096_v56, %v8096_v56  ;;  %v8104_v13 = vsub.f32 %v7990_v37, %v3488_v62  ;;  %v3552_v19 = vsel %vm891_vm1, %v3522_v4, 0.0 }
 0xf86   : > { %v3470_v42 = vpop.xlane.xlu1 %3469 }
 0xf87   : > { %v8109_v8 = vsub.f32 %v7979_v1, %v3487_v41  ;;  %v3494_v54 = vmul.f32 0.03125, %v3470_v42  ;;  %v3549_v27 = vsel %vm891_vm1, %v3521_v60, 0.0  ;;  %v3520_v12 = vmul.f32 %v8104_v13, %v8104_v13 }
 0xf88   : > { %3535 = vadd.xlane.f32.xlu1 %v3534_v24  ;;  %3550 = vadd.xlane.f32.xlu0 %v3549_v27  ;;  %v3467_v35 = vpop.xlane.xlu0 %3466 }
 0xf89   : > { %v3493_v17 = vmul.f32 0.03125, %v3467_v35  ;;  %v3519_v37 = vmul.f32 %v8109_v8, %v8109_v8  ;;  %v8119_v1 = vsub.f32 %v8016_v48, %v3494_v54  ;;  %v3546_v53 = vsel %vm891_vm1, %v3520_v12, 0.0 }
 0xf8a   : > { %v3464_v9 = vpop.xlane.xlu1 %3463 }
 0xf8b   : > { %v8122_v21 = vsub.f32 %v8006_v7, %v3493_v17  ;;  %v3492_v59 = vmul.f32 0.03125, %v3464_v9  ;;  %v3543_v43 = vsel %vm891_vm1, %v3519_v37, 0.0  ;;  %v3526_v25 = vmul.f32 %v8119_v1, %v8119_v1 }
 0xf8c   : > { %3553 = vadd.xlane.f32.xlu1 %v3552_v19  ;;  %3544 = vadd.xlane.f32.xlu0 %v3543_v43  ;;  %v3461_v18 = vpop.xlane.xlu0 %3460 }
 0xf8d   : > { %v3491_v52 = vmul.f32 0.03125, %v3461_v18  ;;  %v3525_v45 = vmul.f32 %v8122_v21, %v8122_v21  ;;  %v8129_v49 = vsub.f32 %v8022_v14, %v3492_v59  ;;  %v3564_v29 = vsel %vm891_vm1, %v3526_v25, 0.0  ;;  %v8174_v25 = vld [vmem:[%s804_s26] ss:$0 sm:$0xff]  ;;  %s8605_s26 = scalar_lea.vmem %s8604_s9, %s6630_s13 }
 0xf8f   : > { %v8132_v48 = vsub.f32 %v8011_v2, %v3491_v52  ;;  %v3561_v7 = vsel %vm891_vm1, %v3525_v45, 0.0  ;;  %v3524_v14 = vmul.f32 %v8129_v49, %v8129_v49 }
 0xf90   : > { %3547 = vadd.xlane.f32.xlu1 %v3546_v53  ;;  %3562 = vadd.xlane.f32.xlu0 %v3561_v7 }
 0xf91   : > { %v3523_v33 = vmul.f32 %v8132_v48, %v8132_v48  ;;  %v3558_v2 = vsel %vm891_vm1, %v3524_v14, 0.0 }
 0xf93   : > { %v3555_v51 = vsel %vm891_vm1, %v3523_v33, 0.0 }
 0xf94   : > { %3565 = vadd.xlane.f32.xlu1 %v3564_v29  ;;  %3556 = vadd.xlane.f32.xlu0 %v3555_v51 }
 0xf98   : > { %3559 = vadd.xlane.f32.xlu1 %v3558_v2 }
 0xfb0   : > { %v3473_v32 = vpop.xlane.xlu0 %3472 }
 0xfb1   : > { %v3495_v20 = vmul.f32 0.03125, %v3473_v32 }
 0xfb2   : > { %v3476_v23 = vpop.xlane.xlu1 %3475 }
 0xfb3   : > { %v8145_v30 = vsub.f32 %v8045_v10, %v3495_v20  ;;  %v3496_v63 = vmul.f32 0.03125, %v3476_v23 }
 0xfb4   : > { %v3479_v0 = vpop.xlane.xlu0 %3478 }
 0xfb5   : > { %v8148_v61 = vsub.f32 %v8054_v38, %v3496_v63  ;;  %v3497_v34 = vmul.f32 0.03125, %v3479_v0  ;;  %v3527_v40 = vmul.f32 %v8145_v30, %v8145_v30  ;;  %v8184_v0 = vld [vmem:[%s8605_s26] ss:$0 sm:$0xff] }
 0xfb6   : > { %v3482_v44 = vpop.xlane.xlu1 %3481 }
 0xfb7   : > { %v8153_v50 = vsub.f32 %v8042_v58, %v3497_v34  ;;  %v3498_v57 = vmul.f32 0.03125, %v3482_v44  ;;  %v3567_v39 = vsel %vm891_vm1, %v3527_v40, 0.0  ;;  %v3528_v10 = vmul.f32 %v8148_v61, %v8148_v61 }
 0xfb8   : > { %3568 = vadd.xlane.f32.xlu0 %v3567_v39 }
 0xfb9   : > { %v8159_v6 = vsub.f32 %v8050_v46, %v3498_v57  ;;  %v3570_v38 = vsel %vm891_vm1, %v3528_v10, 0.0  ;;  %v3529_v28 = vmul.f32 %v8153_v50, %v8153_v50 }
 0xfba   : > { %3571 = vadd.xlane.f32.xlu1 %v3570_v38 }
 0xfbb   : > { %v3573_v16 = vsel %vm891_vm1, %v3529_v28, 0.0  ;;  %v3530_v58 = vmul.f32 %v8159_v6, %v8159_v6 }
 0xfbc   : > { %3574 = vadd.xlane.f32.xlu0 %v3573_v16 }
 0xfbd   : > { %v3576_v11 = vsel %vm891_vm1, %v3530_v58, 0.0 }
 0xfbe   : > { %3577 = vadd.xlane.f32.xlu1 %v3576_v11 }
0x1009   : > { %v3539_v31 = vpop.xlane.xlu0 %3538 }
0x100a   : > { %v3581_v62 = vmul.f32 0.03125, %v3539_v31 }
0x100c   : > { %v3597_v47 = vadd.f32 1e-05, %v3581_v62 }
0x100d   : > { %v3533_v46 = vpop.xlane.xlu0 %3532 }
0x100e   : > { %v3579_v26 = vmul.f32 0.03125, %v3533_v46  ;;  %6171 = vrsqrt.f32 %v3597_v47 }
0x1010   : > { %v3595_v5 = vadd.f32 1e-05, %v3579_v26 }
0x1011   : > { %v3542_v41 = vpop.xlane.xlu1 %3541 }
0x1012   : > { %v3582_v60 = vmul.f32 0.03125, %v3542_v41  ;;  %6173 = vrsqrt.f32 %v3595_v5 }
0x1014   : > { %v3598_v42 = vadd.f32 1e-05, %v3582_v60 }
0x1015   : > { %v3536_v4 = vpop.xlane.xlu1 %3535  ;;  %v3551_v54 = vpop.xlane.xlu0 %3550 }
0x1016   : > { %6175 = vrsqrt.f32 %v3598_v42  ;;  %v3580_v24 = vmul.f32 0.03125, %v3536_v4  ;;  %v3585_v27 = vmul.f32 0.03125, %v3551_v54 }
0x1018   : > { %v3596_v35 = vadd.f32 1e-05, %v3580_v24  ;;  %v3601_v17 = vadd.f32 1e-05, %v3585_v27  ;;  %v6172_v19 = vpop.eup %6171 }
0x1019   : > { %v3554_v37 = vpop.xlane.xlu1 %3553  ;;  %v3545_v9 = vpop.xlane.xlu0 %3544  ;;  %v3629_v52 = vmul.f32 %v6172_v19, %v8073_v55 }
0x101a   : > { %6177 = vrsqrt.f32 %v3596_v35  ;;  %v3586_v12 = vmul.f32 0.03125, %v3554_v37  ;;  %v3583_v59 = vmul.f32 0.03125, %v3545_v9 }
0x101b   : > { %6179 = vrsqrt.f32 %v3601_v17  ;;  %v3651_v32 = vmul.f32 %v8174_v25, %v3629_v52 }
0x101c   : > { %v3602_v43 = vadd.f32 1e-05, %v3586_v12  ;;  %v3599_v18 = vadd.f32 1e-05, %v3583_v59  ;;  %v6174_v7 = vpop.eup %6173 }
0x101d   : > { %v3548_v45 = vpop.xlane.xlu1 %3547  ;;  %v3563_v53 = vpop.xlane.xlu0 %3562  ;;  %v3627_v55 = vmul.f32 %v6174_v7, %v8078_v3 }
0x101e   : > { %6181 = vrsqrt.f32 %v3602_v43  ;;  %v3584_v33 = vmul.f32 0.03125, %v3548_v45  ;;  %v3589_v29 = vmul.f32 0.03125, %v3563_v53 }
0x101f   : > { %6183 = vrsqrt.f32 %v3599_v18  ;;  %v3649_v38 = vmul.f32 %v8174_v25, %v3627_v55 }
0x1020   : > { %v6176_v51 = vpop.eup %6175  ;;  %v3600_v14 = vadd.f32 1e-05, %v3584_v33  ;;  %v3605_v2 = vadd.f32 1e-05, %v3589_v29 }
0x1021   : > { %v3630_v20 = vmul.f32 %v6176_v51, %v8087_v22  ;;  %v3566_v23 = vpop.xlane.xlu1 %3565  ;;  %v3557_v63 = vpop.xlane.xlu0 %3556  ;;  %v3673_v22 = vadd.f32 %v8184_v0, %v3651_v32  ;;  %v3671_v41 = vadd.f32 %v8184_v0, %v3649_v38 }
0x1022   : > { %6185 = vrsqrt.f32 %v3600_v14  ;;  %v3590_v34 = vmul.f32 0.03125, %v3566_v23  ;;  %v3587_v40 = vmul.f32 0.03125, %v3557_v63 }
0x1023   : > { %v3652_v44 = vmul.f32 %v8174_v25, %v3630_v20  ;;  %6187 = vrsqrt.f32 %v3605_v2 }
0x1024   : > { %v6178_v57 = vpop.eup %6177  ;;  %v3606_v39 = vadd.f32 1e-05, %v3590_v34  ;;  %v3603_v10 = vadd.f32 1e-05, %v3587_v40 }
0x1025   : > { %v6180_v3 = vpop.eup %6179  ;;  %v3674_v28 = vadd.f32 %v8184_v0, %v3652_v44  ;;  %v3628_v16 = vmul.f32 %v6178_v57, %v8084_v36  ;;  %v3560_v58 = vpop.xlane.xlu1 %3559 }
0x1026   : > { %v3633_v11 = vmul.f32 %v6180_v3, %v8096_v56  ;;  %6189 = vrsqrt.f32 %v3606_v39  ;;  %v3588_v31 = vmul.f32 0.03125, %v3560_v58 }
0x1027   : > { %v3688_v62 = vpack.c.bf16 %v3674_v28, %v3673_v22  ;;  %v3650_v47 = vmul.f32 %v8174_v25, %v3628_v16  ;;  %6191 = vrsqrt.f32 %v3603_v10 }
0x1028   : > { %v6182_v46 = vpop.eup %6181  ;;  %v3604_v26 = vadd.f32 1e-05, %v3588_v31  ;;  %v3655_v36 = vmul.f32 %v8174_v25, %v3633_v11 }
0x1029   : > { %v6184_v5 = vpop.eup %6183  ;;  %3696 = vst.msk [vmem:[#allocation4 + $0x8] sm:$0xff] %vm891_vm1, %v3688_v62  ;;  %v3672_v60 = vadd.f32 %v8184_v0, %v3650_v47  ;;  %v3634_v42 = vmul.f32 %v6182_v46, %v8093_v15 }
0x102a   : > { %v3631_v56 = vmul.f32 %v6184_v5, %v8109_v8  ;;  %6193 = vrsqrt.f32 %v3604_v26  ;;  %v3677_v35 = vadd.f32 %v8184_v0, %v3655_v36 }
0x102b   : > { %v3687_v4 = vpack.c.bf16 %v3672_v60, %v3671_v41  ;;  %v3656_v54 = vmul.f32 %v8174_v25, %v3634_v42 }
0x102c   : > { %v6186_v24 = vpop.eup %6185  ;;  %v3653_v37 = vmul.f32 %v8174_v25, %v3631_v56 }
0x102d   : > { %v6188_v27 = vpop.eup %6187  ;;  %3695 = vst.msk [vmem:[#allocation4] sm:$0xff] %vm891_vm1, %v3687_v4  ;;  %v3678_v17 = vadd.f32 %v8184_v0, %v3656_v54  ;;  %v3632_v9 = vmul.f32 %v6186_v24, %v8104_v13 }
0x102e   : > { %v3637_v15 = vmul.f32 %v6188_v27, %v8122_v21  ;;  %v3675_v43 = vadd.f32 %v8184_v0, %v3653_v37 }
0x102f   : > { %v3690_v19 = vpack.c.bf16 %v3678_v17, %v3677_v35  ;;  %v3654_v8 = vmul.f32 %v8174_v25, %v3632_v9 }
0x1030   : > { %v6190_v12 = vpop.eup %6189  ;;  %v3659_v52 = vmul.f32 %v8174_v25, %v3637_v15 }
0x1031   : > { %v6192_v59 = vpop.eup %6191  ;;  %3698 = vst.msk [vmem:[#allocation4 + $0x18] sm:$0xff] %vm891_vm1, %v3690_v19  ;;  %v3676_v18 = vadd.f32 %v8184_v0, %v3654_v8  ;;  %v3638_v45 = vmul.f32 %v6190_v12, %v8119_v1 }
0x1032   : > { %v3635_v53 = vmul.f32 %v6192_v59, %v8132_v48  ;;  %v3681_v33 = vadd.f32 %v8184_v0, %v3659_v52 }
0x1033   : > { %v3689_v13 = vpack.c.bf16 %v3676_v18, %v3675_v43  ;;  %v3660_v21 = vmul.f32 %v8174_v25, %v3638_v45 }
0x1034   : > { %v6194_v7 = vpop.eup %6193  ;;  %v3657_v51 = vmul.f32 %v8174_v25, %v3635_v53 }
0x1035   : > { %3697 = vst.msk [vmem:[#allocation4 + $0x10] sm:$0xff] %vm891_vm1, %v3689_v13  ;;  %v3682_v29 = vadd.f32 %v8184_v0, %v3660_v21  ;;  %v3636_v14 = vmul.f32 %v6194_v7, %v8129_v49 }
0x1036   : > { %v3679_v1 = vadd.f32 %v8184_v0, %v3657_v51 }
0x1037   : > { %v3692_v2 = vpack.c.bf16 %v3682_v29, %v3681_v33  ;;  %v3658_v32 = vmul.f32 %v8174_v25, %v3636_v14 }
0x1039   : > { %3700 = vst.msk [vmem:[#allocation4 + $0x28] sm:$0xff] %vm891_vm1, %v3692_v2  ;;  %v3680_v48 = vadd.f32 %v8184_v0, %v3658_v32 }
0x103b   : > { %v3691_v55 = vpack.c.bf16 %v3680_v48, %v3679_v1 }
0x103d   : > { %3699 = vst.msk [vmem:[#allocation4 + $0x20] sm:$0xff] %vm891_vm1, %v3691_v55 }
0x1045   : > { %v3569_v20 = vpop.xlane.xlu0 %3568 }
0x1046   : > { %v3591_v23 = vmul.f32 0.03125, %v3569_v20 }
0x1047   : > { %v3572_v63 = vpop.xlane.xlu1 %3571 }
0x1048   : > { %v3607_v34 = vadd.f32 1e-05, %v3591_v23  ;;  %v3592_v40 = vmul.f32 0.03125, %v3572_v63 }
0x1049   : > { %v3575_v44 = vpop.xlane.xlu0 %3574 }
0x104a   : > { %6195 = vrsqrt.f32 %v3607_v34  ;;  %v3608_v49 = vadd.f32 1e-05, %v3592_v40  ;;  %v3593_v57 = vmul.f32 0.03125, %v3575_v44 }
0x104b   : > { %v3578_v39 = vpop.xlane.xlu1 %3577 }
0x104c   : > { %6197 = vrsqrt.f32 %v3608_v49  ;;  %v3609_v10 = vadd.f32 1e-05, %v3593_v57  ;;  %v3594_v3 = vmul.f32 0.03125, %v3578_v39 }
0x104e   : > { %6199 = vrsqrt.f32 %v3609_v10  ;;  %v3610_v22 = vadd.f32 1e-05, %v3594_v3 }
0x1050   : > { %6201 = vrsqrt.f32 %v3610_v22 }
0x1054   : > { %v6196_v38 = vpop.eup %6195 }
0x1055   : > { %v3639_v28 = vmul.f32 %v6196_v38, %v8145_v30 }
0x1056   : > { %v6198_v16 = vpop.eup %6197 }
0x1057   : > { %v3661_v58 = vmul.f32 %v8174_v25, %v3639_v28  ;;  %v3640_v11 = vmul.f32 %v6198_v16, %v8148_v61 }
0x1058   : > { %v6200_v31 = vpop.eup %6199 }
0x1059   : > { %v3662_v62 = vmul.f32 %v8174_v25, %v3640_v11  ;;  %v3641_v47 = vmul.f32 %v6200_v31, %v8153_v50  ;;  %v3683_v26 = vadd.f32 %v8184_v0, %v3661_v58 }
0x105a   : > { %v6202_v46 = vpop.eup %6201 }
0x105b   : > { %v3684_v5 = vadd.f32 %v8184_v0, %v3662_v62  ;;  %v3663_v41 = vmul.f32 %v8174_v25, %v3641_v47  ;;  %v3642_v60 = vmul.f32 %v6202_v46, %v8159_v6 }
0x105d   : > { %v3693_v30 = vpack.c.bf16 %v3684_v5, %v3683_v26  ;;  %v3664_v36 = vmul.f32 %v8174_v25, %v3642_v60  ;;  %v3685_v61 = vadd.f32 %v8184_v0, %v3663_v41 }
0x105f   : > { %3701 = vst.msk [vmem:[#allocation4 + $0x30] sm:$0xff] %vm891_vm1, %v3693_v30  ;;  %v3686_v42 = vadd.f32 %v8184_v0, %v3664_v36 }
0x1061   : > { %v3694_v56 = vpack.c.bf16 %v3686_v42, %v3685_v61 }
0x1063   : > { %3702 = vst.msk [vmem:[#allocation4 + $0x38] sm:$0xff] %vm891_vm1, %v3694_v56 }
0x1064 PF: > { %v6219_v50 = vld [vmem:[%s6689_s24 + $0x4] ss:$16 sps:$4 sm:$0xff]   ;;  %v6221_v6 = vld [vmem:[%s6689_s24 + $0xc] ss:$16 sps:$4 sm:$0xff]   ;;  %v6410_v25 = vmov 0   ;;  %vm3820_vm7 = vcmask 261120   ;;  %v3760_v58 = vlaneseq }
0x1065   : > { %3877 = vmatprep.mubr.bf16.mxu0 %v6410_v25  ;;  %3990 = vmatprep.mubr.bf16.mxu1 %v6410_v25  ;;  %v6223_v0 = vld [vmem:[%s6689_s24] ss:$16 sps:$4 sm:$0xff]   ;;  %v6224_v4 = vld [vmem:[%s6689_s24 + $0x8] ss:$16 sps:$4 sm:$0xff]   ;;  %v6225_v54 = vld [vmem:[%s6689_s24 + $0x24] ss:$16 sps:$4 sm:$0xff]  }
0x1066   : > { %3845 = vmatprep.subr.bf16.mxu0 %v6219_v50  ;;  %3958 = vmatprep.subr.bf16.mxu1 %v6221_v6  ;;  %v6227_v24 = vld [vmem:[%s6689_s24 + $0x2c] ss:$16 sps:$4 sm:$0xff]   ;;  %v6229_v27 = vld [vmem:[%s6689_s24 + $0x20] ss:$16 sps:$4 sm:$0xff]   ;;  %v6230_v35 = vld [vmem:[%s6689_s24 + $0x28] ss:$16 sps:$4 sm:$0xff]  }
0x1067   : > { %3846 = vmatpush1.bf16.msra.mxu0 %v6223_v0  ;;  %3959 = vmatpush1.bf16.msra.mxu1 %v6224_v4  ;;  %v3742_v17 = vld [vmem:[#allocation4] sm:$0xff]  ;;  %v6235_v8 = vld [vmem:[%s6686_s20 + $0x48] sm:$0xff]   ;;  %v6239_v52 = vld [vmem:[%s6686_s20 + $0x50] sm:$0xff]   ;;  %v3761_v11 = vshrl.u32 %v3760_v58, 7  ;;  %p4665_p11 = scmp.eq.s32.totalorder %s6373_s0, 1  ;;  %p4666_p12 = scmp.eq.s32.totalorder %s6369_s29, 3 }
0x1068   : > { %3847 = vmatprep.subr.bf16.mxu0 %v6225_v54  ;;  %3960 = vmatprep.subr.bf16.mxu1 %v6227_v24  ;;  %v6231_v37 = vld [vmem:[%s6686_s20 + $0x40] sm:$0xff]   ;;  %v6236_v12 = vld [vmem:[%s6686_s20 + $0xc8] sm:$0xff]   ;;  %v6240_v45 = vld [vmem:[%s6686_s20 + $0xd0] sm:$0xff]  }
0x1069   : > { %v6232_v9 = vld [vmem:[%s6686_s20 + $0xc0] sm:$0xff]   ;;  %v3743_v59 = vld [vmem:[#allocation4 + $0x8] sm:$0xff]  ;;  %v6241_v53 = vld [vmem:[%s6686_s20 + $0x10] sm:$0xff]   ;;  %v3762_v31 = vsub.s32 0, %v3761_v11  ;;  %v3770_v62 = vsub.s32 2, %v3761_v11  ;;  %v3766_v46 = vsub.s32 1, %v3761_v11  ;;  %p8385_p0 = pnand %p4666_p12, %p4665_p11 }
0x106a   : > { %v6233_v15 = vld [vmem:[%s6686_s20] sm:$0xff]   ;;  %v6237_v43 = vld [vmem:[%s6686_s20 + $0x8] sm:$0xff]   ;;  %v6242_v13 = vld [vmem:[%s6686_s20 + $0x90] sm:$0xff]   ;;  %v3774_v26 = vsub.s32 3, %v3761_v11  ;;  %vm4674_vm8 = vcmask (!%p8385_p0), 253952   ;;  %s8607_s13 = sld [smem:[#allocation40_spill]] (!%p8385_p0) }
0x106b   : > { %3848 = vmatpush1.bf16.msra.mxu0 %v6229_v27  ;;  %3961 = vmatpush1.bf16.msra.mxu1 %v6230_v35  ;;  %v6234_v19 = vld [vmem:[%s6686_s20 + $0x80] sm:$0xff]   ;;  %v6238_v18 = vld [vmem:[%s6686_s20 + $0x88] sm:$0xff]   ;;  %v6243_v21 = vld [vmem:[%s6686_s20 + $0x58] sm:$0xff]   ;;  %vm6412_vm9 = vmmov (!%p8385_p0), 0   ;;  %s8608_s10 = sld [smem:[#allocation38_spill]] (!%p8385_p0)  ;;  %s8609_s12 = sld [smem:[#allocation39_spill]] (!%p8385_p0) }
0x106c   : > { %5275 = vmatprep.subr.bf16.mxu0 %v6231_v37  ;;  %5339 = vmatprep.subr.bf16.mxu1 %v6232_v9  ;;  %v6244_v7 = vld [vmem:[%s6686_s20 + $0xd8] sm:$0xff]   ;;  %v3744_v33 = vld [vmem:[#allocation4 + $0x10] sm:$0xff]  ;;  %v6247_v14 = vld [vmem:[%s6686_s20 + $0x60] sm:$0xff]   ;;  %s8610_s21 = sld [smem:[#allocation41_spill]] (!%p8385_p0)  ;;  %vm4752_vm10 = vcmask (!%p8385_p0), 122880  }
0x106d   : > { %v6245_v29 = vld [vmem:[%s6686_s20 + $0x18] sm:$0xff]   ;;  %v6248_v2 = vld [vmem:[%s6686_s20 + $0xe0] sm:$0xff]   ;;  %v6251_v48 = vld [vmem:[%s6686_s20 + $0x68] sm:$0xff]  }
0x106e   : > { %5070 = vmatmul.mubr.msk.bf16.vlgmr.msra.gmra.mrb[0].mxu0 %vm3820_vm7, %v3742_v17  ;;  %5078 = vmatmul.mubr.msk.bf16.vlgmr.msra.gmra.mrb[0].mxu1 %vm3820_vm7, %v3742_v17  ;;  %v6246_v51 = vld [vmem:[%s6686_s20 + $0x98] sm:$0xff]   ;;  %v6249_v32 = vld [vmem:[%s6686_s20 + $0x20] sm:$0xff]   ;;  %v6252_v55 = vld [vmem:[%s6686_s20 + $0xe8] sm:$0xff]  }
0x106f   : > { %3887 = vmatprep.mubr.bf16.mxu0 %v6410_v25  ;;  %4000 = vmatprep.mubr.bf16.mxu1 %v6410_v25  ;;  %v6250_v1 = vld [vmem:[%s6686_s20 + $0xa0] sm:$0xff]   ;;  %v3745_v20 = vld [vmem:[#allocation4 + $0x18] sm:$0xff]  ;;  %v6253_v23 = vld [vmem:[%s6686_s20 + $0x28] sm:$0xff]  }
0x1070   : > { %5276 = vmatpush3.bf16.msra.mxu0 %v6233_v15  ;;  %5340 = vmatpush3.bf16.msra.mxu1 %v6234_v19  ;;  %v6254_v63 = vld [vmem:[%s6686_s20 + $0xa8] sm:$0xff]   ;;  %v6255_v34 = vld [vmem:[%s6686_s20 + $0x70] sm:$0xff]   ;;  %v3746_v57 = vld [vmem:[#allocation4 + $0x20] sm:$0xff] }
0x1071   : > { %5277 = vmatprep.subr.bf16.mxu0 %v6235_v8  ;;  %5341 = vmatprep.subr.bf16.mxu1 %v6236_v12  ;;  %v6256_v40 = vld [vmem:[%s6686_s20 + $0xf0] sm:$0xff]   ;;  %v3747_v39 = vld [vmem:[#allocation4 + $0x28] sm:$0xff]  ;;  %v3749_v3 = vld [vmem:[#allocation4 + $0x38] sm:$0xff] }
0x1072   : > { %v6257_v44 = vld [vmem:[%s6686_s20 + $0x30] sm:$0xff]   ;;  %v6259_v22 = vld [vmem:[%s6686_s20 + $0x78] sm:$0xff]   ;;  %v3758_v47 = vld [vmem:[%s6677_s30] sm:$0xf] }
0x1073   : > { %v6258_v49 = vld [vmem:[%s6686_s20 + $0xb0] sm:$0xff]   ;;  %v6260_v38 = vld [vmem:[%s6686_s20 + $0xf8] sm:$0xff]   ;;  %v8311_v5 = vrot.slane %v3758_v47, %v3762_v31  ;;  %v8313_v41 = vrot.slane %v3758_v47, %v3770_v62  ;;  %v8315_v60 = vrot.slane %v3758_v47, %v3766_v46  ;;  %v8317_v30 = vrot.slane %v3758_v47, %v3774_v26 }
0x1074   : > { %5278 = vmatpush3.bf16.msra.mxu0 %v6237_v43  ;;  %5342 = vmatpush3.bf16.msra.mxu1 %v6238_v18  ;;  %v3748_v10 = vld [vmem:[#allocation4 + $0x30] sm:$0xff]  ;;  %v6261_v28 = vld [vmem:[%s6686_s20 + $0x38] sm:$0xff]  }
0x1075   : > { %5279 = vmatprep.subr.bf16.mxu0 %v6239_v52  ;;  %5343 = vmatprep.subr.bf16.mxu1 %v6240_v45  ;;  %v6262_v16 = vld [vmem:[%s6686_s20 + $0xb8] sm:$0xff]  }
0x1076   : > { %5071 = vmatmul.mubr.msk.bf16.gmra.mrb[4].mxu0 %vm3820_vm7, %v3743_v59  ;;  %5079 = vmatmul.mubr.msk.bf16.gmra.mrb[4].mxu1 %vm3820_vm7, %v3743_v59 }
0x1077   : > { %3897 = vmatprep.mubr.bf16.mxu0 %v6410_v25  ;;  %4010 = vmatprep.mubr.bf16.mxu1 %v6410_v25 }
0x1078   : > { %5280 = vmatpush3.bf16.msra.mxu0 %v6241_v53  ;;  %5344 = vmatpush3.bf16.msra.mxu1 %v6242_v13 }
0x1079   : > { %5281 = vmatprep.subr.bf16.mxu0 %v6243_v21  ;;  %5345 = vmatprep.subr.bf16.mxu1 %v6244_v7 }
0x107c   : > { %5282 = vmatpush3.bf16.msra.mxu0 %v6245_v29  ;;  %5346 = vmatpush3.bf16.msra.mxu1 %v6246_v51 }
0x107d   : > { %5283 = vmatprep.subr.bf16.mxu0 %v6247_v14  ;;  %5347 = vmatprep.subr.bf16.mxu1 %v6248_v2 }
0x107e   : > { %5072 = vmatmul.mubr.msk.bf16.gmra.mrb[8].mxu0 %vm3820_vm7, %v3744_v33  ;;  %5080 = vmatmul.mubr.msk.bf16.gmra.mrb[8].mxu1 %vm3820_vm7, %v3744_v33 }
0x107f   : > { %3907 = vmatprep.mubr.bf16.mxu0 %v6410_v25  ;;  %4020 = vmatprep.mubr.bf16.mxu1 %v6410_v25 }
0x1080   : > { %5284 = vmatpush3.bf16.msra.mxu0 %v6249_v32  ;;  %5348 = vmatpush3.bf16.msra.mxu1 %v6250_v1 }
0x1081   : > { %5285 = vmatprep.subr.bf16.mxu0 %v6251_v48  ;;  %5349 = vmatprep.subr.bf16.mxu1 %v6252_v55 }
0x1084   : > { %5286 = vmatpush3.bf16.msra.mxu0 %v6253_v23  ;;  %5350 = vmatpush3.bf16.msra.mxu1 %v6254_v63 }
0x1085   : > { %5287 = vmatprep.subr.bf16.mxu0 %v6255_v34  ;;  %5351 = vmatprep.subr.bf16.mxu1 %v6256_v40 }
0x1086   : > { %5073 = vmatmul.mubr.msk.bf16.gmra.mrb[12].mxu0 %vm3820_vm7, %v3745_v20  ;;  %5081 = vmatmul.mubr.msk.bf16.gmra.mrb[12].mxu1 %vm3820_vm7, %v3745_v20 }
0x1087   : > { %3917 = vmatprep.mubr.bf16.mxu0 %v6410_v25  ;;  %4030 = vmatprep.mubr.bf16.mxu1 %v6410_v25 }
0x1088   : > { %5288 = vmatpush3.bf16.msra.mxu0 %v6257_v44  ;;  %5352 = vmatpush3.bf16.msra.mxu1 %v6258_v49 }
0x1089   : > { %5289 = vmatprep.subr.bf16.mxu0 %v6259_v22  ;;  %5353 = vmatprep.subr.bf16.mxu1 %v6260_v38 }
0x108c   : > { %5290 = vmatpush3.bf16.msra.mxu0 %v6261_v28  ;;  %5354 = vmatpush3.bf16.msra.mxu1 %v6262_v16 }
0x108e   : > { %5074 = vmatmul.mubr.msk.bf16.gmra.mrb[16].mxu0 %vm3820_vm7, %v3746_v57  ;;  %5082 = vmatmul.mubr.msk.bf16.gmra.mrb[16].mxu1 %vm3820_vm7, %v3746_v57 }
0x108f   : > { %3927 = vmatprep.mubr.bf16.mxu0 %v6410_v25  ;;  %4040 = vmatprep.mubr.bf16.mxu1 %v6410_v25 }
0x1096   : > { %5075 = vmatmul.mubr.msk.bf16.gmra.mrb[20].mxu0 %vm3820_vm7, %v3747_v39  ;;  %5083 = vmatmul.mubr.msk.bf16.gmra.mrb[20].mxu1 %vm3820_vm7, %v3747_v39 }
0x1097   : > { %3937 = vmatprep.mubr.bf16.mxu0 %v6410_v25  ;;  %4050 = vmatprep.mubr.bf16.mxu1 %v6410_v25 }
0x109e   : > { %5076 = vmatmul.mubr.msk.bf16.gmra.mrb[24].mxu0 %vm3820_vm7, %v3748_v10  ;;  %5084 = vmatmul.mubr.msk.bf16.gmra.mrb[24].mxu1 %vm3820_vm7, %v3748_v10 }
0x109f   : > { %3947 = vmatprep.mubr.bf16.mxu0 %v6410_v25  ;;  %4060 = vmatprep.mubr.bf16.mxu1 %v6410_v25 }
0x10a6   : > { %5077 = vmatmul.mubr.msk.bf16.gmra.mrb[28].mxu0 %vm3820_vm7, %v3749_v3  ;;  %5085 = vmatmul.mubr.msk.bf16.gmra.mrb[28].mxu1 %vm3820_vm7, %v3749_v3 }
0x1141   : > { %v3879_v36 = vpop.f32.mrb[0].mxu0  ;;  %v3992_v61 = vpop.f32.mrb[0].mxu1 }
0x1142   : > { %v3880_v42 = vadd.f32 %v3879_v36, %v8311_v5  ;;  %v3993_v56 = vadd.f32 %v3992_v61, %v8313_v41  ;;  %v3881_v50 = vpop.f32.mrb[1].mxu0  ;;  %v3994_v6 = vpop.f32.mrb[1].mxu1 }
0x1143   : > { %v3882_v25 = vadd.f32 %v3881_v50, %v8315_v60  ;;  %v3995_v0 = vadd.f32 %v3994_v6, %v8317_v30  ;;  %v3883_v4 = vpop.f32.mrb[2].mxu0  ;;  %v3996_v54 = vpop.f32.mrb[2].mxu1 }
0x1144   : > { %v3884_v24 = vadd.f32 %v3883_v4, %v8311_v5  ;;  %v3997_v27 = vadd.f32 %v3996_v54, %v8313_v41  ;;  %v3885_v35 = vpop.f32.mrb[3].mxu0  ;;  %v3998_v17 = vpop.f32.mrb[3].mxu1  ;;  %v4071_v15 = vmax.f32 %v3880_v42, 0.0  ;;  %v4073_v19 = vmax.f32 %v3993_v56, 0.0 }
0x1145   : > { %v3886_v37 = vadd.f32 %v3885_v35, %v8315_v60  ;;  %v3999_v9 = vadd.f32 %v3998_v17, %v8317_v30  ;;  %v4072_v59 = vmax.f32 %v3882_v25, 0.0  ;;  %v4074_v43 = vmax.f32 %v3995_v0, 0.0 }
0x1146   : > { %v4075_v8 = vmax.f32 %v3884_v24, 0.0  ;;  %v4077_v12 = vmax.f32 %v3997_v27, 0.0 }
0x1147   : > { %v4076_v18 = vmax.f32 %v3886_v37, 0.0  ;;  %v4078_v52 = vmax.f32 %v3999_v9, 0.0 }
0x1148   : > { %v4135_v45 = vpack.c.bf16 %v4075_v8, %v4071_v15  ;;  %v4137_v53 = vpack.c.bf16 %v4077_v12, %v4073_v19 }
0x1149   : > { %v4136_v13 = vpack.c.bf16 %v4076_v18, %v4072_v59  ;;  %v4138_v21 = vpack.c.bf16 %v4078_v52, %v4074_v43  ;;  %v3889_v7 = vpop.f32.mrb[4].mxu0  ;;  %v4002_v33 = vpop.f32.mrb[4].mxu1 }
0x114a   : > { %v3890_v29 = vadd.f32 %v3889_v7, %v8311_v5  ;;  %v4003_v51 = vadd.f32 %v4002_v33, %v8313_v41  ;;  %v3891_v14 = vpop.f32.mrb[5].mxu0  ;;  %v4004_v2 = vpop.f32.mrb[5].mxu1 }
0x114b   : > { %v3892_v32 = vadd.f32 %v3891_v14, %v8315_v60  ;;  %v4005_v1 = vadd.f32 %v4004_v2, %v8317_v30  ;;  %v3893_v48 = vpop.f32.mrb[6].mxu0  ;;  %v4006_v55 = vpop.f32.mrb[6].mxu1  ;;  %4471 = vmatprep.mubr.bf16.mxu0 %v4136_v13  ;;  %4568 = vmatprep.mubr.bf16.mxu1 %v4138_v21 }
0x114c   : > { %v3894_v20 = vadd.f32 %v3893_v48, %v8311_v5  ;;  %v4007_v23 = vadd.f32 %v4006_v55, %v8313_v41  ;;  %v3895_v63 = vpop.f32.mrb[7].mxu0  ;;  %v4008_v34 = vpop.f32.mrb[7].mxu1  ;;  %4472 = vmatmul.mubr.bf16.vlgmr.msra.gmra.mrb[32].mxu0 %v4135_v45  ;;  %4569 = vmatmul.mubr.bf16.vlgmr.msra.gmra.mrb[32].mxu1 %v4137_v53  ;;  %v4079_v49 = vmax.f32 %v3890_v29, 0.0  ;;  %v4081_v57 = vmax.f32 %v4003_v51, 0.0 }
0x114d   : > { %v3896_v40 = vadd.f32 %v3895_v63, %v8315_v60  ;;  %v4009_v44 = vadd.f32 %v4008_v34, %v8317_v30  ;;  %v4080_v3 = vmax.f32 %v3892_v32, 0.0  ;;  %v4082_v22 = vmax.f32 %v4005_v1, 0.0 }
0x114e   : > { %v4083_v39 = vmax.f32 %v3894_v20, 0.0  ;;  %v4085_v10 = vmax.f32 %v4007_v23, 0.0 }
0x114f   : > { %v4084_v38 = vmax.f32 %v3896_v40, 0.0  ;;  %v4086_v28 = vmax.f32 %v4009_v44, 0.0 }
0x1150   : > { %v4139_v16 = vpack.c.bf16 %v4083_v39, %v4079_v49  ;;  %v4141_v58 = vpack.c.bf16 %v4085_v10, %v4081_v57 }
0x1151   : > { %v4140_v11 = vpack.c.bf16 %v4084_v38, %v4080_v3  ;;  %v4142_v31 = vpack.c.bf16 %v4086_v28, %v4082_v22  ;;  %v3899_v62 = vpop.f32.mrb[8].mxu0  ;;  %v4012_v47 = vpop.f32.mrb[8].mxu1 }
0x1152   : > { %v3900_v46 = vadd.f32 %v3899_v62, %v8311_v5  ;;  %v4013_v26 = vadd.f32 %v4012_v47, %v8313_v41  ;;  %v3901_v36 = vpop.f32.mrb[9].mxu0  ;;  %v4014_v61 = vpop.f32.mrb[9].mxu1 }
0x1153   : > { %v3902_v42 = vadd.f32 %v3901_v36, %v8315_v60  ;;  %v4015_v56 = vadd.f32 %v4014_v61, %v8317_v30  ;;  %v3903_v50 = vpop.f32.mrb[10].mxu0  ;;  %v4016_v6 = vpop.f32.mrb[10].mxu1  ;;  %4479 = vmatprep.mubr.bf16.mxu0 %v4140_v11  ;;  %4576 = vmatprep.mubr.bf16.mxu1 %v4142_v31 }
0x1154   : > { %v3904_v25 = vadd.f32 %v3903_v50, %v8311_v5  ;;  %v4017_v0 = vadd.f32 %v4016_v6, %v8313_v41  ;;  %v3905_v4 = vpop.f32.mrb[11].mxu0  ;;  %v4018_v54 = vpop.f32.mrb[11].mxu1  ;;  %4480 = vmatmul.mubr.bf16.gmra.mrb[36].mxu0 %v4139_v16  ;;  %4577 = vmatmul.mubr.bf16.gmra.mrb[36].mxu1 %v4141_v58  ;;  %v4087_v35 = vmax.f32 %v3900_v46, 0.0  ;;  %v4089_v17 = vmax.f32 %v4013_v26, 0.0 }
0x1155   : > { %v3906_v24 = vadd.f32 %v3905_v4, %v8315_v60  ;;  %v4019_v27 = vadd.f32 %v4018_v54, %v8317_v30  ;;  %v4088_v15 = vmax.f32 %v3902_v42, 0.0  ;;  %v4090_v19 = vmax.f32 %v4015_v56, 0.0 }
0x1156   : > { %v4091_v37 = vmax.f32 %v3904_v25, 0.0  ;;  %v4093_v9 = vmax.f32 %v4017_v0, 0.0 }
0x1157   : > { %v4092_v8 = vmax.f32 %v3906_v24, 0.0  ;;  %v4094_v12 = vmax.f32 %v4019_v27, 0.0 }
0x1158   : > { %v4143_v59 = vpack.c.bf16 %v4091_v37, %v4087_v35  ;;  %v4145_v43 = vpack.c.bf16 %v4093_v9, %v4089_v17 }
0x1159   : > { %v4144_v18 = vpack.c.bf16 %v4092_v8, %v4088_v15  ;;  %v4146_v52 = vpack.c.bf16 %v4094_v12, %v4090_v19  ;;  %v3909_v45 = vpop.f32.mrb[12].mxu0  ;;  %v4022_v53 = vpop.f32.mrb[12].mxu1 }
0x115a   : > { %v3910_v13 = vadd.f32 %v3909_v45, %v8311_v5  ;;  %v4023_v21 = vadd.f32 %v4022_v53, %v8313_v41  ;;  %v3911_v7 = vpop.f32.mrb[13].mxu0  ;;  %v4024_v33 = vpop.f32.mrb[13].mxu1 }
0x115b   : > { %v3912_v29 = vadd.f32 %v3911_v7, %v8315_v60  ;;  %v4025_v51 = vadd.f32 %v4024_v33, %v8317_v30  ;;  %v3913_v14 = vpop.f32.mrb[14].mxu0  ;;  %v4026_v2 = vpop.f32.mrb[14].mxu1  ;;  %4487 = vmatprep.mubr.bf16.mxu0 %v4144_v18  ;;  %4584 = vmatprep.mubr.bf16.mxu1 %v4146_v52 }
0x115c   : > { %v3914_v32 = vadd.f32 %v3913_v14, %v8311_v5  ;;  %v4027_v1 = vadd.f32 %v4026_v2, %v8313_v41  ;;  %v3915_v48 = vpop.f32.mrb[15].mxu0  ;;  %v4028_v55 = vpop.f32.mrb[15].mxu1  ;;  %4488 = vmatmul.mubr.bf16.gmra.mrb[40].mxu0 %v4143_v59  ;;  %4585 = vmatmul.mubr.bf16.gmra.mrb[40].mxu1 %v4145_v43  ;;  %v4095_v63 = vmax.f32 %v3910_v13, 0.0  ;;  %v4097_v34 = vmax.f32 %v4023_v21, 0.0 }
0x115d   : > { %v3916_v20 = vadd.f32 %v3915_v48, %v8315_v60  ;;  %v4029_v23 = vadd.f32 %v4028_v55, %v8317_v30  ;;  %v4096_v49 = vmax.f32 %v3912_v29, 0.0  ;;  %v4098_v57 = vmax.f32 %v4025_v51, 0.0 }
0x115e   : > { %v4099_v40 = vmax.f32 %v3914_v32, 0.0  ;;  %v4101_v44 = vmax.f32 %v4027_v1, 0.0 }
0x115f   : > { %v4100_v39 = vmax.f32 %v3916_v20, 0.0  ;;  %v4102_v10 = vmax.f32 %v4029_v23, 0.0 }
0x1160   : > { %v4147_v3 = vpack.c.bf16 %v4099_v40, %v4095_v63  ;;  %v4149_v22 = vpack.c.bf16 %v4101_v44, %v4097_v34 }
0x1161   : > { %v4148_v38 = vpack.c.bf16 %v4100_v39, %v4096_v49  ;;  %v4150_v28 = vpack.c.bf16 %v4102_v10, %v4098_v57  ;;  %v3919_v16 = vpop.f32.mrb[16].mxu0  ;;  %v4032_v58 = vpop.f32.mrb[16].mxu1 }
0x1162   : > { %v3920_v11 = vadd.f32 %v3919_v16, %v8311_v5  ;;  %v4033_v31 = vadd.f32 %v4032_v58, %v8313_v41  ;;  %v3921_v62 = vpop.f32.mrb[17].mxu0  ;;  %v4034_v47 = vpop.f32.mrb[17].mxu1 }
0x1163   : > { %v3922_v46 = vadd.f32 %v3921_v62, %v8315_v60  ;;  %v4035_v26 = vadd.f32 %v4034_v47, %v8317_v30  ;;  %v3923_v36 = vpop.f32.mrb[18].mxu0  ;;  %v4036_v61 = vpop.f32.mrb[18].mxu1  ;;  %4495 = vmatprep.mubr.bf16.mxu0 %v4148_v38  ;;  %4592 = vmatprep.mubr.bf16.mxu1 %v4150_v28 }
0x1164   : > { %v3924_v42 = vadd.f32 %v3923_v36, %v8311_v5  ;;  %v4037_v56 = vadd.f32 %v4036_v61, %v8313_v41  ;;  %v3925_v50 = vpop.f32.mrb[19].mxu0  ;;  %v4038_v6 = vpop.f32.mrb[19].mxu1  ;;  %4496 = vmatmul.mubr.bf16.gmra.mrb[44].mxu0 %v4147_v3  ;;  %4593 = vmatmul.mubr.bf16.gmra.mrb[44].mxu1 %v4149_v22  ;;  %v4103_v4 = vmax.f32 %v3920_v11, 0.0  ;;  %v4105_v54 = vmax.f32 %v4033_v31, 0.0 }
0x1165   : > { %v3926_v25 = vadd.f32 %v3925_v50, %v8315_v60  ;;  %v4039_v0 = vadd.f32 %v4038_v6, %v8317_v30  ;;  %v4104_v35 = vmax.f32 %v3922_v46, 0.0  ;;  %v4106_v17 = vmax.f32 %v4035_v26, 0.0 }
0x1166   : > { %v4107_v24 = vmax.f32 %v3924_v42, 0.0  ;;  %v4109_v27 = vmax.f32 %v4037_v56, 0.0 }
0x1167   : > { %v4108_v37 = vmax.f32 %v3926_v25, 0.0  ;;  %v4110_v9 = vmax.f32 %v4039_v0, 0.0 }
0x1168   : > { %v4151_v15 = vpack.c.bf16 %v4107_v24, %v4103_v4  ;;  %v4153_v19 = vpack.c.bf16 %v4109_v27, %v4105_v54 }
0x1169   : > { %v4152_v8 = vpack.c.bf16 %v4108_v37, %v4104_v35  ;;  %v4154_v12 = vpack.c.bf16 %v4110_v9, %v4106_v17  ;;  %v3929_v59 = vpop.f32.mrb[20].mxu0  ;;  %v4042_v43 = vpop.f32.mrb[20].mxu1 }
0x116a   : > { %v3930_v18 = vadd.f32 %v3929_v59, %v8311_v5  ;;  %v4043_v52 = vadd.f32 %v4042_v43, %v8313_v41  ;;  %v3931_v45 = vpop.f32.mrb[21].mxu0  ;;  %v4044_v53 = vpop.f32.mrb[21].mxu1 }
0x116b   : > { %v3932_v13 = vadd.f32 %v3931_v45, %v8315_v60  ;;  %v4045_v21 = vadd.f32 %v4044_v53, %v8317_v30  ;;  %v3933_v7 = vpop.f32.mrb[22].mxu0  ;;  %v4046_v33 = vpop.f32.mrb[22].mxu1  ;;  %4503 = vmatprep.mubr.bf16.mxu0 %v4152_v8  ;;  %4600 = vmatprep.mubr.bf16.mxu1 %v4154_v12 }
0x116c   : > { %v3934_v29 = vadd.f32 %v3933_v7, %v8311_v5  ;;  %v4047_v51 = vadd.f32 %v4046_v33, %v8313_v41  ;;  %v3935_v14 = vpop.f32.mrb[23].mxu0  ;;  %v4048_v2 = vpop.f32.mrb[23].mxu1  ;;  %4504 = vmatmul.mubr.bf16.gmra.mrb[48].mxu0 %v4151_v15  ;;  %4601 = vmatmul.mubr.bf16.gmra.mrb[48].mxu1 %v4153_v19  ;;  %v4111_v48 = vmax.f32 %v3930_v18, 0.0  ;;  %v4113_v55 = vmax.f32 %v4043_v52, 0.0 }
0x116d   : > { %v3936_v32 = vadd.f32 %v3935_v14, %v8315_v60  ;;  %v4049_v1 = vadd.f32 %v4048_v2, %v8317_v30  ;;  %v4112_v63 = vmax.f32 %v3932_v13, 0.0  ;;  %v4114_v34 = vmax.f32 %v4045_v21, 0.0 }
0x116e   : > { %v4115_v20 = vmax.f32 %v3934_v29, 0.0  ;;  %v4117_v23 = vmax.f32 %v4047_v51, 0.0 }
0x116f   : > { %v4116_v40 = vmax.f32 %v3936_v32, 0.0  ;;  %v4118_v44 = vmax.f32 %v4049_v1, 0.0 }
0x1170   : > { %v4155_v49 = vpack.c.bf16 %v4115_v20, %v4111_v48  ;;  %v4157_v57 = vpack.c.bf16 %v4117_v23, %v4113_v55 }
0x1171   : > { %v4156_v39 = vpack.c.bf16 %v4116_v40, %v4112_v63  ;;  %v4158_v10 = vpack.c.bf16 %v4118_v44, %v4114_v34  ;;  %v3939_v3 = vpop.f32.mrb[24].mxu0  ;;  %v4052_v22 = vpop.f32.mrb[24].mxu1 }
0x1172   : > { %v3940_v38 = vadd.f32 %v3939_v3, %v8311_v5  ;;  %v4053_v28 = vadd.f32 %v4052_v22, %v8313_v41  ;;  %v3941_v16 = vpop.f32.mrb[25].mxu0  ;;  %v4054_v58 = vpop.f32.mrb[25].mxu1  ;;  %v4167_v3 = vld [vmem:[#allocation2] sm:$0xff] }
0x1173   : > { %v3942_v11 = vadd.f32 %v3941_v16, %v8315_v60  ;;  %v4055_v31 = vadd.f32 %v4054_v58, %v8317_v30  ;;  %v3943_v62 = vpop.f32.mrb[26].mxu0  ;;  %v4056_v47 = vpop.f32.mrb[26].mxu1  ;;  %4511 = vmatprep.mubr.bf16.mxu0 %v4156_v39  ;;  %4608 = vmatprep.mubr.bf16.mxu1 %v4158_v10 }
0x1174   : > { %v3944_v46 = vadd.f32 %v3943_v62, %v8311_v5  ;;  %v4057_v26 = vadd.f32 %v4056_v47, %v8313_v41  ;;  %v3945_v36 = vpop.f32.mrb[27].mxu0  ;;  %v4058_v61 = vpop.f32.mrb[27].mxu1  ;;  %4512 = vmatmul.mubr.bf16.gmra.mrb[52].mxu0 %v4155_v49  ;;  %4609 = vmatmul.mubr.bf16.gmra.mrb[52].mxu1 %v4157_v57  ;;  %v4119_v50 = vmax.f32 %v3940_v38, 0.0  ;;  %v4121_v6 = vmax.f32 %v4053_v28, 0.0 }
0x1175   : > { %v3946_v42 = vadd.f32 %v3945_v36, %v8315_v60  ;;  %v4059_v56 = vadd.f32 %v4058_v61, %v8317_v30  ;;  %v4120_v4 = vmax.f32 %v3942_v11, 0.0  ;;  %v4122_v54 = vmax.f32 %v4055_v31, 0.0  ;;  %v4168_v11 = vld [vmem:[#allocation2 + $0x8] sm:$0xff] }
0x1176   : > { %v4123_v25 = vmax.f32 %v3944_v46, 0.0  ;;  %v4125_v0 = vmax.f32 %v4057_v26, 0.0 }
0x1177   : > { %v4124_v24 = vmax.f32 %v3946_v42, 0.0  ;;  %v4126_v27 = vmax.f32 %v4059_v56, 0.0 }
0x1178   : > { %v4159_v35 = vpack.c.bf16 %v4123_v25, %v4119_v50  ;;  %v4161_v17 = vpack.c.bf16 %v4125_v0, %v4121_v6  ;;  %v4169_v25 = vld [vmem:[#allocation2 + $0x10] sm:$0xff] }
0x1179   : > { %v4160_v37 = vpack.c.bf16 %v4124_v24, %v4120_v4  ;;  %v4162_v9 = vpack.c.bf16 %v4126_v27, %v4122_v54  ;;  %v3949_v15 = vpop.f32.mrb[28].mxu0  ;;  %v4062_v19 = vpop.f32.mrb[28].mxu1 }
0x117a   : > { %v3950_v8 = vadd.f32 %v3949_v15, %v8311_v5  ;;  %v4063_v12 = vadd.f32 %v4062_v19, %v8313_v41  ;;  %v3951_v59 = vpop.f32.mrb[29].mxu0  ;;  %v4064_v43 = vpop.f32.mrb[29].mxu1 }
0x117b   : > { %v3952_v18 = vadd.f32 %v3951_v59, %v8315_v60  ;;  %v4065_v52 = vadd.f32 %v4064_v43, %v8317_v30  ;;  %v3953_v45 = vpop.f32.mrb[30].mxu0  ;;  %v4066_v53 = vpop.f32.mrb[30].mxu1  ;;  %4519 = vmatprep.mubr.bf16.mxu0 %v4160_v37  ;;  %4616 = vmatprep.mubr.bf16.mxu1 %v4162_v9 }
0x117c   : > { %v3954_v13 = vadd.f32 %v3953_v45, %v8311_v5  ;;  %v4067_v21 = vadd.f32 %v4066_v53, %v8313_v41  ;;  %v3955_v7 = vpop.f32.mrb[31].mxu0  ;;  %v4068_v33 = vpop.f32.mrb[31].mxu1  ;;  %4520 = vmatmul.mubr.bf16.gmra.mrb[56].mxu0 %v4159_v35  ;;  %4617 = vmatmul.mubr.bf16.gmra.mrb[56].mxu1 %v4161_v17  ;;  %v4127_v14 = vmax.f32 %v3950_v8, 0.0  ;;  %v4129_v2 = vmax.f32 %v4063_v12, 0.0  ;;  %v4170_v35 = vld [vmem:[#allocation2 + $0x18] sm:$0xff]  ;;  %v4171_v45 = vld [vmem:[#allocation2 + $0x20] sm:$0xff] }
0x117d   : > { %v3956_v29 = vadd.f32 %v3955_v7, %v8315_v60  ;;  %v4069_v51 = vadd.f32 %v4068_v33, %v8317_v30  ;;  %v4128_v48 = vmax.f32 %v3952_v18, 0.0  ;;  %v4130_v55 = vmax.f32 %v4065_v52, 0.0 }
0x117e   : > { %v4131_v32 = vmax.f32 %v3954_v13, 0.0  ;;  %v4133_v1 = vmax.f32 %v4067_v21, 0.0 }
0x117f   : > { %v4132_v20 = vmax.f32 %v3956_v29, 0.0  ;;  %v4134_v5 = vmax.f32 %v4069_v51, 0.0  ;;  %v4172_v29 = vld [vmem:[#allocation2 + $0x28] sm:$0xff] }
0x1180   : > { %v4163_v23 = vpack.c.bf16 %v4131_v32, %v4127_v14  ;;  %v4165_v41 = vpack.c.bf16 %v4133_v1, %v4129_v2 }
0x1181   : > { %v4164_v63 = vpack.c.bf16 %v4132_v20, %v4128_v48  ;;  %v4166_v34 = vpack.c.bf16 %v4134_v5, %v4130_v55 }
0x1183   : > { %4527 = vmatprep.mubr.bf16.mxu0 %v4164_v63  ;;  %4624 = vmatprep.mubr.bf16.mxu1 %v4166_v34  ;;  %v4173_v63 = vld [vmem:[#allocation2 + $0x30] sm:$0xff] }
0x1184   : > { %4528 = vmatmul.mubr.bf16.gmra.mrb[60].mxu0 %v4163_v23  ;;  %4625 = vmatmul.mubr.bf16.gmra.mrb[60].mxu1 %v4165_v41 }
0x121f   : > { %v5291_v60 = vpop.f32.mrb[32].mxu0  ;;  %v5355_v30 = vpop.f32.mrb[32].mxu1 }
0x1220   : > { %v5292_v40 = vpop.f32.mrb[33].mxu0  ;;  %v5356_v44 = vpop.f32.mrb[33].mxu1 }
0x1221   : > { %v5293_v49 = vadd.f32 %v5292_v40, %v5291_v60  ;;  %v5357_v57 = vadd.f32 %v5356_v44, %v5355_v30  ;;  %v5294_v39 = vpop.f32.mrb[34].mxu0  ;;  %v5358_v10 = vpop.f32.mrb[34].mxu1 }
0x1222   : > { %v5295_v22 = vpop.f32.mrb[35].mxu0  ;;  %v5359_v38 = vpop.f32.mrb[35].mxu1 }
0x1223   : > { %v4571_v28 = vadd.f32 %v5357_v57, %v5293_v49  ;;  %v5296_v16 = vadd.f32 %v5295_v22, %v5294_v39  ;;  %v5360_v58 = vadd.f32 %v5359_v38, %v5358_v10  ;;  %v4174_v49 = vld [vmem:[#allocation2 + $0x38] sm:$0xff] }
0x1225   : > { %v4633_v31 = vadd.f32 %v4571_v28, %v4167_v3  ;;  %v4574_v62 = vadd.f32 %v5360_v58, %v5296_v16 }
0x1227   : > { %4649 = vst.msk [vmem:[#allocation2] sm:$0xff] %vm3820_vm7, %v4633_v31  ;;  %v4634_v47 = vadd.f32 %v4574_v62, %v4168_v11  ;;  %v5297_v46 = vpop.f32.mrb[36].mxu0  ;;  %v5361_v26 = vpop.f32.mrb[36].mxu1  ;;  %v4175_v62 = vld [vmem:[#allocation2 + $0x40] sm:$0xff] }
0x1228   : > { %v5298_v36 = vpop.f32.mrb[37].mxu0  ;;  %v5362_v61 = vpop.f32.mrb[37].mxu1 }
0x1229   : > { %4650 = vst.msk [vmem:[#allocation2 + $0x8] sm:$0xff] %vm3820_vm7, %v4634_v47  ;;  %v5299_v42 = vadd.f32 %v5298_v36, %v5297_v46  ;;  %v5363_v56 = vadd.f32 %v5362_v61, %v5361_v26  ;;  %v5300_v50 = vpop.f32.mrb[38].mxu0  ;;  %v5364_v6 = vpop.f32.mrb[38].mxu1 }
0x122a   : > { %v5301_v0 = vpop.f32.mrb[39].mxu0  ;;  %v5365_v4 = vpop.f32.mrb[39].mxu1 }
0x122b   : > { %v4579_v54 = vadd.f32 %v5363_v56, %v5299_v42  ;;  %v5302_v24 = vadd.f32 %v5301_v0, %v5300_v50  ;;  %v5366_v27 = vadd.f32 %v5365_v4, %v5364_v6  ;;  %v4176_v42 = vld [vmem:[#allocation2 + $0x48] sm:$0xff] }
0x122d   : > { %v4635_v17 = vadd.f32 %v4579_v54, %v4169_v25  ;;  %v4582_v37 = vadd.f32 %v5366_v27, %v5302_v24 }
0x122f   : > { %4651 = vst.msk [vmem:[#allocation2 + $0x10] sm:$0xff] %vm3820_vm7, %v4635_v17  ;;  %v4636_v9 = vadd.f32 %v4582_v37, %v4170_v35  ;;  %v5303_v15 = vpop.f32.mrb[40].mxu0  ;;  %v5367_v19 = vpop.f32.mrb[40].mxu1  ;;  %v4177_v37 = vld [vmem:[#allocation2 + $0x50] sm:$0xff] }
0x1230   : > { %v5304_v8 = vpop.f32.mrb[41].mxu0  ;;  %v5368_v12 = vpop.f32.mrb[41].mxu1 }
0x1231   : > { %4652 = vst.msk [vmem:[#allocation2 + $0x18] sm:$0xff] %vm3820_vm7, %v4636_v9  ;;  %v5305_v59 = vadd.f32 %v5304_v8, %v5303_v15  ;;  %v5369_v43 = vadd.f32 %v5368_v12, %v5367_v19  ;;  %v5306_v18 = vpop.f32.mrb[42].mxu0  ;;  %v5370_v52 = vpop.f32.mrb[42].mxu1 }
0x1232   : > { %v5307_v53 = vpop.f32.mrb[43].mxu0  ;;  %v5371_v13 = vpop.f32.mrb[43].mxu1 }
0x1233   : > { %v4587_v21 = vadd.f32 %v5369_v43, %v5305_v59  ;;  %v5308_v7 = vadd.f32 %v5307_v53, %v5306_v18  ;;  %v5372_v33 = vadd.f32 %v5371_v13, %v5370_v52  ;;  %v4178_v59 = vld [vmem:[#allocation2 + $0x58] sm:$0xff] }
0x1235   : > { %v4637_v51 = vadd.f32 %v4587_v21, %v4171_v45  ;;  %v4590_v14 = vadd.f32 %v5372_v33, %v5308_v7 }
0x1237   : > { %4653 = vst.msk [vmem:[#allocation2 + $0x20] sm:$0xff] %vm3820_vm7, %v4637_v51  ;;  %v4638_v2 = vadd.f32 %v4590_v14, %v4172_v29  ;;  %v5309_v32 = vpop.f32.mrb[44].mxu0  ;;  %v5373_v1 = vpop.f32.mrb[44].mxu1  ;;  %v4179_v14 = vld [vmem:[#allocation2 + $0x60] sm:$0xff] }
0x1238   : > { %v5310_v48 = vpop.f32.mrb[45].mxu0  ;;  %v5374_v55 = vpop.f32.mrb[45].mxu1 }
0x1239   : > { %4654 = vst.msk [vmem:[#allocation2 + $0x28] sm:$0xff] %vm3820_vm7, %v4638_v2  ;;  %v5311_v20 = vadd.f32 %v5310_v48, %v5309_v32  ;;  %v5375_v5 = vadd.f32 %v5374_v55, %v5373_v1  ;;  %v5312_v23 = vpop.f32.mrb[46].mxu0  ;;  %v5376_v41 = vpop.f32.mrb[46].mxu1 }
0x123a   : > { %v5313_v34 = vpop.f32.mrb[47].mxu0  ;;  %v5377_v60 = vpop.f32.mrb[47].mxu1 }
0x123b   : > { %v4595_v30 = vadd.f32 %v5375_v5, %v5311_v20  ;;  %v5314_v40 = vadd.f32 %v5313_v34, %v5312_v23  ;;  %v5378_v44 = vadd.f32 %v5377_v60, %v5376_v41  ;;  %v4180_v20 = vld [vmem:[#allocation2 + $0x68] sm:$0xff] }
0x123d   : > { %v4639_v57 = vadd.f32 %v4595_v30, %v4173_v63  ;;  %v4598_v39 = vadd.f32 %v5378_v44, %v5314_v40 }
0x123f   : > { %4655 = vst.msk [vmem:[#allocation2 + $0x30] sm:$0xff] %vm3820_vm7, %v4639_v57  ;;  %v4640_v10 = vadd.f32 %v4598_v39, %v4174_v49  ;;  %v5315_v3 = vpop.f32.mrb[48].mxu0  ;;  %v5379_v22 = vpop.f32.mrb[48].mxu1  ;;  %v4181_v39 = vld [vmem:[#allocation2 + $0x70] sm:$0xff] }
0x1240   : > { %v5316_v38 = vpop.f32.mrb[49].mxu0  ;;  %v5380_v28 = vpop.f32.mrb[49].mxu1 }
0x1241   : > { %4656 = vst.msk [vmem:[#allocation2 + $0x38] sm:$0xff] %vm3820_vm7, %v4640_v10  ;;  %v5317_v16 = vadd.f32 %v5316_v38, %v5315_v3  ;;  %v5381_v58 = vadd.f32 %v5380_v28, %v5379_v22  ;;  %v5318_v11 = vpop.f32.mrb[50].mxu0  ;;  %v5382_v31 = vpop.f32.mrb[50].mxu1 }
0x1242   : > { %v5319_v47 = vpop.f32.mrb[51].mxu0  ;;  %v5383_v46 = vpop.f32.mrb[51].mxu1 }
0x1243   : > { %v4603_v26 = vadd.f32 %v5381_v58, %v5317_v16  ;;  %v5320_v36 = vadd.f32 %v5319_v47, %v5318_v11  ;;  %v5384_v61 = vadd.f32 %v5383_v46, %v5382_v31  ;;  %v4182_v16 = vld [vmem:[#allocation2 + $0x78] sm:$0xff] }
0x1245   : > { %v4641_v56 = vadd.f32 %v4603_v26, %v4175_v62  ;;  %v4606_v50 = vadd.f32 %v5384_v61, %v5320_v36  ;;  %v4671_v62 = vld [vmem:[#allocation2] sm:$0xff] (!%p8385_p0) }
0x1246   : > { %v4675_v47 = vsel (!%p8385_p0), %vm4674_vm8, %v4671_v62, 0.0 }
0x1247   : > { %4657 = vst.msk [vmem:[#allocation2 + $0x40] sm:$0xff] %vm3820_vm7, %v4641_v56  ;;  %v4642_v6 = vadd.f32 %v4606_v50, %v4176_v42  ;;  %v5321_v25 = vpop.f32.mrb[52].mxu0  ;;  %v5385_v0 = vpop.f32.mrb[52].mxu1  ;;  %4676 = vadd.xlane.f32.xlu0 (!%p8385_p0), %v4675_v47  ;;  %v6263_v56 = vld [vmem:[%s8607_s13] sm:$0xff] (!%p8385_p0)   ;;  %v6411_v50 = vmov (!%p8385_p0), 0.0  }
0x1248   : > { %v5322_v4 = vpop.f32.mrb[53].mxu0  ;;  %v5386_v54 = vpop.f32.mrb[53].mxu1  ;;  %5702 = vmatprep.subr.bf16.mxu0 (!%p8385_p0), %v6411_v50  ;;  %5706 = vmatprep.mubr.msk.bf16.mxu0 (!%p8385_p0), %vm6412_vm9, %v6411_v50 }
0x1249   : > { %4658 = vst.msk [vmem:[#allocation2 + $0x48] sm:$0xff] %vm3820_vm7, %v4642_v6  ;;  %v5323_v24 = vadd.f32 %v5322_v4, %v5321_v25  ;;  %v5387_v27 = vadd.f32 %v5386_v54, %v5385_v0  ;;  %v5324_v35 = vpop.f32.mrb[54].mxu0  ;;  %v5388_v17 = vpop.f32.mrb[54].mxu1  ;;  %5703 = vmatpush3.bf16.msra.mxu0 (!%p8385_p0), %v6263_v56  ;;  %v6264_v6 = vld [vmem:[%s8607_s13 + $0x8] sm:$0xff] (!%p8385_p0)  }
0x124a   : > { %v5325_v9 = vpop.f32.mrb[55].mxu0  ;;  %v5389_v15 = vpop.f32.mrb[55].mxu1  ;;  %5704 = vmatprep.subr.bf16.mxu0 (!%p8385_p0), %v6411_v50 }
0x124b   : > { %v4611_v19 = vadd.f32 %v5387_v27, %v5323_v24  ;;  %v5326_v8 = vadd.f32 %v5325_v9, %v5324_v35  ;;  %v5390_v12 = vadd.f32 %v5389_v15, %v5388_v17  ;;  %v4672_v24 = vld [vmem:[%s8608_s10] sm:$0x1] (!%p8385_p0) }
0x124c   : > { %v4673_v35 = vld [vmem:[%s8609_s12] sm:$0x1] (!%p8385_p0) }
0x124d   : > { %v4643_v43 = vadd.f32 %v4611_v19, %v4177_v37  ;;  %v4614_v18 = vadd.f32 %v5390_v12, %v5326_v8  ;;  %5705 = vmatpush3.bf16.msra.mxu0 (!%p8385_p0), %v6264_v6  ;;  %v4696_v15 = vld [vmem:[%s8610_s21] sm:$0x1] (!%p8385_p0) }
0x124f   : > { %4659 = vst.msk [vmem:[#allocation2 + $0x50] sm:$0xff] %vm3820_vm7, %v4643_v43  ;;  %v4644_v52 = vadd.f32 %v4614_v18, %v4178_v59  ;;  %v5327_v45 = vpop.f32.mrb[56].mxu0  ;;  %v5391_v53 = vpop.f32.mrb[56].mxu1 }
0x1250   : > { %v5328_v13 = vpop.f32.mrb[57].mxu0  ;;  %v5392_v21 = vpop.f32.mrb[57].mxu1 }
0x1251   : > { %4660 = vst.msk [vmem:[#allocation2 + $0x58] sm:$0xff] %vm3820_vm7, %v4644_v52  ;;  %v5329_v7 = vadd.f32 %v5328_v13, %v5327_v45  ;;  %v5393_v33 = vadd.f32 %v5392_v21, %v5391_v53  ;;  %v5330_v29 = vpop.f32.mrb[58].mxu0  ;;  %v5394_v51 = vpop.f32.mrb[58].mxu1 }
0x1252   : > { %v5331_v2 = vpop.f32.mrb[59].mxu0  ;;  %v5395_v32 = vpop.f32.mrb[59].mxu1 }
0x1253   : > { %v4619_v1 = vadd.f32 %v5393_v33, %v5329_v7  ;;  %v5332_v48 = vadd.f32 %v5331_v2, %v5330_v29  ;;  %v5396_v55 = vadd.f32 %v5395_v32, %v5394_v51 }
0x1255   : > { %v4645_v5 = vadd.f32 %v4619_v1, %v4179_v14  ;;  %v4622_v23 = vadd.f32 %v5396_v55, %v5332_v48 }
0x1257   : > { %4661 = vst.msk [vmem:[#allocation2 + $0x60] sm:$0xff] %vm3820_vm7, %v4645_v5  ;;  %v4646_v41 = vadd.f32 %v4622_v23, %v4180_v20  ;;  %v5333_v63 = vpop.f32.mrb[60].mxu0  ;;  %v5397_v34 = vpop.f32.mrb[60].mxu1 }
0x1258   : > { %v5334_v60 = vpop.f32.mrb[61].mxu0  ;;  %v5398_v30 = vpop.f32.mrb[61].mxu1 }
0x1259   : > { %4662 = vst.msk [vmem:[#allocation2 + $0x68] sm:$0xff] %vm3820_vm7, %v4646_v41  ;;  %v5335_v40 = vadd.f32 %v5334_v60, %v5333_v63  ;;  %v5399_v44 = vadd.f32 %v5398_v30, %v5397_v34  ;;  %v5336_v49 = vpop.f32.mrb[62].mxu0  ;;  %v5400_v57 = vpop.f32.mrb[62].mxu1 }
0x125a   : > { %v5337_v10 = vpop.f32.mrb[63].mxu0  ;;  %v5401_v3 = vpop.f32.mrb[63].mxu1 }
0x125b   : > { %v4627_v22 = vadd.f32 %v5399_v44, %v5335_v40  ;;  %v5338_v38 = vadd.f32 %v5337_v10, %v5336_v49  ;;  %v5402_v28 = vadd.f32 %v5401_v3, %v5400_v57  ;;  %4670 = sbr.rel (%p8385_p0) target bundleno = 5208 (0x1458), region = 123 }
0x125d   : > { %v4647_v58 = vadd.f32 %v4627_v22, %v4181_v39  ;;  %v4630_v11 = vadd.f32 %v5402_v28, %v5338_v38 }
0x125f   : > { %4663 = vst.msk [vmem:[#allocation2 + $0x70] sm:$0xff] %vm3820_vm7, %v4647_v58  ;;  %v4648_v31 = vadd.f32 %v4630_v11, %v4182_v16 }
0x1261   : > { %4664 = vst.msk [vmem:[#allocation2 + $0x78] sm:$0xff] %vm3820_vm7, %v4648_v31 }
0x12d4   : > { %v4677_v46 = vpop.xlane.xlu0 %4676 }
0x12d5   : > { %v4679_v26 = vmul.f32 0.03125, %v4677_v46 }
0x12d7   : > { %v4680_v36 = vsub.f32 %v4671_v62, %v4679_v26 }
0x12d9   : > { %v4681_v61 = vmul.f32 %v4680_v36, %v4680_v36 }
0x12db   : > { %v4682_v42 = vsel %vm4674_vm8, %v4681_v61, 0.0 }
0x12dc   : > { %4683 = vadd.xlane.f32.xlu0 %v4682_v42 }
0x1369   : > { %v4684_v25 = vpop.xlane.xlu0 %4683 }
0x136a   : > { %v4685_v0 = vmul.f32 0.03125, %v4684_v25 }
0x136c   : > { %v4686_v4 = vadd.f32 1e-05, %v4685_v0 }
0x136e   : > { %6265 = vrsqrt.f32 %v4686_v4 }
0x1378   : > { %v6266_v54 = vpop.eup %6265 }
0x1379   : > { %v4688_v27 = vmul.f32 %v6266_v54, %v4680_v36 }
0x137b   : > { %v4689_v17 = vmul.f32 %v4688_v27, %v4672_v24 }
0x137d   : > { %v4690_v37 = vadd.f32 %v4689_v17, %v4673_v35 }
0x137f   : > { %v4691_v9 = vpack.c.bf16 %v4690_v37, %v4690_v37 }
0x1381   : > { %5707 = vmatmul.mubr.msk.bf16.vlgmr.msra.gmra.mrb[0].mxu0 %vm3820_vm7, %v4691_v9 }
0x1454   : > { %v4746_v19 = vpop.f32.mrb[0].mxu0 }
0x1455   : > { %v4747_v8 = vadd.f32 %v4746_v19, %v4696_v15  ;;  %v5708_v12 = vpop.f32.mrb[1].mxu0 }
0x1456   : > { %v4749_v59 = vpop.f32.mrb[2].mxu0 }
0x1457   : > { %4753 = vst.msk [vmem:[%s6693_s1] sm:$0x1] %vm4752_vm10, %v4747_v8  ;;  %v5709_v43 = vpop.f32.mrb[3].mxu0 }
0x1458 PF: > { %s8611_s27 = sld [smem:[#allocation12_spill]]  ;;  %s8613_s19 = sld [smem:[#allocation42_spill]] }
0x1459   : > { %s4767_s6 = sshll.u32 %s6693_s1, 4  ;;  %s8615_s3 = sand.u32 1, %s6353_s25   ;;  %s4768_s6 = int_to_ptr.vmem [resolvable:$true] %s4767_s6 }
0x145a   : > { %s4755_s9 = scalar_lea.sflag [#allocation7], %s8615_s3  ;;  %s6267_s26 = scalar_lea.vmem %s4768_s6, 16 }
0x145b   : > { %p6268_p1 = scmp.ne.s32.totalorder %s4768_s6, %s6267_s26  ;;  %s6413_s30 = smov [#allocation6]  }
0x145c   : > { %s6271_s29 = sshll.u32 %s6413_s30, 4  ;;  %s6272_s29 = int_to_ptr.vmem [resolvable:$false] %s6271_s29 }
0x145d   : > { %p6269_p2 = pnand %p6268_p1, %p6590_p9  ;;  %s6273_s0 = scalar_lea.vmem %s6272_s29, 32 }
0x145e   : > { %s5121_s16 = sshll.u32 %s8611_s27, 4  ;;  %s8614_s8 = smov %s8613_s19 }
0x145f   : > { %s8428_s11 = scalar_lea.hbm %s8613_s19, %s5121_s16  ;;  %p6270_p3 = pneg %p6269_p2 }
0x1460   : > { %p6274_p4 = scmp.lt.s32.totalorder %s4768_s6, %s6272_s29  ;;  %p6275_p5 = scmp.lt.s32.totalorder %s6273_s0, %s6267_s26 }
0x1462   : > { %p6276_p6 = por %p6275_p5, %p6274_p4 }
0x1464   : > { %p6277_p7 = pnand %p6276_p6, %p6270_p3 }
0x1466   : > { %6280 = shalt.err (!%p6277_p7)
}
0x1467   : > { %s6281_s1 = scalar_lea.hbm %s8428_s11, 16  ;;  %s6285_s28 = scalar_lea.hbm %s8614_s8, 32 }
0x1468   : > { %p6282_p8 = scmp.ne.s32.totalorder %s8428_s11, %s6281_s1  ;;  %p6286_p12 = scmp.lt.u32.totalorder %s8428_s11, %s8614_s8 }
0x1469   : > { %p6287_p0 = scmp.lt.u32.totalorder %s6285_s28, %s6281_s1  ;;  %p6289_p2 = scmp.lt.u32.totalorder %s6281_s1, %s8428_s11 }
0x146a   : > { %p6283_p10 = pnand %p6282_p8, %p6590_p9 }
0x146b   : > { %p6288_p1 = por %p6287_p0, %p6286_p12 }
0x146c   : > { %p6284_p11 = pneg %p6283_p10 }
0x146d   : > { %p6290_p3 = por %p6289_p2, %p6288_p1 }
0x146f   : > { %p6291_p4 = pnand %p6290_p3, %p6284_p11 }
0x1471   : > { %6294 = shalt.err (!%p6291_p4)
}
0x1472   : > { %5758 = dma.vmem_to_hbm [thread:$0]  (%p6590_p9), %s4768_s6, 16, %s8428_s11, %s4755_s9  }
0x1473 PF: > { %s8616_s17 = sld [smem:[#allocation16_spill]]  ;;  %s8617_s15 = sld [smem:[#allocation9_spill]] }
0x1479   : > { %p5764_p5 = scmp.ge.s32.totalorder %s8616_s17, 2  ;;  %s4779_s14 = sand.u32 1, %s8617_s15  }
0x147a   : > { %s4780_s22 = scalar_lea.sflag [#allocation7], %s4779_s14 }
0x147b   : > { %p5761_p6 = pnand %p5764_p5, %p6606_p13 }
0x147d   : > { %6344 = dma.done.wait (!%p5761_p6), %s4780_s22, 16  }
0x147e   : > { %6346 = vsyncadd (!%p5761_p6), %s4780_s22, 4294967280  ;;  %s30_s20 = sadd.s32 1, %s8616_s17   ;;  %s8619_s21 = sld [smem:[#allocation10_spill]] }
0x147f   : > { %p27_p7 = scmp.ge.s32.totalorder %s30_s20, 18   ;;  %s8620_s26 = sld [smem:[#allocation22_spill]] }
0x1480   : > { %s8621_s27 = sld [smem:[#allocation11_spill]]  ;;  %s8622_s28 = sld [smem:[#allocation21_spill]] }
0x1481   : > { %s8623_s29 = sld [smem:[#allocation13_spill]]  ;;  %s8624_s0 = sld [smem:[#allocation14_spill]] }
0x1482   : > { %s8625_s30 = sld [smem:[#allocation15_spill]]  ;;  %s8626_s18 = sld [smem:[#allocation17_spill]] }
0x1483   : > { %s8627_s19 = sld [smem:[#allocation18_spill]]  ;;  %s8628_s1 = sld [smem:[#allocation20_spill]] }
0x1484   : > { %s8629_s24 = smov %s6353_s25  ;;  %s8630_s25 = smov %s8619_s21 }
0x1485   :  { %29 = sbr.rel (!%p27_p7) target bundleno = 24 (0x18), region = 199 }
0x148c   :  { %4784 = vsyncpa [#allocation7], 1 }
0x148d   :  { %4786 = vsyncpa [#allocation7 + $0x1], 1 }

</bundles_post_ra>
